<compile_context>
chip_gen: v7x
topology: tpu7x:2x2x1
jax: 0.10.0
libtpu: 0.0.40
codegen_flags: <defaults>
</compile_context>

<pallas_src>
import functools

import jax
import jax.numpy as jnp
from jax.experimental import pallas as pl
from jax.experimental.pallas import tpu as pltpu

_EPS = 1e-5  # nn.LayerNorm default eps


def _detect_vmem_bytes():
    """Per-core VMEM capacity; conservative 64 MiB fallback if the query is unavailable."""
    try:
        info = pltpu.get_tpu_info()
        for attr in ("vmem_capacity_bytes", "vmem_bytes", "vmem_size_bytes"):
            v = getattr(info, attr, None)
            if v:
                return int(v)
    except Exception:
        pass
    return 64 * 1024 * 1024


_VMEM_BYTES = _detect_vmem_bytes()
_SMALL_VMEM = _VMEM_BYTES <= 80 * 1024 * 1024          # v7x-class parts (64 MiB / TC)
_VMEM_LIMIT = (40 if _SMALL_VMEM else 96) * 1024 * 1024
_ROW_TARGET = 256 if _SMALL_VMEM else 512              # mem-bound tiling: 512 rows ~85% roofline


def _cp(*sem):
    return pltpu.CompilerParams(dimension_semantics=sem, vmem_limit_bytes=_VMEM_LIMIT)


def _row_tile(m, target=None):
    """Row (M) tile: cap at target, and when the whole problem would be one grid step,
    split it in two (16-row aligned) so both v7x TensorCores get work."""
    target = _ROW_TARGET if target is None else target
    if m > target:
        return target
    half = -(-m // 2)
    half = -(-half // 16) * 16
    if 0 < half < m:
        return half
    return m


def _pick_div(dim, candidates=(512, 256, 128)):
    """Largest candidate tile that divides `dim`; otherwise the full dim (no tiling)."""
    for c in candidates:
        if dim % c == 0:
            return c
    return dim


def _largest_divisor_leq(n, target):
    d = max(1, min(n, target))
    while n % d != 0:
        d -= 1
    return d


def _layernorm_f32(x, g, b):
    mu = jnp.mean(x, axis=-1, keepdims=True)
    xc = x - mu
    var = jnp.mean(xc * xc, axis=-1, keepdims=True)
    return xc * jax.lax.rsqrt(var + _EPS) * g + b


# ----------------------------------------------------------------------------
# Pallas kernels
# ----------------------------------------------------------------------------
def _linear_kernel(x_ref, w_ref, b_ref, o_ref, acc_ref):
    """Tiled matmul with f32 VMEM accumulator over the K grid axis (bf16 operands)."""
    @pl.when(pl.program_id(2) == 0)
    def _():
        acc_ref[...] = jnp.zeros_like(acc_ref)

    acc_ref[...] += jnp.dot(x_ref[...].astype(jnp.bfloat16), w_ref[...],
                            preferred_element_type=jnp.float32)

    @pl.when(pl.program_id(2) == pl.num_programs(2) - 1)
    def _():
        o_ref[...] = (acc_ref[...] + b_ref[...]).astype(o_ref.dtype)


def linear(x, w, b, out_dtype=jnp.bfloat16):
    """x: (M, K) bf16, w: (K, N) bf16, b: (N,) f32 -> (M, N) out_dtype."""
    M, K = x.shape
    _, N = w.shape
    tm = _row_tile(M)
    tn = _pick_div(N)
    tk = _pick_div(K)
    grid = (pl.cdiv(M, tm), N // tn, K // tk)
    return pl.pallas_call(
        _linear_kernel,
        out_shape=jax.ShapeDtypeStruct((M, N), out_dtype),
        grid=grid,
        in_specs=[
            pl.BlockSpec((tm, tk), lambda i, j, k: (i, k)),
            pl.BlockSpec((tk, tn), lambda i, j, k: (k, j)),
            pl.BlockSpec((1, tn), lambda i, j, k: (0, j)),
        ],
        out_specs=pl.BlockSpec((tm, tn), lambda i, j, k: (i, j)),
        scratch_shapes=[pltpu.VMEM((tm, tn), jnp.float32)],
        compiler_params=_cp("parallel", "parallel", "arbitrary"),
    )(x, w, b.reshape(1, N))


def _ln_qkv_kernel(x_ref, g_ref, b_ref, w_ref, bias_ref, q_ref, k_ref, v_ref, *, d):
    """LayerNorm + single fused (D, 3D) QKV matmul; lane-sliced into three outputs."""
    xn = _layernorm_f32(x_ref[...].astype(jnp.float32), g_ref[...], b_ref[...])
    y = jnp.dot(xn.astype(jnp.bfloat16), w_ref[...],
                preferred_element_type=jnp.float32) + bias_ref[...]
    q_ref[...] = y[:, 0 * d:1 * d].astype(q_ref.dtype)
    k_ref[...] = y[:, 1 * d:2 * d].astype(k_ref.dtype)
    v_ref[...] = y[:, 2 * d:3 * d].astype(v_ref.dtype)


def ln_qkv(x, g, b, w_qkv, b_qkv):
    """Fused LayerNorm + QKV. x: (M, D) bf16, w_qkv: (D, 3D) bf16 -> three (M, D) bf16."""
    M, D = x.shape
    tm = _row_tile(M)
    row_spec = pl.BlockSpec((tm, D), lambda i: (i, 0))
    vec_d = pl.BlockSpec((1, D), lambda i: (0, 0))
    vec_3d = pl.BlockSpec((1, 3 * D), lambda i: (0, 0))
    w_spec = pl.BlockSpec((D, 3 * D), lambda i: (0, 0))
    out = jax.ShapeDtypeStruct((M, D), jnp.bfloat16)
    return pl.pallas_call(
        functools.partial(_ln_qkv_kernel, d=D),
        out_shape=(out, out, out),
        grid=(pl.cdiv(M, tm),),
        in_specs=[row_spec, vec_d, vec_d, w_spec, vec_3d],
        out_specs=(row_spec, row_spec, row_spec),
        compiler_params=_cp("parallel"),
    )(x, g.reshape(1, D), b.reshape(1, D), w_qkv, b_qkv.reshape(1, 3 * D))


def _attn_kernel(q_ref, k_ref, v_ref, o_ref, *, heads, dh, scale, s_valid):
    q = q_ref[...]          # (G, Sp, D) bf16
    k = k_ref[...]
    v = v_ref[...]
    sp = q.shape[1]
    kmask = None
    if s_valid < sp:        # padded keys -> mask before softmax
        kmask = jax.lax.broadcasted_iota(jnp.int32, (1, 1, sp), 2) < s_valid
    for h in range(heads):  # static unroll; each head is a lane slice of the D axis
        sl = slice(h * dh, (h + 1) * dh)
        qh, kh, vh = q[:, :, sl], k[:, :, sl], v[:, :, sl]
        s = jax.lax.dot_general(          # (G, Sp, Sp); no K transpose materialized
            qh, kh, dimension_numbers=(((2,), (2,)), ((0,), (0,))),
            preferred_element_type=jnp.float32) * scale
        if kmask is not None:
            s = jnp.where(kmask, s, -1e30)
        s = s - jnp.max(s, axis=-1, keepdims=True)
        p = jnp.exp(s)
        p = p * pl.reciprocal(jnp.sum(p, axis=-1, keepdims=True), approx=True)
        oh = jax.lax.dot_general(         # (G, Sp, dh)
            p.astype(v.dtype), vh, dimension_numbers=(((2,), (1,)), ((0,), (0,))),
            preferred_element_type=jnp.float32)
        # write each head straight into its lane slice (no per-head f32 list + concat)
        o_ref[:, :, sl] = oh.astype(o_ref.dtype)


def attention(q, k, v, heads):
    """q/k/v: (Bx, S, D) bf16 -> (Bx, S, D) bf16. A group of sequences per grid step."""
    Bx, S, D = q.shape
    dh = D // heads

    # Lane-dense scores: pad long, misaligned sequences (e.g. 197 -> 256) and mask keys.
    Sp = S
    if S > 128 and S % 128 != 0:
        Sp = -(-S // 128) * 128
    if Sp != S:
        pad = ((0, 0), (0, Sp - S), (0, 0))
        q = jnp.pad(q, pad)
        k = jnp.pad(k, pad)
        v = jnp.pad(v, pad)

    # ~4096 rows per step to feed the MXU / amortize per-step overhead,
    # while keeping >= 2 grid steps so both v7x TensorCores get work.
    budget = max(1, 4096 // Sp)
    if Bx >= 2:
        budget = min(budget, Bx // 2)
    G = _largest_divisor_leq(Bx, max(1, budget))

    spec = pl.BlockSpec((G, Sp, D), lambda i: (i, 0, 0))
    kernel = functools.partial(_attn_kernel, heads=heads, dh=dh, scale=dh ** -0.5,
                               s_valid=S)
    out = pl.pallas_call(
        kernel,
        out_shape=jax.ShapeDtypeStruct((Bx, Sp, D), q.dtype),
        grid=(Bx // G,),
        in_specs=[spec, spec, spec],
        out_specs=spec,
        compiler_params=_cp("parallel"),
    )(q, k, v)
    if Sp != S:
        out = out[:, :S, :]
    return out


def _proj_fc_res_kernel(a_ref, r_ref, w1_ref, b1_ref, w2_ref, b2_ref, o_ref):
    t = jnp.dot(a_ref[...], w1_ref[...], preferred_element_type=jnp.float32) + b1_ref[...]
    y = jnp.dot(t.astype(jnp.bfloat16), w2_ref[...],
                preferred_element_type=jnp.float32) + b2_ref[...]
    o_ref[...] = (r_ref[...].astype(jnp.float32) + y).astype(o_ref.dtype)


def proj_fc_residual(a, r, w1, b1, w2, b2):
    """Temporal branch tail: r + temporal_fc(proj(a)). a, r: (M, D) bf16 -> (M, D) bf16."""
    M, D = a.shape
    tm = _row_tile(M)
    row = pl.BlockSpec((tm, D), lambda i: (i, 0))
    vec = pl.BlockSpec((1, D), lambda i: (0, 0))
    wsp = pl.BlockSpec((D, D), lambda i: (0, 0))
    return pl.pallas_call(
        _proj_fc_res_kernel,
        out_shape=jax.ShapeDtypeStruct((M, D), jnp.bfloat16),
        grid=(pl.cdiv(M, tm),),
        in_specs=[row, row, wsp, vec, wsp, vec],
        out_specs=row,
        compiler_params=_cp("parallel"),
    )(a, r, w1, b1.reshape(1, D), w2, b2.reshape(1, D))


def _mlp_kernel(x_ref, g_ref, b_ref, w1_ref, b1_ref, w2_ref, b2_ref, o_ref):
    x = x_ref[...].astype(jnp.float32)
    xn = _layernorm_f32(x, g_ref[...], b_ref[...])
    h = jnp.dot(xn.astype(jnp.bfloat16), w1_ref[...],
                preferred_element_type=jnp.float32) + b1_ref[...]
    # TODO(synk): PyTorch nn.GELU() defaults to exact erf-GELU; tanh approximation is used
    # because erf lowering inside Mosaic is not guaranteed.
    h = jax.nn.gelu(h, approximate=True)
    y = jnp.dot(h.astype(jnp.bfloat16), w2_ref[...],
                preferred_element_type=jnp.float32) + b2_ref[...]
    o_ref[...] = (x + y).astype(o_ref.dtype)


def mlp_residual(x, g, b, w1, b1, w2, b2):
    """x + fc2(gelu(fc1(LN(x)))). x: (M, D) bf16; w1: (D, Hd) bf16; w2: (Hd, D) bf16."""
    M, D = x.shape
    Hd = w1.shape[1]
    tm = _row_tile(M)
    row = pl.BlockSpec((tm, D), lambda i: (i, 0))
    return pl.pallas_call(
        _mlp_kernel,
        out_shape=jax.ShapeDtypeStruct((M, D), jnp.bfloat16),
        grid=(pl.cdiv(M, tm),),
        in_specs=[row,
                  pl.BlockSpec((1, D), lambda i: (0, 0)),
                  pl.BlockSpec((1, D), lambda i: (0, 0)),
                  pl.BlockSpec((D, Hd), lambda i: (0, 0)),
                  pl.BlockSpec((1, Hd), lambda i: (0, 0)),
                  pl.BlockSpec((Hd, D), lambda i: (0, 0)),
                  pl.BlockSpec((1, D), lambda i: (0, 0))],
        out_specs=row,
        compiler_params=_cp("parallel"),
    )(x, g.reshape(1, D), b.reshape(1, D), w1, b1.reshape(1, Hd), w2, b2.reshape(1, D))


def _ln_linear_kernel(x_ref, g_ref, b_ref, w_ref, bias_ref, o_ref):
    xn = _layernorm_f32(x_ref[...].astype(jnp.float32), g_ref[...], b_ref[...])
    y = jnp.dot(xn.astype(jnp.bfloat16), w_ref[...],
                preferred_element_type=jnp.float32) + bias_ref[...]
    o_ref[...] = y.astype(o_ref.dtype)


def ln_linear(x, g, b, w, bias):
    """Fused LayerNorm + matmul (classifier head). x: (M, K) bf16, w: (K, N) bf16 -> f32."""
    M, K = x.shape
    N = w.shape[1]
    tm = _row_tile(M)
    return pl.pallas_call(
        _ln_linear_kernel,
        out_shape=jax.ShapeDtypeStruct((M, N), jnp.float32),
        grid=(pl.cdiv(M, tm),),
        in_specs=[pl.BlockSpec((tm, K), lambda i: (i, 0)),
                  pl.BlockSpec((1, K), lambda i: (0, 0)),
                  pl.BlockSpec((1, K), lambda i: (0, 0)),
                  pl.BlockSpec((K, N), lambda i: (0, 0)),
                  pl.BlockSpec((1, N), lambda i: (0, 0))],
        out_specs=pl.BlockSpec((tm, N), lambda i: (i, 0)),
        compiler_params=_cp("parallel"),
    )(x, g.reshape(1, K), b.reshape(1, K), w, bias.reshape(1, N))


# ----------------------------------------------------------------------------
# Model blocks (plain-JAX glue around the fused Pallas kernels; bf16 activations)
# ----------------------------------------------------------------------------
def divided_block(x, p, *, B, T, N, heads):
    """Divided space-time attention block. x: (B, 1 + N*T, D) bf16; non-cls tokens are
    ordered (spatial-major, time-minor) as in the reference."""
    D = x.shape[-1]
    S = x.shape[1]

    # --- temporal attention over the T axis of each spatial location ---
    xt_res = x[:, 1:, :]                                           # (B, N*T, D)
    x2 = xt_res.reshape(B * N * T, D)
    q, k, v = ln_qkv(x2, p["tnorm_g"], p["tnorm_b"], p["t_wqkv"], p["t_bqkv"])
    a = attention(q.reshape(B * N, T, D), k.reshape(B * N, T, D),
                  v.reshape(B * N, T, D), heads)                   # (B*N, T, D) bf16
    xt = proj_fc_residual(a.reshape(B * N * T, D), x2,
                          p["t_proj_w"], p["t_proj_b"],
                          p["t_fc_w"], p["t_fc_b"]).reshape(B, N * T, D)

    # --- spatial attention over the N axis of each frame (cls prepended per frame) ---
    init_cls = x[:, 0, :][:, None, :]                              # (B, 1, D)
    cls_rep = jnp.broadcast_to(init_cls, (B, T, D)).reshape(B * T, 1, D)
    # TODO(synk): fold this (n t) -> (t n) reorder into a 4-D BlockSpec index_map on the
    # spatial ln_qkv / writeback instead of materializing XLA transposes.
    xs = xt.reshape(B, N, T, D).transpose(0, 2, 1, 3).reshape(B * T, N, D)
    xs = jnp.concatenate([cls_rep, xs], axis=1)                    # (B*T, N+1, D)
    xs2 = xs.reshape(B * T * (N + 1), D)
    q, k, v = ln_qkv(xs2, p["norm1_g"], p["norm1_b"], p["s_wqkv"], p["s_bqkv"])
    a = attention(q.reshape(B * T, N + 1, D), k.reshape(B * T, N + 1, D),
                  v.reshape(B * T, N + 1, D), heads)               # (B*T, N+1, D) bf16
    res_s = linear(a.reshape(B * T * (N + 1), D), p["s_proj_w"], p["s_proj_b"])
    res_s = res_s.reshape(B * T, N + 1, D)
    cls_out = res_s[:, 0, :].astype(jnp.float32).reshape(B, T, D).mean(axis=1, keepdims=True)
    cls_out = cls_out.astype(x.dtype)                              # avg cls over frames
    res_sp = res_s[:, 1:, :].reshape(B, T, N, D).transpose(0, 2, 1, 3).reshape(B, N * T, D)
    x = jnp.concatenate([init_cls, xt], axis=1) + jnp.concatenate([cls_out, res_sp], axis=1)

    # --- MLP (LayerNorm + fc1-gelu + fc2 + residual fused in one kernel) ---
    x = mlp_residual(x.reshape(B * S, D), p["norm2_g"], p["norm2_b"],
                     p["fc1_w"], p["fc1_b"], p["fc2_w"], p["fc2_b"]).reshape(B, S, D)
    return x


def timesformer_forward(x, params, *, ph, pw, heads):
    # layout: x is (B, T, H, W, C) channels-last (PyTorch reference: (B, C, T, H, W))
    B, T, H, W, C = x.shape
    Nh, Nw = H // ph, W // pw
    N = Nh * Nw
    D = params["cls_token"].shape[-1]

    # Patch embedding: Conv2d(kernel=stride=patch) == matmul over flattened patches.
    patches = x.reshape(B, T, Nh, ph, Nw, pw, C)
    patches = patches.transpose(0, 1, 2, 4, 6, 3, 5)               # (B,T,Nh,Nw,C,ph,pw)
    patches = patches.reshape(B * T * N, C * ph * pw).astype(jnp.bfloat16)
    tok = linear(patches, params["patch_w"], params["patch_b"])    # (B*T*N, D) bf16
    tok = tok.reshape(B * T, N, D)

    cls = jnp.broadcast_to(params["cls_token"].astype(jnp.bfloat16), (B * T, 1, D))
    xx = jnp.concatenate([cls, tok], axis=1)                       # (B*T, N+1, D)
    xx = xx.astype(jnp.float32) + params["pos_embed"]              # (1, N+1, D) f32 add
    # drop_rate = 0.0 -> pos_drop is identity

    # Time embedding (reference keeps one cls per clip, adds time_embed to patch tokens).
    cls_tokens = xx[:B, 0, :][:, None, :]                          # (B, 1, D)
    xs = xx[:, 1:, :].reshape(B, T, N, D).transpose(0, 2, 1, 3)    # (B, N, T, D)
    xs = xs.reshape(B * N, T, D) + params["time_embed"]            # + (1, T, D)
    xs = xs.reshape(B, N * T, D)                                   # token order (n t)
    xx = jnp.concatenate([cls_tokens, xs], axis=1).astype(jnp.bfloat16)  # (B, 1+N*T, D)

    for blk in params["blocks"]:
        xx = divided_block(xx, blk, B=B, T=T, N=N, heads=heads)

    feat = xx[:, 0, :]                                             # token_pool='first'
    # Final LayerNorm is row-wise, so fusing it on the cls row only equals norm-then-index.
    logits = ln_linear(feat, params["norm_g"], params["norm_b"],
                       params["head_w"], params["head_b"])
    return logits


# ----------------------------------------------------------------------------
# Deterministic parameter init (synthetic; shapes follow the module's __init__).
# Matmul weights are stored in bf16 (f32 accumulation inside the kernels).
# NOTE: when loading real PyTorch weights, Conv2d patch weight (D,C,kh,kw) must be
# permuted/flattened in (C, ph, pw) order, and Linear weights transposed to (in, out);
# the qkv weight must be laid out as a single (D, 3D) = [Wq | Wk | Wv] concat.
# ----------------------------------------------------------------------------
def init_params(key, *, C, ph, pw, D, heads, depth, T, N, ff_mult, num_classes):
    scale = 0.02
    keys = iter(jax.random.split(key, 256))

    def rand(shape, dtype=jnp.bfloat16):
        return (scale * jax.random.normal(next(keys), shape, dtype=jnp.float32)).astype(dtype)

    params = {
        "patch_w": rand((C * ph * pw, D)),
        "patch_b": jnp.zeros((D,), jnp.float32),
        "cls_token": rand((1, 1, D), jnp.float32),
        "pos_embed": rand((1, N + 1, D), jnp.float32),
        "time_embed": rand((1, T, D), jnp.float32),
        "norm_g": jnp.ones((D,), jnp.float32),
        "norm_b": jnp.zeros((D,), jnp.float32),
        "head_w": rand((D, num_classes)),
        "head_b": jnp.zeros((num_classes,), jnp.float32),
        "blocks": [],
    }
    hidden = D * ff_mult
    for _ in range(depth):
        params["blocks"].append({
            "tnorm_g": jnp.ones((D,), jnp.float32), "tnorm_b": jnp.zeros((D,), jnp.float32),
            "t_wqkv": rand((D, 3 * D)), "t_bqkv": jnp.zeros((3 * D,), jnp.float32),
            "t_proj_w": rand((D, D)), "t_proj_b": jnp.zeros((D,), jnp.float32),
            "t_fc_w": rand((D, D)), "t_fc_b": jnp.zeros((D,), jnp.float32),
            "norm1_g": jnp.ones((D,), jnp.float32), "norm1_b": jnp.zeros((D,), jnp.float32),
            "s_wqkv": rand((D, 3 * D)), "s_bqkv": jnp.zeros((3 * D,), jnp.float32),
            "s_proj_w": rand((D, D)), "s_proj_b": jnp.zeros((D,), jnp.float32),
            "norm2_g": jnp.ones((D,), jnp.float32), "norm2_b": jnp.zeros((D,), jnp.float32),
            "fc1_w": rand((D, hidden)), "fc1_b": jnp.zeros((hidden,), jnp.float32),
            "fc2_w": rand((hidden, D)), "fc2_b": jnp.zeros((D,), jnp.float32),
        })
    return params


# ----------------------------------------------------------------------------
if __name__ == "__main__":
    # Small config consistent with the module's defaults (scaled down):
    B, C, T, H, W = 2, 3, 4, 16, 16       # clip_len=4, crop_size=16
    PH, PW = 8, 8                         # patch_size=(1, 8, 8)
    D, HEADS, DEPTH = 32, 4, 2            # embed_dim=32, layer_sizes=(2, 4)
    FF_MULT, NUM_CLASSES = 4, 8
    N = (H // PH) * (W // PW)

    key = jax.random.PRNGKey(0)
    kx, kp = jax.random.split(key)
    x = jax.random.normal(kx, (B, T, H, W, C), dtype=jnp.float32)
    params = init_params(kp, C=C, ph=PH, pw=PW, D=D, heads=HEADS, depth=DEPTH,
                         T=T, N=N, ff_mult=FF_MULT, num_classes=NUM_CLASSES)

    fwd = jax.jit(functools.partial(timesformer_forward, ph=PH, pw=PW, heads=HEADS))
    out = fwd(x, params)
    jax.block_until_ready(out)
    assert out.shape == (B, NUM_CLASSES), out.shape
    print("KERNEL_OK")
</pallas_src>

<mosaic_0001>
module attributes {stable_mosaic.version = 11 : i64} {
  func.func @_proj_fc_res_kernel(%arg0: i32, %arg1: memref<16x32xbf16, #tpu.memory_space<vmem>>, %arg2: memref<16x32xbf16, #tpu.memory_space<vmem>>, %arg3: memref<32x32xbf16, #tpu.memory_space<vmem>>, %arg4: memref<1x32xf32, #tpu.memory_space<vmem>>, %arg5: memref<32x32xbf16, #tpu.memory_space<vmem>>, %arg6: memref<1x32xf32, #tpu.memory_space<vmem>>, %arg7: memref<16x32xbf16, #tpu.memory_space<vmem>>) attributes {dimension_semantics = [#tpu.dimension_semantics<parallel>], iteration_bounds = array<i64: 2>, scalar_prefetch = 0 : i64, scratch_operands = 0 : i64, tpu.core_type = #tpu.core_type<tc>, window_params = [{transform_indices = @transform_0, window_bounds = array<i64: 16, 32>}, {transform_indices = @transform_1, window_bounds = array<i64: 16, 32>}, {pipeline_mode = #tpu.pipeline_mode<synchronous>, transform_indices = @transform_2, window_bounds = array<i64: 32, 32>}, {pipeline_mode = #tpu.pipeline_mode<synchronous>, transform_indices = @transform_3, window_bounds = array<i64: 1, 32>}, {pipeline_mode = #tpu.pipeline_mode<synchronous>, transform_indices = @transform_4, window_bounds = array<i64: 32, 32>}, {pipeline_mode = #tpu.pipeline_mode<synchronous>, transform_indices = @transform_5, window_bounds = array<i64: 1, 32>}, {transform_indices = @transform_6, window_bounds = array<i64: 16, 32>}]} {
    %c0 = arith.constant 0 : index
    %c0_0 = arith.constant 0 : index
    %0 = vector.load %arg1[%c0, %c0_0] : memref<16x32xbf16, #tpu.memory_space<vmem>>, vector<16x32xbf16>
    %c0_1 = arith.constant 0 : index
    %c0_2 = arith.constant 0 : index
    %1 = vector.load %arg3[%c0_1, %c0_2] : memref<32x32xbf16, #tpu.memory_space<vmem>>, vector<32x32xbf16>
    %cst = arith.constant dense<0.000000e+00> : vector<16x32xf32>
    %2 = tpu.matmul %0, %1, %cst {dimension_numbers = #tpu.dot_dimension_numbers<[1], [0], [0], [1], [0, 0, 1, 1], [], []>} : vector<16x32xbf16>, vector<32x32xbf16>, vector<16x32xf32> -> vector<16x32xf32>
    %c0_3 = arith.constant 0 : index
    %c0_4 = arith.constant 0 : index
    %3 = vector.load %arg4[%c0_3, %c0_4] : memref<1x32xf32, #tpu.memory_space<vmem>>, vector<1x32xf32>
    %4 = vector.broadcast %3 : vector<1x32xf32> to vector<16x32xf32>
    %5 = arith.addf %2, %4 : vector<16x32xf32>
    %6 = arith.truncf %5 : vector<16x32xf32> to vector<16x32xbf16>
    %c0_5 = arith.constant 0 : index
    %c0_6 = arith.constant 0 : index
    %7 = vector.load %arg5[%c0_5, %c0_6] : memref<32x32xbf16, #tpu.memory_space<vmem>>, vector<32x32xbf16>
    %cst_7 = arith.constant dense<0.000000e+00> : vector<16x32xf32>
    %8 = tpu.matmul %6, %7, %cst_7 {dimension_numbers = #tpu.dot_dimension_numbers<[1], [0], [0], [1], [0, 0, 1, 1], [], []>} : vector<16x32xbf16>, vector<32x32xbf16>, vector<16x32xf32> -> vector<16x32xf32>
    %c0_8 = arith.constant 0 : index
    %c0_9 = arith.constant 0 : index
    %9 = vector.load %arg6[%c0_8, %c0_9] : memref<1x32xf32, #tpu.memory_space<vmem>>, vector<1x32xf32>
    %10 = vector.broadcast %9 : vector<1x32xf32> to vector<16x32xf32>
    %11 = arith.addf %8, %10 : vector<16x32xf32>
    %c0_10 = arith.constant 0 : index
    %c0_11 = arith.constant 0 : index
    %12 = vector.load %arg2[%c0_10, %c0_11] : memref<16x32xbf16, #tpu.memory_space<vmem>>, vector<16x32xbf16>
    %13 = arith.extf %12 : vector<16x32xbf16> to vector<16x32xf32>
    %14 = arith.addf %13, %11 : vector<16x32xf32>
    %15 = arith.truncf %14 : vector<16x32xf32> to vector<16x32xbf16>
    %c0_12 = arith.constant 0 : index
    %c0_13 = arith.constant 0 : index
    %16 = vector.load %arg7[%c0_12, %c0_13] : memref<16x32xbf16, #tpu.memory_space<vmem>>, vector<16x32xbf16>
    tpu.vector_store %arg7[%c0_12, %c0_13], %15 {strides = array<i32>} : memref<16x32xbf16, #tpu.memory_space<vmem>>, vector<16x32xbf16>,
    return
  }
  func.func @transform_0(%arg0: i32) -> (i32, i32) {
    %c0_i32 = arith.constant 0 : i32
    %c0_i32_0 = arith.constant 0 : i32
    return %arg0, %c0_i32 : i32, i32
  }
  func.func @transform_1(%arg0: i32) -> (i32, i32) {
    %c0_i32 = arith.constant 0 : i32
    %c0_i32_0 = arith.constant 0 : i32
    return %arg0, %c0_i32 : i32, i32
  }
  func.func @transform_2(%arg0: i32) -> (i32, i32) {
    %c0_i32 = arith.constant 0 : i32
    %c0_i32_0 = arith.constant 0 : i32
    %c0_i32_1 = arith.constant 0 : i32
    return %c0_i32, %c0_i32_0 : i32, i32
  }
  func.func @transform_3(%arg0: i32) -> (i32, i32) {
    %c0_i32 = arith.constant 0 : i32
    %c0_i32_0 = arith.constant 0 : i32
    %c0_i32_1 = arith.constant 0 : i32
    return %c0_i32, %c0_i32_0 : i32, i32
  }
  func.func @transform_4(%arg0: i32) -> (i32, i32) {
    %c0_i32 = arith.constant 0 : i32
    %c0_i32_0 = arith.constant 0 : i32
    %c0_i32_1 = arith.constant 0 : i32
    return %c0_i32, %c0_i32_0 : i32, i32
  }
  func.func @transform_5(%arg0: i32) -> (i32, i32) {
    %c0_i32 = arith.constant 0 : i32
    %c0_i32_0 = arith.constant 0 : i32
    %c0_i32_1 = arith.constant 0 : i32
    return %c0_i32, %c0_i32_0 : i32, i32
  }
  func.func @transform_6(%arg0: i32) -> (i32, i32) {
    %c0_i32 = arith.constant 0 : i32
    %c0_i32_0 = arith.constant 0 : i32
    return %arg0, %c0_i32 : i32, i32
  }
}

module attributes {stable_mosaic.version = 11 : i64} {
  func.func @_ln_qkv_kernel(%arg0: i32, %arg1: memref<16x32xbf16, #tpu.memory_space<vmem>>, %arg2: memref<1x32xf32, #tpu.memory_space<vmem>>, %arg3: memref<1x32xf32, #tpu.memory_space<vmem>>, %arg4: memref<32x96xbf16, #tpu.memory_space<vmem>>, %arg5: memref<1x96xf32, #tpu.memory_space<vmem>>, %arg6: memref<16x32xbf16, #tpu.memory_space<vmem>>, %arg7: memref<16x32xbf16, #tpu.memory_space<vmem>>, %arg8: memref<16x32xbf16, #tpu.memory_space<vmem>>) attributes {dimension_semantics = [#tpu.dimension_semantics<parallel>], iteration_bounds = array<i64: 2>, scalar_prefetch = 0 : i64, scratch_operands = 0 : i64, tpu.core_type = #tpu.core_type<tc>, window_params = [{transform_indices = @transform_0, window_bounds = array<i64: 16, 32>}, {pipeline_mode = #tpu.pipeline_mode<synchronous>, transform_indices = @transform_1, window_bounds = array<i64: 1, 32>}, {pipeline_mode = #tpu.pipeline_mode<synchronous>, transform_indices = @transform_2, window_bounds = array<i64: 1, 32>}, {pipeline_mode = #tpu.pipeline_mode<synchronous>, transform_indices = @transform_3, window_bounds = array<i64: 32, 96>}, {pipeline_mode = #tpu.pipeline_mode<synchronous>, transform_indices = @transform_4, window_bounds = array<i64: 1, 96>}, {transform_indices = @transform_5, window_bounds = array<i64: 16, 32>}, {transform_indices = @transform_6, window_bounds = array<i64: 16, 32>}, {transform_indices = @transform_7, window_bounds = array<i64: 16, 32>}]} {
    %c0 = arith.constant 0 : index
    %c0_0 = arith.constant 0 : index
    %0 = vector.load %arg1[%c0, %c0_0] : memref<16x32xbf16, #tpu.memory_space<vmem>>, vector<16x32xbf16>
    %1 = arith.extf %0 : vector<16x32xbf16> to vector<16x32xf32>
    %c0_1 = arith.constant 0 : index
    %c0_2 = arith.constant 0 : index
    %2 = vector.load %arg2[%c0_1, %c0_2] : memref<1x32xf32, #tpu.memory_space<vmem>>, vector<1x32xf32>
    %c0_3 = arith.constant 0 : index
    %c0_4 = arith.constant 0 : index
    %3 = vector.load %arg3[%c0_3, %c0_4] : memref<1x32xf32, #tpu.memory_space<vmem>>, vector<1x32xf32>
    %cst = arith.constant dense<0.000000e+00> : vector<16xf32>
    %4 = vector.multi_reduction <add>, %1, %cst [1] : vector<16x32xf32> to vector<16xf32>
    %5 = vector.shape_cast %4 : vector<16xf32> to vector<16x1xf32>
    %cst_5 = arith.constant 3.200000e+01 : f32
    %6 = vector.broadcast %cst_5 : f32 to vector<16x1xf32>
    %7 = arith.divf %5, %6 : vector<16x1xf32>
    %8 = vector.broadcast %7 : vector<16x1xf32> to vector<16x32xf32>
    %9 = arith.subf %1, %8 : vector<16x32xf32>
    %10 = arith.mulf %9, %9 : vector<16x32xf32>
    %cst_6 = arith.constant dense<0.000000e+00> : vector<16xf32>
    %11 = vector.multi_reduction <add>, %10, %cst_6 [1] : vector<16x32xf32> to vector<16xf32>
    %12 = vector.shape_cast %11 : vector<16xf32> to vector<16x1xf32>
    %cst_7 = arith.constant 3.200000e+01 : f32
    %13 = vector.broadcast %cst_7 : f32 to vector<16x1xf32>
    %14 = arith.divf %12, %13 : vector<16x1xf32>
    %cst_8 = arith.constant 9.99999974E-6 : f32
    %15 = vector.broadcast %cst_8 : f32 to vector<16x1xf32>
    %16 = arith.addf %14, %15 : vector<16x1xf32>
    %17 = math.rsqrt %16 : vector<16x1xf32>
    %18 = vector.broadcast %17 : vector<16x1xf32> to vector<16x32xf32>
    %19 = arith.mulf %9, %18 : vector<16x32xf32>
    %20 = vector.broadcast %2 : vector<1x32xf32> to vector<16x32xf32>
    %21 = arith.mulf %19, %20 : vector<16x32xf32>
    %22 = vector.broadcast %3 : vector<1x32xf32> to vector<16x32xf32>
    %23 = arith.addf %21, %22 : vector<16x32xf32>
    %24 = arith.truncf %23 : vector<16x32xf32> to vector<16x32xbf16>
    %c0_9 = arith.constant 0 : index
    %c0_10 = arith.constant 0 : index
    %25 = vector.load %arg4[%c0_9, %c0_10] : memref<32x96xbf16, #tpu.memory_space<vmem>>, vector<32x96xbf16>
    %cst_11 = arith.constant dense<0.000000e+00> : vector<16x96xf32>
    %26 = tpu.matmul %24, %25, %cst_11 {dimension_numbers = #tpu.dot_dimension_numbers<[1], [0], [0], [1], [0, 0, 1, 1], [], []>} : vector<16x32xbf16>, vector<32x96xbf16>, vector<16x96xf32> -> vector<16x96xf32>
    %c0_12 = arith.constant 0 : index
    %c0_13 = arith.constant 0 : index
    %27 = vector.load %arg5[%c0_12, %c0_13] : memref<1x96xf32, #tpu.memory_space<vmem>>, vector<1x96xf32>
    %28 = vector.broadcast %27 : vector<1x96xf32> to vector<16x96xf32>
    %29 = arith.addf %26, %28 : vector<16x96xf32>
    %30 = vector.extract_strided_slice %29 {offsets = [0, 0], sizes = [16, 32], strides = [1, 1]} : vector<16x96xf32> to vector<16x32xf32>
    %31 = arith.truncf %30 : vector<16x32xf32> to vector<16x32xbf16>
    %c0_14 = arith.constant 0 : index
    %c0_15 = arith.constant 0 : index
    %32 = vector.load %arg6[%c0_14, %c0_15] : memref<16x32xbf16, #tpu.memory_space<vmem>>, vector<16x32xbf16>
    tpu.vector_store %arg6[%c0_14, %c0_15], %31 {strides = array<i32>} : memref<16x32xbf16, #tpu.memory_space<vmem>>, vector<16x32xbf16>,
    %33 = vector.extract_strided_slice %29 {offsets = [0, 32], sizes = [16, 32], strides = [1, 1]} : vector<16x96xf32> to vector<16x32xf32>
    %34 = arith.truncf %33 : vector<16x32xf32> to vector<16x32xbf16>
    %c0_16 = arith.constant 0 : index
    %c0_17 = arith.constant 0 : index
    %35 = vector.load %arg7[%c0_16, %c0_17] : memref<16x32xbf16, #tpu.memory_space<vmem>>, vector<16x32xbf16>
    tpu.vector_store %arg7[%c0_16, %c0_17], %34 {strides = array<i32>} : memref<16x32xbf16, #tpu.memory_space<vmem>>, vector<16x32xbf16>,
    %36 = vector.extract_strided_slice %29 {offsets = [0, 64], sizes = [16, 32], strides = [1, 1]} : vector<16x96xf32> to vector<16x32xf32>
    %37 = arith.truncf %36 : vector<16x32xf32> to vector<16x32xbf16>
    %c0_18 = arith.constant 0 : index
    %c0_19 = arith.constant 0 : index
    %38 = vector.load %arg8[%c0_18, %c0_19] : memref<16x32xbf16, #tpu.memory_space<vmem>>, vector<16x32xbf16>
    tpu.vector_store %arg8[%c0_18, %c0_19], %37 {strides = array<i32>} : memref<16x32xbf16, #tpu.memory_space<vmem>>, vector<16x32xbf16>,
    return
  }
  func.func @transform_0(%arg0: i32) -> (i32, i32) {
    %c0_i32 = arith.constant 0 : i32
    %c0_i32_0 = arith.constant 0 : i32
    return %arg0, %c0_i32 : i32, i32
  }
  func.func @transform_1(%arg0: i32) -> (i32, i32) {
    %c0_i32 = arith.constant 0 : i32
    %c0_i32_0 = arith.constant 0 : i32
    %c0_i32_1 = arith.constant 0 : i32
    return %c0_i32, %c0_i32_0 : i32, i32
  }
  func.func @transform_2(%arg0: i32) -> (i32, i32) {
    %c0_i32 = arith.constant 0 : i32
    %c0_i32_0 = arith.constant 0 : i32
    %c0_i32_1 = arith.constant 0 : i32
    return %c0_i32, %c0_i32_0 : i32, i32
  }
  func.func @transform_3(%arg0: i32) -> (i32, i32) {
    %c0_i32 = arith.constant 0 : i32
    %c0_i32_0 = arith.constant 0 : i32
    %c0_i32_1 = arith.constant 0 : i32
    return %c0_i32, %c0_i32_0 : i32, i32
  }
  func.func @transform_4(%arg0: i32) -> (i32, i32) {
    %c0_i32 = arith.constant 0 : i32
    %c0_i32_0 = arith.constant 0 : i32
    %c0_i32_1 = arith.constant 0 : i32
    return %c0_i32, %c0_i32_0 : i32, i32
  }
  func.func @transform_5(%arg0: i32) -> (i32, i32) {
    %c0_i32 = arith.constant 0 : i32
    %c0_i32_0 = arith.constant 0 : i32
    return %arg0, %c0_i32 : i32, i32
  }
  func.func @transform_6(%arg0: i32) -> (i32, i32) {
    %c0_i32 = arith.constant 0 : i32
    %c0_i32_0 = arith.constant 0 : i32
    return %arg0, %c0_i32 : i32, i32
  }
  func.func @transform_7(%arg0: i32) -> (i32, i32) {
    %c0_i32 = arith.constant 0 : i32
    %c0_i32_0 = arith.constant 0 : i32
    return %arg0, %c0_i32 : i32, i32
  }
}

module attributes {stable_mosaic.version = 11 : i64} {
  func.func @_linear_kernel(%arg0: i32, %arg1: i32, %arg2: i32, %arg3: memref<16x192xbf16, #tpu.memory_space<vmem>>, %arg4: memref<192x32xbf16, #tpu.memory_space<vmem>>, %arg5: memref<1x32xf32, #tpu.memory_space<vmem>>, %arg6: memref<16x32xbf16, #tpu.memory_space<vmem>>, %arg7: memref<16x32xf32, #tpu.memory_space<vmem>>) attributes {dimension_semantics = [#tpu.dimension_semantics<parallel>, #tpu.dimension_semantics<parallel>, #tpu.dimension_semantics<arbitrary>], iteration_bounds = array<i64: 2, 1, 1>, scalar_prefetch = 0 : i64, scratch_operands = 1 : i64, tpu.core_type = #tpu.core_type<tc>, window_params = [{transform_indices = @transform_0, window_bounds = array<i64: 16, 192>}, {transform_indices = @transform_1, window_bounds = array<i64: 192, 32>}, {transform_indices = @transform_2, window_bounds = array<i64: 1, 32>}, {transform_indices = @transform_3, window_bounds = array<i64: 16, 32>}]} {
    %c0_i32 = arith.constant 0 : i32
    %0 = arith.cmpi eq, %arg2, %c0_i32 : i32
    %1 = arith.extui %0 : i1 to i32
    %c0_i32_0 = arith.constant 0 : i32
    %2 = arith.cmpi ne, %1, %c0_i32_0 : i32
    scf.if %2 {
      %cst_10 = arith.constant 0.000000e+00 : f32
      %12 = vector.broadcast %cst_10 : f32 to vector<16x32xf32>
      %c0_11 = arith.constant 0 : index
      %c0_12 = arith.constant 0 : index
      %13 = vector.load %arg7[%c0_11, %c0_12] : memref<16x32xf32, #tpu.memory_space<vmem>>, vector<16x32xf32>
      tpu.vector_store %arg7[%c0_11, %c0_12], %12 {strides = array<i32>} : memref<16x32xf32, #tpu.memory_space<vmem>>, vector<16x32xf32>,
    } else {
    }
    %c0 = arith.constant 0 : index
    %c0_1 = arith.constant 0 : index
    %3 = vector.load %arg7[%c0, %c0_1] : memref<16x32xf32, #tpu.memory_space<vmem>>, vector<16x32xf32>
    %c0_2 = arith.constant 0 : index
    %c0_3 = arith.constant 0 : index
    %4 = vector.load %arg3[%c0_2, %c0_3] : memref<16x192xbf16, #tpu.memory_space<vmem>>, vector<16x192xbf16>
    %c0_4 = arith.constant 0 : index
    %c0_5 = arith.constant 0 : index
    %5 = vector.load %arg4[%c0_4, %c0_5] : memref<192x32xbf16, #tpu.memory_space<vmem>>, vector<192x32xbf16>
    %cst = arith.constant dense<0.000000e+00> : vector<16x32xf32>
    %6 = tpu.matmul %4, %5, %cst {dimension_numbers = #tpu.dot_dimension_numbers<[1], [0], [0], [1], [0, 0, 1, 1], [], []>} : vector<16x192xbf16>, vector<192x32xbf16>, vector<16x32xf32> -> vector<16x32xf32>
    %7 = arith.addf %3, %6 : vector<16x32xf32>
    %c0_6 = arith.constant 0 : index
    %c0_7 = arith.constant 0 : index
    %8 = vector.load %arg7[%c0_6, %c0_7] : memref<16x32xf32, #tpu.memory_space<vmem>>, vector<16x32xf32>
    tpu.vector_store %arg7[%c0_6, %c0_7], %7 {strides = array<i32>} : memref<16x32xf32, #tpu.memory_space<vmem>>, vector<16x32xf32>,
    %c0_i32_8 = arith.constant 0 : i32
    %9 = arith.cmpi eq, %arg2, %c0_i32_8 : i32
    %10 = arith.extui %9 : i1 to i32
    %c0_i32_9 = arith.constant 0 : i32
    %11 = arith.cmpi ne, %10, %c0_i32_9 : i32
    scf.if %11 {
      %c0_10 = arith.constant 0 : index
      %c0_11 = arith.constant 0 : index
      %12 = vector.load %arg7[%c0_10, %c0_11] : memref<16x32xf32, #tpu.memory_space<vmem>>, vector<16x32xf32>
      %c0_12 = arith.constant 0 : index
      %c0_13 = arith.constant 0 : index
      %13 = vector.load %arg5[%c0_12, %c0_13] : memref<1x32xf32, #tpu.memory_space<vmem>>, vector<1x32xf32>
      %14 = vector.broadcast %13 : vector<1x32xf32> to vector<16x32xf32>
      %15 = arith.addf %12, %14 : vector<16x32xf32>
      %16 = arith.truncf %15 : vector<16x32xf32> to vector<16x32xbf16>
      %c0_14 = arith.constant 0 : index
      %c0_15 = arith.constant 0 : index
      %17 = vector.load %arg6[%c0_14, %c0_15] : memref<16x32xbf16, #tpu.memory_space<vmem>>, vector<16x32xbf16>
      tpu.vector_store %arg6[%c0_14, %c0_15], %16 {strides = array<i32>} : memref<16x32xbf16, #tpu.memory_space<vmem>>, vector<16x32xbf16>,
    } else {
    }
    return
  }
  func.func @transform_0(%arg0: i32, %arg1: i32, %arg2: i32) -> (i32, i32) {
    %c0_i32 = arith.constant 0 : i32
    return %arg0, %arg2 : i32, i32
  }
  func.func @transform_1(%arg0: i32, %arg1: i32, %arg2: i32) -> (i32, i32) {
    %c0_i32 = arith.constant 0 : i32
    return %arg2, %arg1 : i32, i32
  }
  func.func @transform_2(%arg0: i32, %arg1: i32, %arg2: i32) -> (i32, i32) {
    %c0_i32 = arith.constant 0 : i32
    %c0_i32_0 = arith.constant 0 : i32
    return %c0_i32, %arg1 : i32, i32
  }
  func.func @transform_3(%arg0: i32, %arg1: i32, %arg2: i32) -> (i32, i32) {
    %c0_i32 = arith.constant 0 : i32
    return %arg0, %arg1 : i32, i32
  }
}

module attributes {stable_mosaic.version = 11 : i64} {
  func.func @_attn_kernel(%arg0: i32, %arg1: memref<4x4x32xbf16, #tpu.memory_space<vmem>>, %arg2: memref<4x4x32xbf16, #tpu.memory_space<vmem>>, %arg3: memref<4x4x32xbf16, #tpu.memory_space<vmem>>, %arg4: memref<4x4x32xbf16, #tpu.memory_space<vmem>>) attributes {dimension_semantics = [#tpu.dimension_semantics<parallel>], iteration_bounds = array<i64: 2>, scalar_prefetch = 0 : i64, scratch_operands = 0 : i64, tpu.core_type = #tpu.core_type<tc>, window_params = [{transform_indices = @transform_0, window_bounds = array<i64: 4, 4, 32>}, {transform_indices = @transform_1, window_bounds = array<i64: 4, 4, 32>}, {transform_indices = @transform_2, window_bounds = array<i64: 4, 4, 32>}, {transform_indices = @transform_3, window_bounds = array<i64: 4, 4, 32>}]} {
    %c0 = arith.constant 0 : index
    %c0_0 = arith.constant 0 : index
    %c0_1 = arith.constant 0 : index
    %0 = vector.load %arg1[%c0, %c0_0, %c0_1] : memref<4x4x32xbf16, #tpu.memory_space<vmem>>, vector<4x4x32xbf16>
    %c0_2 = arith.constant 0 : index
    %c0_3 = arith.constant 0 : index
    %c0_4 = arith.constant 0 : index
    %1 = vector.load %arg2[%c0_2, %c0_3, %c0_4] : memref<4x4x32xbf16, #tpu.memory_space<vmem>>, vector<4x4x32xbf16>
    %c0_5 = arith.constant 0 : index
    %c0_6 = arith.constant 0 : index
    %c0_7 = arith.constant 0 : index
    %2 = vector.load %arg3[%c0_5, %c0_6, %c0_7] : memref<4x4x32xbf16, #tpu.memory_space<vmem>>, vector<4x4x32xbf16>
    %3 = vector.extract_strided_slice %0 {offsets = [0, 0, 0], sizes = [4, 4, 8], strides = [1, 1, 1]} : vector<4x4x32xbf16> to vector<4x4x8xbf16>
    %4 = vector.extract_strided_slice %1 {offsets = [0, 0, 0], sizes = [4, 4, 8], strides = [1, 1, 1]} : vector<4x4x32xbf16> to vector<4x4x8xbf16>
    %5 = vector.extract_strided_slice %2 {offsets = [0, 0, 0], sizes = [4, 4, 8], strides = [1, 1, 1]} : vector<4x4x32xbf16> to vector<4x4x8xbf16>
    %cst = arith.constant dense<0.000000e+00> : vector<4x4x4xf32>
    %6 = tpu.matmul %3, %4, %cst {dimension_numbers = #tpu.dot_dimension_numbers<[2], [2], [1], [1], [0, 0, 0, 1, 1, 1], [0], [0]>} : vector<4x4x8xbf16>, vector<4x4x8xbf16>, vector<4x4x4xf32> -> vector<4x4x4xf32>
    %cst_8 = arith.constant 0.353553385 : f32
    %7 = vector.broadcast %cst_8 : f32 to vector<4x4x4xf32>
    %8 = arith.mulf %6, %7 : vector<4x4x4xf32>
    %cst_9 = arith.constant dense<0xFF800000> : vector<4x4xf32>
    %9 = vector.multi_reduction <maximumf>, %8, %cst_9 [2] : vector<4x4x4xf32> to vector<4x4xf32>
    %10 = vector.shape_cast %9 : vector<4x4xf32> to vector<4x4x1xf32>
    %11 = vector.broadcast %10 : vector<4x4x1xf32> to vector<4x4x4xf32>
    %12 = arith.subf %8, %11 : vector<4x4x4xf32>
    %13 = math.exp %12 : vector<4x4x4xf32>
    %cst_10 = arith.constant dense<0.000000e+00> : vector<4x4xf32>
    %14 = vector.multi_reduction <add>, %13, %cst_10 [2] : vector<4x4x4xf32> to vector<4x4xf32>
    %15 = vector.shape_cast %14 : vector<4x4xf32> to vector<4x4x1xf32>
    %16 = tpu.reciprocal %15 {approx = true} : vector<4x4x1xf32> -> vector<4x4x1xf32>
    %17 = vector.broadcast %16 : vector<4x4x1xf32> to vector<4x4x4xf32>
    %18 = arith.mulf %13, %17 : vector<4x4x4xf32>
    %19 = arith.truncf %18 : vector<4x4x4xf32> to vector<4x4x4xbf16>
    %cst_11 = arith.constant dense<0.000000e+00> : vector<4x4x8xf32>
    %20 = tpu.matmul %19, %5, %cst_11 {dimension_numbers = #tpu.dot_dimension_numbers<[2], [1], [1], [2], [0, 0, 0, 1, 1, 2], [0], [0]>} : vector<4x4x4xbf16>, vector<4x4x8xbf16>, vector<4x4x8xf32> -> vector<4x4x8xf32>
    %21 = arith.truncf %20 : vector<4x4x8xf32> to vector<4x4x8xbf16>
    %c0_12 = arith.constant 0 : index
    %c0_13 = arith.constant 0 : index
    %c0_14 = arith.constant 0 : index
    %22 = vector.load %arg4[%c0_12, %c0_13, %c0_14] : memref<4x4x32xbf16, #tpu.memory_space<vmem>>, vector<4x4x8xbf16>
    tpu.vector_store %arg4[%c0_12, %c0_13, %c0_14], %21 {strides = array<i32>} : memref<4x4x32xbf16, #tpu.memory_space<vmem>>, vector<4x4x8xbf16>,
    %23 = vector.extract_strided_slice %0 {offsets = [0, 0, 8], sizes = [4, 4, 8], strides = [1, 1, 1]} : vector<4x4x32xbf16> to vector<4x4x8xbf16>
    %24 = vector.extract_strided_slice %1 {offsets = [0, 0, 8], sizes = [4, 4, 8], strides = [1, 1, 1]} : vector<4x4x32xbf16> to vector<4x4x8xbf16>
    %25 = vector.extract_strided_slice %2 {offsets = [0, 0, 8], sizes = [4, 4, 8], strides = [1, 1, 1]} : vector<4x4x32xbf16> to vector<4x4x8xbf16>
    %cst_15 = arith.constant dense<0.000000e+00> : vector<4x4x4xf32>
    %26 = tpu.matmul %23, %24, %cst_15 {dimension_numbers = #tpu.dot_dimension_numbers<[2], [2], [1], [1], [0, 0, 0, 1, 1, 1], [0], [0]>} : vector<4x4x8xbf16>, vector<4x4x8xbf16>, vector<4x4x4xf32> -> vector<4x4x4xf32>
    %cst_16 = arith.constant 0.353553385 : f32
    %27 = vector.broadcast %cst_16 : f32 to vector<4x4x4xf32>
    %28 = arith.mulf %26, %27 : vector<4x4x4xf32>
    %cst_17 = arith.constant dense<0xFF800000> : vector<4x4xf32>
    %29 = vector.multi_reduction <maximumf>, %28, %cst_17 [2] : vector<4x4x4xf32> to vector<4x4xf32>
    %30 = vector.shape_cast %29 : vector<4x4xf32> to vector<4x4x1xf32>
    %31 = vector.broadcast %30 : vector<4x4x1xf32> to vector<4x4x4xf32>
    %32 = arith.subf %28, %31 : vector<4x4x4xf32>
    %33 = math.exp %32 : vector<4x4x4xf32>
    %cst_18 = arith.constant dense<0.000000e+00> : vector<4x4xf32>
    %34 = vector.multi_reduction <add>, %33, %cst_18 [2] : vector<4x4x4xf32> to vector<4x4xf32>
    %35 = vector.shape_cast %34 : vector<4x4xf32> to vector<4x4x1xf32>
    %36 = tpu.reciprocal %35 {approx = true} : vector<4x4x1xf32> -> vector<4x4x1xf32>
    %37 = vector.broadcast %36 : vector<4x4x1xf32> to vector<4x4x4xf32>
    %38 = arith.mulf %33, %37 : vector<4x4x4xf32>
    %39 = arith.truncf %38 : vector<4x4x4xf32> to vector<4x4x4xbf16>
    %cst_19 = arith.constant dense<0.000000e+00> : vector<4x4x8xf32>
    %40 = tpu.matmul %39, %25, %cst_19 {dimension_numbers = #tpu.dot_dimension_numbers<[2], [1], [1], [2], [0, 0, 0, 1, 1, 2], [0], [0]>} : vector<4x4x4xbf16>, vector<4x4x8xbf16>, vector<4x4x8xf32> -> vector<4x4x8xf32>
    %41 = arith.truncf %40 : vector<4x4x8xf32> to vector<4x4x8xbf16>
    %c0_20 = arith.constant 0 : index
    %c0_21 = arith.constant 0 : index
    %c8 = arith.constant 8 : index
    %42 = vector.load %arg4[%c0_20, %c0_21, %c8] : memref<4x4x32xbf16, #tpu.memory_space<vmem>>, vector<4x4x8xbf16>
    tpu.vector_store %arg4[%c0_20, %c0_21, %c8], %41 {strides = array<i32>} : memref<4x4x32xbf16, #tpu.memory_space<vmem>>, vector<4x4x8xbf16>,
    %43 = vector.extract_strided_slice %0 {offsets = [0, 0, 16], sizes = [4, 4, 8], strides = [1, 1, 1]} : vector<4x4x32xbf16> to vector<4x4x8xbf16>
    %44 = vector.extract_strided_slice %1 {offsets = [0, 0, 16], sizes = [4, 4, 8], strides = [1, 1, 1]} : vector<4x4x32xbf16> to vector<4x4x8xbf16>
    %45 = vector.extract_strided_slice %2 {offsets = [0, 0, 16], sizes = [4, 4, 8], strides = [1, 1, 1]} : vector<4x4x32xbf16> to vector<4x4x8xbf16>
    %cst_22 = arith.constant dense<0.000000e+00> : vector<4x4x4xf32>
    %46 = tpu.matmul %43, %44, %cst_22 {dimension_numbers = #tpu.dot_dimension_numbers<[2], [2], [1], [1], [0, 0, 0, 1, 1, 1], [0], [0]>} : vector<4x4x8xbf16>, vector<4x4x8xbf16>, vector<4x4x4xf32> -> vector<4x4x4xf32>
    %cst_23 = arith.constant 0.353553385 : f32
    %47 = vector.broadcast %cst_23 : f32 to vector<4x4x4xf32>
    %48 = arith.mulf %46, %47 : vector<4x4x4xf32>
    %cst_24 = arith.constant dense<0xFF800000> : vector<4x4xf32>
    %49 = vector.multi_reduction <maximumf>, %48, %cst_24 [2] : vector<4x4x4xf32> to vector<4x4xf32>
    %50 = vector.shape_cast %49 : vector<4x4xf32> to vector<4x4x1xf32>
    %51 = vector.broadcast %50 : vector<4x4x1xf32> to vector<4x4x4xf32>
    %52 = arith.subf %48, %51 : vector<4x4x4xf32>
    %53 = math.exp %52 : vector<4x4x4xf32>
    %cst_25 = arith.constant dense<0.000000e+00> : vector<4x4xf32>
    %54 = vector.multi_reduction <add>, %53, %cst_25 [2] : vector<4x4x4xf32> to vector<4x4xf32>
    %55 = vector.shape_cast %54 : vector<4x4xf32> to vector<4x4x1xf32>
    %56 = tpu.reciprocal %55 {approx = true} : vector<4x4x1xf32> -> vector<4x4x1xf32>
    %57 = vector.broadcast %56 : vector<4x4x1xf32> to vector<4x4x4xf32>
    %58 = arith.mulf %53, %57 : vector<4x4x4xf32>
    %59 = arith.truncf %58 : vector<4x4x4xf32> to vector<4x4x4xbf16>
    %cst_26 = arith.constant dense<0.000000e+00> : vector<4x4x8xf32>
    %60 = tpu.matmul %59, %45, %cst_26 {dimension_numbers = #tpu.dot_dimension_numbers<[2], [1], [1], [2], [0, 0, 0, 1, 1, 2], [0], [0]>} : vector<4x4x4xbf16>, vector<4x4x8xbf16>, vector<4x4x8xf32> -> vector<4x4x8xf32>
    %61 = arith.truncf %60 : vector<4x4x8xf32> to vector<4x4x8xbf16>
    %c0_27 = arith.constant 0 : index
    %c0_28 = arith.constant 0 : index
    %c16 = arith.constant 16 : index
    %62 = vector.load %arg4[%c0_27, %c0_28, %c16] : memref<4x4x32xbf16, #tpu.memory_space<vmem>>, vector<4x4x8xbf16>
    tpu.vector_store %arg4[%c0_27, %c0_28, %c16], %61 {strides = array<i32>} : memref<4x4x32xbf16, #tpu.memory_space<vmem>>, vector<4x4x8xbf16>,
    %63 = vector.extract_strided_slice %0 {offsets = [0, 0, 24], sizes = [4, 4, 8], strides = [1, 1, 1]} : vector<4x4x32xbf16> to vector<4x4x8xbf16>
    %64 = vector.extract_strided_slice %1 {offsets = [0, 0, 24], sizes = [4, 4, 8], strides = [1, 1, 1]} : vector<4x4x32xbf16> to vector<4x4x8xbf16>
    %65 = vector.extract_strided_slice %2 {offsets = [0, 0, 24], sizes = [4, 4, 8], strides = [1, 1, 1]} : vector<4x4x32xbf16> to vector<4x4x8xbf16>
    %cst_29 = arith.constant dense<0.000000e+00> : vector<4x4x4xf32>
    %66 = tpu.matmul %63, %64, %cst_29 {dimension_numbers = #tpu.dot_dimension_numbers<[2], [2], [1], [1], [0, 0, 0, 1, 1, 1], [0], [0]>} : vector<4x4x8xbf16>, vector<4x4x8xbf16>, vector<4x4x4xf32> -> vector<4x4x4xf32>
    %cst_30 = arith.constant 0.353553385 : f32
    %67 = vector.broadcast %cst_30 : f32 to vector<4x4x4xf32>
    %68 = arith.mulf %66, %67 : vector<4x4x4xf32>
    %cst_31 = arith.constant dense<0xFF800000> : vector<4x4xf32>
    %69 = vector.multi_reduction <maximumf>, %68, %cst_31 [2] : vector<4x4x4xf32> to vector<4x4xf32>
    %70 = vector.shape_cast %69 : vector<4x4xf32> to vector<4x4x1xf32>
    %71 = vector.broadcast %70 : vector<4x4x1xf32> to vector<4x4x4xf32>
    %72 = arith.subf %68, %71 : vector<4x4x4xf32>
    %73 = math.exp %72 : vector<4x4x4xf32>
    %cst_32 = arith.constant dense<0.000000e+00> : vector<4x4xf32>
    %74 = vector.multi_reduction <add>, %73, %cst_32 [2] : vector<4x4x4xf32> to vector<4x4xf32>
    %75 = vector.shape_cast %74 : vector<4x4xf32> to vector<4x4x1xf32>
    %76 = tpu.reciprocal %75 {approx = true} : vector<4x4x1xf32> -> vector<4x4x1xf32>
    %77 = vector.broadcast %76 : vector<4x4x1xf32> to vector<4x4x4xf32>
    %78 = arith.mulf %73, %77 : vector<4x4x4xf32>
    %79 = arith.truncf %78 : vector<4x4x4xf32> to vector<4x4x4xbf16>
    %cst_33 = arith.constant dense<0.000000e+00> : vector<4x4x8xf32>
    %80 = tpu.matmul %79, %65, %cst_33 {dimension_numbers = #tpu.dot_dimension_numbers<[2], [1], [1], [2], [0, 0, 0, 1, 1, 2], [0], [0]>} : vector<4x4x4xbf16>, vector<4x4x8xbf16>, vector<4x4x8xf32> -> vector<4x4x8xf32>
    %81 = arith.truncf %80 : vector<4x4x8xf32> to vector<4x4x8xbf16>
    %c0_34 = arith.constant 0 : index
    %c0_35 = arith.constant 0 : index
    %c24 = arith.constant 24 : index
    %82 = vector.load %arg4[%c0_34, %c0_35, %c24] : memref<4x4x32xbf16, #tpu.memory_space<vmem>>, vector<4x4x8xbf16>
    tpu.vector_store %arg4[%c0_34, %c0_35, %c24], %81 {strides = array<i32>} : memref<4x4x32xbf16, #tpu.memory_space<vmem>>, vector<4x4x8xbf16>,
    return
  }
  func.func @transform_0(%arg0: i32) -> (i32, i32, i32) {
    %c0_i32 = arith.constant 0 : i32
    %c0_i32_0 = arith.constant 0 : i32
    %c0_i32_1 = arith.constant 0 : i32
    return %arg0, %c0_i32, %c0_i32_0 : i32, i32, i32
  }
  func.func @transform_1(%arg0: i32) -> (i32, i32, i32) {
    %c0_i32 = arith.constant 0 : i32
    %c0_i32_0 = arith.constant 0 : i32
    %c0_i32_1 = arith.constant 0 : i32
    return %arg0, %c0_i32, %c0_i32_0 : i32, i32, i32
  }
  func.func @transform_2(%arg0: i32) -> (i32, i32, i32) {
    %c0_i32 = arith.constant 0 : i32
    %c0_i32_0 = arith.constant 0 : i32
    %c0_i32_1 = arith.constant 0 : i32
    return %arg0, %c0_i32, %c0_i32_0 : i32, i32, i32
  }
  func.func @transform_3(%arg0: i32) -> (i32, i32, i32) {
    %c0_i32 = arith.constant 0 : i32
    %c0_i32_0 = arith.constant 0 : i32
    %c0_i32_1 = arith.constant 0 : i32
    return %arg0, %c0_i32, %c0_i32_0 : i32, i32, i32
  }
}

module attributes {stable_mosaic.version = 11 : i64} {
  func.func @_linear_kernel(%arg0: i32, %arg1: i32, %arg2: i32, %arg3: memref<32x32xbf16, #tpu.memory_space<vmem>>, %arg4: memref<32x32xbf16, #tpu.memory_space<vmem>>, %arg5: memref<1x32xf32, #tpu.memory_space<vmem>>, %arg6: memref<32x32xbf16, #tpu.memory_space<vmem>>, %arg7: memref<32x32xf32, #tpu.memory_space<vmem>>) attributes {dimension_semantics = [#tpu.dimension_semantics<parallel>, #tpu.dimension_semantics<parallel>, #tpu.dimension_semantics<arbitrary>], iteration_bounds = array<i64: 2, 1, 1>, scalar_prefetch = 0 : i64, scratch_operands = 1 : i64, tpu.core_type = #tpu.core_type<tc>, window_params = [{transform_indices = @transform_0, window_bounds = array<i64: 32, 32>}, {transform_indices = @transform_1, window_bounds = array<i64: 32, 32>}, {transform_indices = @transform_2, window_bounds = array<i64: 1, 32>}, {transform_indices = @transform_3, window_bounds = array<i64: 32, 32>}]} {
    %c0_i32 = arith.constant 0 : i32
    %0 = arith.cmpi eq, %arg2, %c0_i32 : i32
    %1 = arith.extui %0 : i1 to i32
    %c0_i32_0 = arith.constant 0 : i32
    %2 = arith.cmpi ne, %1, %c0_i32_0 : i32
    scf.if %2 {
      %cst_10 = arith.constant 0.000000e+00 : f32
      %12 = vector.broadcast %cst_10 : f32 to vector<32x32xf32>
      %c0_11 = arith.constant 0 : index
      %c0_12 = arith.constant 0 : index
      %13 = vector.load %arg7[%c0_11, %c0_12] : memref<32x32xf32, #tpu.memory_space<vmem>>, vector<32x32xf32>
      tpu.vector_store %arg7[%c0_11, %c0_12], %12 {strides = array<i32>} : memref<32x32xf32, #tpu.memory_space<vmem>>, vector<32x32xf32>,
    } else {
    }
    %c0 = arith.constant 0 : index
    %c0_1 = arith.constant 0 : index
    %3 = vector.load %arg7[%c0, %c0_1] : memref<32x32xf32, #tpu.memory_space<vmem>>, vector<32x32xf32>
    %c0_2 = arith.constant 0 : index
    %c0_3 = arith.constant 0 : index
    %4 = vector.load %arg3[%c0_2, %c0_3] : memref<32x32xbf16, #tpu.memory_space<vmem>>, vector<32x32xbf16>
    %c0_4 = arith.constant 0 : index
    %c0_5 = arith.constant 0 : index
    %5 = vector.load %arg4[%c0_4, %c0_5] : memref<32x32xbf16, #tpu.memory_space<vmem>>, vector<32x32xbf16>
    %cst = arith.constant dense<0.000000e+00> : vector<32x32xf32>
    %6 = tpu.matmul %4, %5, %cst {dimension_numbers = #tpu.dot_dimension_numbers<[1], [0], [0], [1], [0, 0, 1, 1], [], []>} : vector<32x32xbf16>, vector<32x32xbf16>, vector<32x32xf32> -> vector<32x32xf32>
    %7 = arith.addf %3, %6 : vector<32x32xf32>
    %c0_6 = arith.constant 0 : index
    %c0_7 = arith.constant 0 : index
    %8 = vector.load %arg7[%c0_6, %c0_7] : memref<32x32xf32, #tpu.memory_space<vmem>>, vector<32x32xf32>
    tpu.vector_store %arg7[%c0_6, %c0_7], %7 {strides = array<i32>} : memref<32x32xf32, #tpu.memory_space<vmem>>, vector<32x32xf32>,
    %c0_i32_8 = arith.constant 0 : i32
    %9 = arith.cmpi eq, %arg2, %c0_i32_8 : i32
    %10 = arith.extui %9 : i1 to i32
    %c0_i32_9 = arith.constant 0 : i32
    %11 = arith.cmpi ne, %10, %c0_i32_9 : i32
    scf.if %11 {
      %c0_10 = arith.constant 0 : index
      %c0_11 = arith.constant 0 : index
      %12 = vector.load %arg7[%c0_10, %c0_11] : memref<32x32xf32, #tpu.memory_space<vmem>>, vector<32x32xf32>
      %c0_12 = arith.constant 0 : index
      %c0_13 = arith.constant 0 : index
      %13 = vector.load %arg5[%c0_12, %c0_13] : memref<1x32xf32, #tpu.memory_space<vmem>>, vector<1x32xf32>
      %14 = vector.broadcast %13 : vector<1x32xf32> to vector<32x32xf32>
      %15 = arith.addf %12, %14 : vector<32x32xf32>
      %16 = arith.truncf %15 : vector<32x32xf32> to vector<32x32xbf16>
      %c0_14 = arith.constant 0 : index
      %c0_15 = arith.constant 0 : index
      %17 = vector.load %arg6[%c0_14, %c0_15] : memref<32x32xbf16, #tpu.memory_space<vmem>>, vector<32x32xbf16>
      tpu.vector_store %arg6[%c0_14, %c0_15], %16 {strides = array<i32>} : memref<32x32xbf16, #tpu.memory_space<vmem>>, vector<32x32xbf16>,
    } else {
    }
    return
  }
  func.func @transform_0(%arg0: i32, %arg1: i32, %arg2: i32) -> (i32, i32) {
    %c0_i32 = arith.constant 0 : i32
    return %arg0, %arg2 : i32, i32
  }
  func.func @transform_1(%arg0: i32, %arg1: i32, %arg2: i32) -> (i32, i32) {
    %c0_i32 = arith.constant 0 : i32
    return %arg2, %arg1 : i32, i32
  }
  func.func @transform_2(%arg0: i32, %arg1: i32, %arg2: i32) -> (i32, i32) {
    %c0_i32 = arith.constant 0 : i32
    %c0_i32_0 = arith.constant 0 : i32
    return %c0_i32, %arg1 : i32, i32
  }
  func.func @transform_3(%arg0: i32, %arg1: i32, %arg2: i32) -> (i32, i32) {
    %c0_i32 = arith.constant 0 : i32
    return %arg0, %arg1 : i32, i32
  }
}

module attributes {stable_mosaic.version = 11 : i64} {
  func.func @_attn_kernel(%arg0: i32, %arg1: memref<4x5x32xbf16, #tpu.memory_space<vmem>>, %arg2: memref<4x5x32xbf16, #tpu.memory_space<vmem>>, %arg3: memref<4x5x32xbf16, #tpu.memory_space<vmem>>, %arg4: memref<4x5x32xbf16, #tpu.memory_space<vmem>>) attributes {dimension_semantics = [#tpu.dimension_semantics<parallel>], iteration_bounds = array<i64: 2>, scalar_prefetch = 0 : i64, scratch_operands = 0 : i64, tpu.core_type = #tpu.core_type<tc>, window_params = [{transform_indices = @transform_0, window_bounds = array<i64: 4, 5, 32>}, {transform_indices = @transform_1, window_bounds = array<i64: 4, 5, 32>}, {transform_indices = @transform_2, window_bounds = array<i64: 4, 5, 32>}, {transform_indices = @transform_3, window_bounds = array<i64: 4, 5, 32>}]} {
    %c0 = arith.constant 0 : index
    %c0_0 = arith.constant 0 : index
    %c0_1 = arith.constant 0 : index
    %0 = vector.load %arg1[%c0, %c0_0, %c0_1] : memref<4x5x32xbf16, #tpu.memory_space<vmem>>, vector<4x5x32xbf16>
    %c0_2 = arith.constant 0 : index
    %c0_3 = arith.constant 0 : index
    %c0_4 = arith.constant 0 : index
    %1 = vector.load %arg2[%c0_2, %c0_3, %c0_4] : memref<4x5x32xbf16, #tpu.memory_space<vmem>>, vector<4x5x32xbf16>
    %c0_5 = arith.constant 0 : index
    %c0_6 = arith.constant 0 : index
    %c0_7 = arith.constant 0 : index
    %2 = vector.load %arg3[%c0_5, %c0_6, %c0_7] : memref<4x5x32xbf16, #tpu.memory_space<vmem>>, vector<4x5x32xbf16>
    %3 = vector.extract_strided_slice %0 {offsets = [0, 0, 0], sizes = [4, 5, 8], strides = [1, 1, 1]} : vector<4x5x32xbf16> to vector<4x5x8xbf16>
    %4 = vector.extract_strided_slice %1 {offsets = [0, 0, 0], sizes = [4, 5, 8], strides = [1, 1, 1]} : vector<4x5x32xbf16> to vector<4x5x8xbf16>
    %5 = vector.extract_strided_slice %2 {offsets = [0, 0, 0], sizes = [4, 5, 8], strides = [1, 1, 1]} : vector<4x5x32xbf16> to vector<4x5x8xbf16>
    %cst = arith.constant dense<0.000000e+00> : vector<4x5x5xf32>
    %6 = tpu.matmul %3, %4, %cst {dimension_numbers = #tpu.dot_dimension_numbers<[2], [2], [1], [1], [0, 0, 0, 1, 1, 1], [0], [0]>} : vector<4x5x8xbf16>, vector<4x5x8xbf16>, vector<4x5x5xf32> -> vector<4x5x5xf32>
    %cst_8 = arith.constant 0.353553385 : f32
    %7 = vector.broadcast %cst_8 : f32 to vector<4x5x5xf32>
    %8 = arith.mulf %6, %7 : vector<4x5x5xf32>
    %cst_9 = arith.constant dense<0xFF800000> : vector<4x5xf32>
    %9 = vector.multi_reduction <maximumf>, %8, %cst_9 [2] : vector<4x5x5xf32> to vector<4x5xf32>
    %10 = vector.shape_cast %9 : vector<4x5xf32> to vector<4x5x1xf32>
    %11 = vector.broadcast %10 : vector<4x5x1xf32> to vector<4x5x5xf32>
    %12 = arith.subf %8, %11 : vector<4x5x5xf32>
    %13 = math.exp %12 : vector<4x5x5xf32>
    %cst_10 = arith.constant dense<0.000000e+00> : vector<4x5xf32>
    %14 = vector.multi_reduction <add>, %13, %cst_10 [2] : vector<4x5x5xf32> to vector<4x5xf32>
    %15 = vector.shape_cast %14 : vector<4x5xf32> to vector<4x5x1xf32>
    %16 = tpu.reciprocal %15 {approx = true} : vector<4x5x1xf32> -> vector<4x5x1xf32>
    %17 = vector.broadcast %16 : vector<4x5x1xf32> to vector<4x5x5xf32>
    %18 = arith.mulf %13, %17 : vector<4x5x5xf32>
    %19 = arith.truncf %18 : vector<4x5x5xf32> to vector<4x5x5xbf16>
    %cst_11 = arith.constant dense<0.000000e+00> : vector<4x5x8xf32>
    %20 = tpu.matmul %19, %5, %cst_11 {dimension_numbers = #tpu.dot_dimension_numbers<[2], [1], [1], [2], [0, 0, 0, 1, 1, 2], [0], [0]>} : vector<4x5x5xbf16>, vector<4x5x8xbf16>, vector<4x5x8xf32> -> vector<4x5x8xf32>
    %21 = arith.truncf %20 : vector<4x5x8xf32> to vector<4x5x8xbf16>
    %c0_12 = arith.constant 0 : index
    %c0_13 = arith.constant 0 : index
    %c0_14 = arith.constant 0 : index
    %22 = vector.load %arg4[%c0_12, %c0_13, %c0_14] : memref<4x5x32xbf16, #tpu.memory_space<vmem>>, vector<4x5x8xbf16>
    tpu.vector_store %arg4[%c0_12, %c0_13, %c0_14], %21 {strides = array<i32>} : memref<4x5x32xbf16, #tpu.memory_space<vmem>>, vector<4x5x8xbf16>,
    %23 = vector.extract_strided_slice %0 {offsets = [0, 0, 8], sizes = [4, 5, 8], strides = [1, 1, 1]} : vector<4x5x32xbf16> to vector<4x5x8xbf16>
    %24 = vector.extract_strided_slice %1 {offsets = [0, 0, 8], sizes = [4, 5, 8], strides = [1, 1, 1]} : vector<4x5x32xbf16> to vector<4x5x8xbf16>
    %25 = vector.extract_strided_slice %2 {offsets = [0, 0, 8], sizes = [4, 5, 8], strides = [1, 1, 1]} : vector<4x5x32xbf16> to vector<4x5x8xbf16>
    %cst_15 = arith.constant dense<0.000000e+00> : vector<4x5x5xf32>
    %26 = tpu.matmul %23, %24, %cst_15 {dimension_numbers = #tpu.dot_dimension_numbers<[2], [2], [1], [1], [0, 0, 0, 1, 1, 1], [0], [0]>} : vector<4x5x8xbf16>, vector<4x5x8xbf16>, vector<4x5x5xf32> -> vector<4x5x5xf32>
    %cst_16 = arith.constant 0.353553385 : f32
    %27 = vector.broadcast %cst_16 : f32 to vector<4x5x5xf32>
    %28 = arith.mulf %26, %27 : vector<4x5x5xf32>
    %cst_17 = arith.constant dense<0xFF800000> : vector<4x5xf32>
    %29 = vector.multi_reduction <maximumf>, %28, %cst_17 [2] : vector<4x5x5xf32> to vector<4x5xf32>
    %30 = vector.shape_cast %29 : vector<4x5xf32> to vector<4x5x1xf32>
    %31 = vector.broadcast %30 : vector<4x5x1xf32> to vector<4x5x5xf32>
    %32 = arith.subf %28, %31 : vector<4x5x5xf32>
    %33 = math.exp %32 : vector<4x5x5xf32>
    %cst_18 = arith.constant dense<0.000000e+00> : vector<4x5xf32>
    %34 = vector.multi_reduction <add>, %33, %cst_18 [2] : vector<4x5x5xf32> to vector<4x5xf32>
    %35 = vector.shape_cast %34 : vector<4x5xf32> to vector<4x5x1xf32>
    %36 = tpu.reciprocal %35 {approx = true} : vector<4x5x1xf32> -> vector<4x5x1xf32>
    %37 = vector.broadcast %36 : vector<4x5x1xf32> to vector<4x5x5xf32>
    %38 = arith.mulf %33, %37 : vector<4x5x5xf32>
    %39 = arith.truncf %38 : vector<4x5x5xf32> to vector<4x5x5xbf16>
    %cst_19 = arith.constant dense<0.000000e+00> : vector<4x5x8xf32>
    %40 = tpu.matmul %39, %25, %cst_19 {dimension_numbers = #tpu.dot_dimension_numbers<[2], [1], [1], [2], [0, 0, 0, 1, 1, 2], [0], [0]>} : vector<4x5x5xbf16>, vector<4x5x8xbf16>, vector<4x5x8xf32> -> vector<4x5x8xf32>
    %41 = arith.truncf %40 : vector<4x5x8xf32> to vector<4x5x8xbf16>
    %c0_20 = arith.constant 0 : index
    %c0_21 = arith.constant 0 : index
    %c8 = arith.constant 8 : index
    %42 = vector.load %arg4[%c0_20, %c0_21, %c8] : memref<4x5x32xbf16, #tpu.memory_space<vmem>>, vector<4x5x8xbf16>
    tpu.vector_store %arg4[%c0_20, %c0_21, %c8], %41 {strides = array<i32>} : memref<4x5x32xbf16, #tpu.memory_space<vmem>>, vector<4x5x8xbf16>,
    %43 = vector.extract_strided_slice %0 {offsets = [0, 0, 16], sizes = [4, 5, 8], strides = [1, 1, 1]} : vector<4x5x32xbf16> to vector<4x5x8xbf16>
    %44 = vector.extract_strided_slice %1 {offsets = [0, 0, 16], sizes = [4, 5, 8], strides = [1, 1, 1]} : vector<4x5x32xbf16> to vector<4x5x8xbf16>
    %45 = vector.extract_strided_slice %2 {offsets = [0, 0, 16], sizes = [4, 5, 8], strides = [1, 1, 1]} : vector<4x5x32xbf16> to vector<4x5x8xbf16>
    %cst_22 = arith.constant dense<0.000000e+00> : vector<4x5x5xf32>
    %46 = tpu.matmul %43, %44, %cst_22 {dimension_numbers = #tpu.dot_dimension_numbers<[2], [2], [1], [1], [0, 0, 0, 1, 1, 1], [0], [0]>} : vector<4x5x8xbf16>, vector<4x5x8xbf16>, vector<4x5x5xf32> -> vector<4x5x5xf32>
    %cst_23 = arith.constant 0.353553385 : f32
    %47 = vector.broadcast %cst_23 : f32 to vector<4x5x5xf32>
    %48 = arith.mulf %46, %47 : vector<4x5x5xf32>
    %cst_24 = arith.constant dense<0xFF800000> : vector<4x5xf32>
    %49 = vector.multi_reduction <maximumf>, %48, %cst_24 [2] : vector<4x5x5xf32> to vector<4x5xf32>
    %50 = vector.shape_cast %49 : vector<4x5xf32> to vector<4x5x1xf32>
    %51 = vector.broadcast %50 : vector<4x5x1xf32> to vector<4x5x5xf32>
    %52 = arith.subf %48, %51 : vector<4x5x5xf32>
    %53 = math.exp %52 : vector<4x5x5xf32>
    %cst_25 = arith.constant dense<0.000000e+00> : vector<4x5xf32>
    %54 = vector.multi_reduction <add>, %53, %cst_25 [2] : vector<4x5x5xf32> to vector<4x5xf32>
    %55 = vector.shape_cast %54 : vector<4x5xf32> to vector<4x5x1xf32>
    %56 = tpu.reciprocal %55 {approx = true} : vector<4x5x1xf32> -> vector<4x5x1xf32>
    %57 = vector.broadcast %56 : vector<4x5x1xf32> to vector<4x5x5xf32>
    %58 = arith.mulf %53, %57 : vector<4x5x5xf32>
    %59 = arith.truncf %58 : vector<4x5x5xf32> to vector<4x5x5xbf16>
    %cst_26 = arith.constant dense<0.000000e+00> : vector<4x5x8xf32>
    %60 = tpu.matmul %59, %45, %cst_26 {dimension_numbers = #tpu.dot_dimension_numbers<[2], [1], [1], [2], [0, 0, 0, 1, 1, 2], [0], [0]>} : vector<4x5x5xbf16>, vector<4x5x8xbf16>, vector<4x5x8xf32> -> vector<4x5x8xf32>
    %61 = arith.truncf %60 : vector<4x5x8xf32> to vector<4x5x8xbf16>
    %c0_27 = arith.constant 0 : index
    %c0_28 = arith.constant 0 : index
    %c16 = arith.constant 16 : index
    %62 = vector.load %arg4[%c0_27, %c0_28, %c16] : memref<4x5x32xbf16, #tpu.memory_space<vmem>>, vector<4x5x8xbf16>
    tpu.vector_store %arg4[%c0_27, %c0_28, %c16], %61 {strides = array<i32>} : memref<4x5x32xbf16, #tpu.memory_space<vmem>>, vector<4x5x8xbf16>,
    %63 = vector.extract_strided_slice %0 {offsets = [0, 0, 24], sizes = [4, 5, 8], strides = [1, 1, 1]} : vector<4x5x32xbf16> to vector<4x5x8xbf16>
    %64 = vector.extract_strided_slice %1 {offsets = [0, 0, 24], sizes = [4, 5, 8], strides = [1, 1, 1]} : vector<4x5x32xbf16> to vector<4x5x8xbf16>
    %65 = vector.extract_strided_slice %2 {offsets = [0, 0, 24], sizes = [4, 5, 8], strides = [1, 1, 1]} : vector<4x5x32xbf16> to vector<4x5x8xbf16>
    %cst_29 = arith.constant dense<0.000000e+00> : vector<4x5x5xf32>
    %66 = tpu.matmul %63, %64, %cst_29 {dimension_numbers = #tpu.dot_dimension_numbers<[2], [2], [1], [1], [0, 0, 0, 1, 1, 1], [0], [0]>} : vector<4x5x8xbf16>, vector<4x5x8xbf16>, vector<4x5x5xf32> -> vector<4x5x5xf32>
    %cst_30 = arith.constant 0.353553385 : f32
    %67 = vector.broadcast %cst_30 : f32 to vector<4x5x5xf32>
    %68 = arith.mulf %66, %67 : vector<4x5x5xf32>
    %cst_31 = arith.constant dense<0xFF800000> : vector<4x5xf32>
    %69 = vector.multi_reduction <maximumf>, %68, %cst_31 [2] : vector<4x5x5xf32> to vector<4x5xf32>
    %70 = vector.shape_cast %69 : vector<4x5xf32> to vector<4x5x1xf32>
    %71 = vector.broadcast %70 : vector<4x5x1xf32> to vector<4x5x5xf32>
    %72 = arith.subf %68, %71 : vector<4x5x5xf32>
    %73 = math.exp %72 : vector<4x5x5xf32>
    %cst_32 = arith.constant dense<0.000000e+00> : vector<4x5xf32>
    %74 = vector.multi_reduction <add>, %73, %cst_32 [2] : vector<4x5x5xf32> to vector<4x5xf32>
    %75 = vector.shape_cast %74 : vector<4x5xf32> to vector<4x5x1xf32>
    %76 = tpu.reciprocal %75 {approx = true} : vector<4x5x1xf32> -> vector<4x5x1xf32>
    %77 = vector.broadcast %76 : vector<4x5x1xf32> to vector<4x5x5xf32>
    %78 = arith.mulf %73, %77 : vector<4x5x5xf32>
    %79 = arith.truncf %78 : vector<4x5x5xf32> to vector<4x5x5xbf16>
    %cst_33 = arith.constant dense<0.000000e+00> : vector<4x5x8xf32>
    %80 = tpu.matmul %79, %65, %cst_33 {dimension_numbers = #tpu.dot_dimension_numbers<[2], [1], [1], [2], [0, 0, 0, 1, 1, 2], [0], [0]>} : vector<4x5x5xbf16>, vector<4x5x8xbf16>, vector<4x5x8xf32> -> vector<4x5x8xf32>
    %81 = arith.truncf %80 : vector<4x5x8xf32> to vector<4x5x8xbf16>
    %c0_34 = arith.constant 0 : index
    %c0_35 = arith.constant 0 : index
    %c24 = arith.constant 24 : index
    %82 = vector.load %arg4[%c0_34, %c0_35, %c24] : memref<4x5x32xbf16, #tpu.memory_space<vmem>>, vector<4x5x8xbf16>
    tpu.vector_store %arg4[%c0_34, %c0_35, %c24], %81 {strides = array<i32>} : memref<4x5x32xbf16, #tpu.memory_space<vmem>>, vector<4x5x8xbf16>,
    return
  }
  func.func @transform_0(%arg0: i32) -> (i32, i32, i32) {
    %c0_i32 = arith.constant 0 : i32
    %c0_i32_0 = arith.constant 0 : i32
    %c0_i32_1 = arith.constant 0 : i32
    return %arg0, %c0_i32, %c0_i32_0 : i32, i32, i32
  }
  func.func @transform_1(%arg0: i32) -> (i32, i32, i32) {
    %c0_i32 = arith.constant 0 : i32
    %c0_i32_0 = arith.constant 0 : i32
    %c0_i32_1 = arith.constant 0 : i32
    return %arg0, %c0_i32, %c0_i32_0 : i32, i32, i32
  }
  func.func @transform_2(%arg0: i32) -> (i32, i32, i32) {
    %c0_i32 = arith.constant 0 : i32
    %c0_i32_0 = arith.constant 0 : i32
    %c0_i32_1 = arith.constant 0 : i32
    return %arg0, %c0_i32, %c0_i32_0 : i32, i32, i32
  }
  func.func @transform_3(%arg0: i32) -> (i32, i32, i32) {
    %c0_i32 = arith.constant 0 : i32
    %c0_i32_0 = arith.constant 0 : i32
    %c0_i32_1 = arith.constant 0 : i32
    return %arg0, %c0_i32, %c0_i32_0 : i32, i32, i32
  }
}

module attributes {stable_mosaic.version = 11 : i64} {
  func.func @_ln_qkv_kernel(%arg0: i32, %arg1: memref<32x32xbf16, #tpu.memory_space<vmem>>, %arg2: memref<1x32xf32, #tpu.memory_space<vmem>>, %arg3: memref<1x32xf32, #tpu.memory_space<vmem>>, %arg4: memref<32x96xbf16, #tpu.memory_space<vmem>>, %arg5: memref<1x96xf32, #tpu.memory_space<vmem>>, %arg6: memref<32x32xbf16, #tpu.memory_space<vmem>>, %arg7: memref<32x32xbf16, #tpu.memory_space<vmem>>, %arg8: memref<32x32xbf16, #tpu.memory_space<vmem>>) attributes {dimension_semantics = [#tpu.dimension_semantics<parallel>], iteration_bounds = array<i64: 2>, scalar_prefetch = 0 : i64, scratch_operands = 0 : i64, tpu.core_type = #tpu.core_type<tc>, window_params = [{transform_indices = @transform_0, window_bounds = array<i64: 32, 32>}, {pipeline_mode = #tpu.pipeline_mode<synchronous>, transform_indices = @transform_1, window_bounds = array<i64: 1, 32>}, {pipeline_mode = #tpu.pipeline_mode<synchronous>, transform_indices = @transform_2, window_bounds = array<i64: 1, 32>}, {pipeline_mode = #tpu.pipeline_mode<synchronous>, transform_indices = @transform_3, window_bounds = array<i64: 32, 96>}, {pipeline_mode = #tpu.pipeline_mode<synchronous>, transform_indices = @transform_4, window_bounds = array<i64: 1, 96>}, {transform_indices = @transform_5, window_bounds = array<i64: 32, 32>}, {transform_indices = @transform_6, window_bounds = array<i64: 32, 32>}, {transform_indices = @transform_7, window_bounds = array<i64: 32, 32>}]} {
    %c0 = arith.constant 0 : index
    %c0_0 = arith.constant 0 : index
    %0 = vector.load %arg1[%c0, %c0_0] : memref<32x32xbf16, #tpu.memory_space<vmem>>, vector<32x32xbf16>
    %1 = arith.extf %0 : vector<32x32xbf16> to vector<32x32xf32>
    %c0_1 = arith.constant 0 : index
    %c0_2 = arith.constant 0 : index
    %2 = vector.load %arg2[%c0_1, %c0_2] : memref<1x32xf32, #tpu.memory_space<vmem>>, vector<1x32xf32>
    %c0_3 = arith.constant 0 : index
    %c0_4 = arith.constant 0 : index
    %3 = vector.load %arg3[%c0_3, %c0_4] : memref<1x32xf32, #tpu.memory_space<vmem>>, vector<1x32xf32>
    %cst = arith.constant dense<0.000000e+00> : vector<32xf32>
    %4 = vector.multi_reduction <add>, %1, %cst [1] : vector<32x32xf32> to vector<32xf32>
    %5 = vector.shape_cast %4 : vector<32xf32> to vector<32x1xf32>
    %cst_5 = arith.constant 3.200000e+01 : f32
    %6 = vector.broadcast %cst_5 : f32 to vector<32x1xf32>
    %7 = arith.divf %5, %6 : vector<32x1xf32>
    %8 = vector.broadcast %7 : vector<32x1xf32> to vector<32x32xf32>
    %9 = arith.subf %1, %8 : vector<32x32xf32>
    %10 = arith.mulf %9, %9 : vector<32x32xf32>
    %cst_6 = arith.constant dense<0.000000e+00> : vector<32xf32>
    %11 = vector.multi_reduction <add>, %10, %cst_6 [1] : vector<32x32xf32> to vector<32xf32>
    %12 = vector.shape_cast %11 : vector<32xf32> to vector<32x1xf32>
    %cst_7 = arith.constant 3.200000e+01 : f32
    %13 = vector.broadcast %cst_7 : f32 to vector<32x1xf32>
    %14 = arith.divf %12, %13 : vector<32x1xf32>
    %cst_8 = arith.constant 9.99999974E-6 : f32
    %15 = vector.broadcast %cst_8 : f32 to vector<32x1xf32>
    %16 = arith.addf %14, %15 : vector<32x1xf32>
    %17 = math.rsqrt %16 : vector<32x1xf32>
    %18 = vector.broadcast %17 : vector<32x1xf32> to vector<32x32xf32>
    %19 = arith.mulf %9, %18 : vector<32x32xf32>
    %20 = vector.broadcast %2 : vector<1x32xf32> to vector<32x32xf32>
    %21 = arith.mulf %19, %20 : vector<32x32xf32>
    %22 = vector.broadcast %3 : vector<1x32xf32> to vector<32x32xf32>
    %23 = arith.addf %21, %22 : vector<32x32xf32>
    %24 = arith.truncf %23 : vector<32x32xf32> to vector<32x32xbf16>
    %c0_9 = arith.constant 0 : index
    %c0_10 = arith.constant 0 : index
    %25 = vector.load %arg4[%c0_9, %c0_10] : memref<32x96xbf16, #tpu.memory_space<vmem>>, vector<32x96xbf16>
    %cst_11 = arith.constant dense<0.000000e+00> : vector<32x96xf32>
    %26 = tpu.matmul %24, %25, %cst_11 {dimension_numbers = #tpu.dot_dimension_numbers<[1], [0], [0], [1], [0, 0, 1, 1], [], []>} : vector<32x32xbf16>, vector<32x96xbf16>, vector<32x96xf32> -> vector<32x96xf32>
    %c0_12 = arith.constant 0 : index
    %c0_13 = arith.constant 0 : index
    %27 = vector.load %arg5[%c0_12, %c0_13] : memref<1x96xf32, #tpu.memory_space<vmem>>, vector<1x96xf32>
    %28 = vector.broadcast %27 : vector<1x96xf32> to vector<32x96xf32>
    %29 = arith.addf %26, %28 : vector<32x96xf32>
    %30 = vector.extract_strided_slice %29 {offsets = [0, 0], sizes = [32, 32], strides = [1, 1]} : vector<32x96xf32> to vector<32x32xf32>
    %31 = arith.truncf %30 : vector<32x32xf32> to vector<32x32xbf16>
    %c0_14 = arith.constant 0 : index
    %c0_15 = arith.constant 0 : index
    %32 = vector.load %arg6[%c0_14, %c0_15] : memref<32x32xbf16, #tpu.memory_space<vmem>>, vector<32x32xbf16>
    tpu.vector_store %arg6[%c0_14, %c0_15], %31 {strides = array<i32>} : memref<32x32xbf16, #tpu.memory_space<vmem>>, vector<32x32xbf16>,
    %33 = vector.extract_strided_slice %29 {offsets = [0, 32], sizes = [32, 32], strides = [1, 1]} : vector<32x96xf32> to vector<32x32xf32>
    %34 = arith.truncf %33 : vector<32x32xf32> to vector<32x32xbf16>
    %c0_16 = arith.constant 0 : index
    %c0_17 = arith.constant 0 : index
    %35 = vector.load %arg7[%c0_16, %c0_17] : memref<32x32xbf16, #tpu.memory_space<vmem>>, vector<32x32xbf16>
    tpu.vector_store %arg7[%c0_16, %c0_17], %34 {strides = array<i32>} : memref<32x32xbf16, #tpu.memory_space<vmem>>, vector<32x32xbf16>,
    %36 = vector.extract_strided_slice %29 {offsets = [0, 64], sizes = [32, 32], strides = [1, 1]} : vector<32x96xf32> to vector<32x32xf32>
    %37 = arith.truncf %36 : vector<32x32xf32> to vector<32x32xbf16>
    %c0_18 = arith.constant 0 : index
    %c0_19 = arith.constant 0 : index
    %38 = vector.load %arg8[%c0_18, %c0_19] : memref<32x32xbf16, #tpu.memory_space<vmem>>, vector<32x32xbf16>
    tpu.vector_store %arg8[%c0_18, %c0_19], %37 {strides = array<i32>} : memref<32x32xbf16, #tpu.memory_space<vmem>>, vector<32x32xbf16>,
    return
  }
  func.func @transform_0(%arg0: i32) -> (i32, i32) {
    %c0_i32 = arith.constant 0 : i32
    %c0_i32_0 = arith.constant 0 : i32
    return %arg0, %c0_i32 : i32, i32
  }
  func.func @transform_1(%arg0: i32) -> (i32, i32) {
    %c0_i32 = arith.constant 0 : i32
    %c0_i32_0 = arith.constant 0 : i32
    %c0_i32_1 = arith.constant 0 : i32
    return %c0_i32, %c0_i32_0 : i32, i32
  }
  func.func @transform_2(%arg0: i32) -> (i32, i32) {
    %c0_i32 = arith.constant 0 : i32
    %c0_i32_0 = arith.constant 0 : i32
    %c0_i32_1 = arith.constant 0 : i32
    return %c0_i32, %c0_i32_0 : i32, i32
  }
  func.func @transform_3(%arg0: i32) -> (i32, i32) {
    %c0_i32 = arith.constant 0 : i32
    %c0_i32_0 = arith.constant 0 : i32
    %c0_i32_1 = arith.constant 0 : i32
    return %c0_i32, %c0_i32_0 : i32, i32
  }
  func.func @transform_4(%arg0: i32) -> (i32, i32) {
    %c0_i32 = arith.constant 0 : i32
    %c0_i32_0 = arith.constant 0 : i32
    %c0_i32_1 = arith.constant 0 : i32
    return %c0_i32, %c0_i32_0 : i32, i32
  }
  func.func @transform_5(%arg0: i32) -> (i32, i32) {
    %c0_i32 = arith.constant 0 : i32
    %c0_i32_0 = arith.constant 0 : i32
    return %arg0, %c0_i32 : i32, i32
  }
  func.func @transform_6(%arg0: i32) -> (i32, i32) {
    %c0_i32 = arith.constant 0 : i32
    %c0_i32_0 = arith.constant 0 : i32
    return %arg0, %c0_i32 : i32, i32
  }
  func.func @transform_7(%arg0: i32) -> (i32, i32) {
    %c0_i32 = arith.constant 0 : i32
    %c0_i32_0 = arith.constant 0 : i32
    return %arg0, %c0_i32 : i32, i32
  }
}

module attributes {stable_mosaic.version = 11 : i64} {
  func.func @_mlp_kernel(%arg0: i32, %arg1: memref<32x32xbf16, #tpu.memory_space<vmem>>, %arg2: memref<1x32xf32, #tpu.memory_space<vmem>>, %arg3: memref<1x32xf32, #tpu.memory_space<vmem>>, %arg4: memref<32x128xbf16, #tpu.memory_space<vmem>>, %arg5: memref<1x128xf32, #tpu.memory_space<vmem>>, %arg6: memref<128x32xbf16, #tpu.memory_space<vmem>>, %arg7: memref<1x32xf32, #tpu.memory_space<vmem>>, %arg8: memref<32x32xbf16, #tpu.memory_space<vmem>>) attributes {dimension_semantics = [#tpu.dimension_semantics<parallel>], iteration_bounds = array<i64: 2>, scalar_prefetch = 0 : i64, scratch_operands = 0 : i64, tpu.core_type = #tpu.core_type<tc>, window_params = [{transform_indices = @transform_0, window_bounds = array<i64: 32, 32>}, {pipeline_mode = #tpu.pipeline_mode<synchronous>, transform_indices = @transform_1, window_bounds = array<i64: 1, 32>}, {pipeline_mode = #tpu.pipeline_mode<synchronous>, transform_indices = @transform_2, window_bounds = array<i64: 1, 32>}, {pipeline_mode = #tpu.pipeline_mode<synchronous>, transform_indices = @transform_3, window_bounds = array<i64: 32, 128>}, {pipeline_mode = #tpu.pipeline_mode<synchronous>, transform_indices = @transform_4, window_bounds = array<i64: 1, 128>}, {pipeline_mode = #tpu.pipeline_mode<synchronous>, transform_indices = @transform_5, window_bounds = array<i64: 128, 32>}, {pipeline_mode = #tpu.pipeline_mode<synchronous>, transform_indices = @transform_6, window_bounds = array<i64: 1, 32>}, {transform_indices = @transform_7, window_bounds = array<i64: 32, 32>}]} {
    %c0 = arith.constant 0 : index
    %c0_0 = arith.constant 0 : index
    %0 = vector.load %arg1[%c0, %c0_0] : memref<32x32xbf16, #tpu.memory_space<vmem>>, vector<32x32xbf16>
    %1 = arith.extf %0 : vector<32x32xbf16> to vector<32x32xf32>
    %c0_1 = arith.constant 0 : index
    %c0_2 = arith.constant 0 : index
    %2 = vector.load %arg2[%c0_1, %c0_2] : memref<1x32xf32, #tpu.memory_space<vmem>>, vector<1x32xf32>
    %c0_3 = arith.constant 0 : index
    %c0_4 = arith.constant 0 : index
    %3 = vector.load %arg3[%c0_3, %c0_4] : memref<1x32xf32, #tpu.memory_space<vmem>>, vector<1x32xf32>
    %cst = arith.constant dense<0.000000e+00> : vector<32xf32>
    %4 = vector.multi_reduction <add>, %1, %cst [1] : vector<32x32xf32> to vector<32xf32>
    %5 = vector.shape_cast %4 : vector<32xf32> to vector<32x1xf32>
    %cst_5 = arith.constant 3.200000e+01 : f32
    %6 = vector.broadcast %cst_5 : f32 to vector<32x1xf32>
    %7 = arith.divf %5, %6 : vector<32x1xf32>
    %8 = vector.broadcast %7 : vector<32x1xf32> to vector<32x32xf32>
    %9 = arith.subf %1, %8 : vector<32x32xf32>
    %10 = arith.mulf %9, %9 : vector<32x32xf32>
    %cst_6 = arith.constant dense<0.000000e+00> : vector<32xf32>
    %11 = vector.multi_reduction <add>, %10, %cst_6 [1] : vector<32x32xf32> to vector<32xf32>
    %12 = vector.shape_cast %11 : vector<32xf32> to vector<32x1xf32>
    %cst_7 = arith.constant 3.200000e+01 : f32
    %13 = vector.broadcast %cst_7 : f32 to vector<32x1xf32>
    %14 = arith.divf %12, %13 : vector<32x1xf32>
    %cst_8 = arith.constant 9.99999974E-6 : f32
    %15 = vector.broadcast %cst_8 : f32 to vector<32x1xf32>
    %16 = arith.addf %14, %15 : vector<32x1xf32>
    %17 = math.rsqrt %16 : vector<32x1xf32>
    %18 = vector.broadcast %17 : vector<32x1xf32> to vector<32x32xf32>
    %19 = arith.mulf %9, %18 : vector<32x32xf32>
    %20 = vector.broadcast %2 : vector<1x32xf32> to vector<32x32xf32>
    %21 = arith.mulf %19, %20 : vector<32x32xf32>
    %22 = vector.broadcast %3 : vector<1x32xf32> to vector<32x32xf32>
    %23 = arith.addf %21, %22 : vector<32x32xf32>
    %24 = arith.truncf %23 : vector<32x32xf32> to vector<32x32xbf16>
    %c0_9 = arith.constant 0 : index
    %c0_10 = arith.constant 0 : index
    %25 = vector.load %arg4[%c0_9, %c0_10] : memref<32x128xbf16, #tpu.memory_space<vmem>>, vector<32x128xbf16>
    %cst_11 = arith.constant dense<0.000000e+00> : vector<32x128xf32>
    %26 = tpu.matmul %24, %25, %cst_11 {dimension_numbers = #tpu.dot_dimension_numbers<[1], [0], [0], [1], [0, 0, 1, 1], [], []>} : vector<32x32xbf16>, vector<32x128xbf16>, vector<32x128xf32> -> vector<32x128xf32>
    %c0_12 = arith.constant 0 : index
    %c0_13 = arith.constant 0 : index
    %27 = vector.load %arg5[%c0_12, %c0_13] : memref<1x128xf32, #tpu.memory_space<vmem>>, vector<1x128xf32>
    %28 = vector.broadcast %27 : vector<1x128xf32> to vector<32x128xf32>
    %29 = arith.addf %26, %28 : vector<32x128xf32>
    %30 = arith.mulf %29, %29 : vector<32x128xf32>
    %31 = arith.mulf %29, %30 : vector<32x128xf32>
    %cst_14 = arith.constant 4.471500e-02 : f32
    %32 = vector.broadcast %cst_14 : f32 to vector<32x128xf32>
    %33 = arith.mulf %32, %31 : vector<32x128xf32>
    %34 = arith.addf %29, %33 : vector<32x128xf32>
    %cst_15 = arith.constant 0.797884583 : f32
    %35 = vector.broadcast %cst_15 : f32 to vector<32x128xf32>
    %36 = arith.mulf %35, %34 : vector<32x128xf32>
    %37 = math.tanh %36 : vector<32x128xf32>
    %cst_16 = arith.constant 1.000000e+00 : f32
    %38 = vector.broadcast %cst_16 : f32 to vector<32x128xf32>
    %39 = arith.addf %38, %37 : vector<32x128xf32>
    %cst_17 = arith.constant 5.000000e-01 : f32
    %40 = vector.broadcast %cst_17 : f32 to vector<32x128xf32>
    %41 = arith.mulf %40, %39 : vector<32x128xf32>
    %42 = arith.mulf %29, %41 : vector<32x128xf32>
    %43 = arith.truncf %42 : vector<32x128xf32> to vector<32x128xbf16>
    %c0_18 = arith.constant 0 : index
    %c0_19 = arith.constant 0 : index
    %44 = vector.load %arg6[%c0_18, %c0_19] : memref<128x32xbf16, #tpu.memory_space<vmem>>, vector<128x32xbf16>
    %cst_20 = arith.constant dense<0.000000e+00> : vector<32x32xf32>
    %45 = tpu.matmul %43, %44, %cst_20 {dimension_numbers = #tpu.dot_dimension_numbers<[1], [0], [0], [1], [0, 0, 1, 1], [], []>} : vector<32x128xbf16>, vector<128x32xbf16>, vector<32x32xf32> -> vector<32x32xf32>
    %c0_21 = arith.constant 0 : index
    %c0_22 = arith.constant 0 : index
    %46 = vector.load %arg7[%c0_21, %c0_22] : memref<1x32xf32, #tpu.memory_space<vmem>>, vector<1x32xf32>
    %47 = vector.broadcast %46 : vector<1x32xf32> to vector<32x32xf32>
    %48 = arith.addf %45, %47 : vector<32x32xf32>
    %49 = arith.addf %1, %48 : vector<32x32xf32>
    %50 = arith.truncf %49 : vector<32x32xf32> to vector<32x32xbf16>
    %c0_23 = arith.constant 0 : index
    %c0_24 = arith.constant 0 : index
    %51 = vector.load %arg8[%c0_23, %c0_24] : memref<32x32xbf16, #tpu.memory_space<vmem>>, vector<32x32xbf16>
    tpu.vector_store %arg8[%c0_23, %c0_24], %50 {strides = array<i32>} : memref<32x32xbf16, #tpu.memory_space<vmem>>, vector<32x32xbf16>,
    return
  }
  func.func @transform_0(%arg0: i32) -> (i32, i32) {
    %c0_i32 = arith.constant 0 : i32
    %c0_i32_0 = arith.constant 0 : i32
    return %arg0, %c0_i32 : i32, i32
  }
  func.func @transform_1(%arg0: i32) -> (i32, i32) {
    %c0_i32 = arith.constant 0 : i32
    %c0_i32_0 = arith.constant 0 : i32
    %c0_i32_1 = arith.constant 0 : i32
    return %c0_i32, %c0_i32_0 : i32, i32
  }
  func.func @transform_2(%arg0: i32) -> (i32, i32) {
    %c0_i32 = arith.constant 0 : i32
    %c0_i32_0 = arith.constant 0 : i32
    %c0_i32_1 = arith.constant 0 : i32
    return %c0_i32, %c0_i32_0 : i32, i32
  }
  func.func @transform_3(%arg0: i32) -> (i32, i32) {
    %c0_i32 = arith.constant 0 : i32
    %c0_i32_0 = arith.constant 0 : i32
    %c0_i32_1 = arith.constant 0 : i32
    return %c0_i32, %c0_i32_0 : i32, i32
  }
  func.func @transform_4(%arg0: i32) -> (i32, i32) {
    %c0_i32 = arith.constant 0 : i32
    %c0_i32_0 = arith.constant 0 : i32
    %c0_i32_1 = arith.constant 0 : i32
    return %c0_i32, %c0_i32_0 : i32, i32
  }
  func.func @transform_5(%arg0: i32) -> (i32, i32) {
    %c0_i32 = arith.constant 0 : i32
    %c0_i32_0 = arith.constant 0 : i32
    %c0_i32_1 = arith.constant 0 : i32
    return %c0_i32, %c0_i32_0 : i32, i32
  }
  func.func @transform_6(%arg0: i32) -> (i32, i32) {
    %c0_i32 = arith.constant 0 : i32
    %c0_i32_0 = arith.constant 0 : i32
    %c0_i32_1 = arith.constant 0 : i32
    return %c0_i32, %c0_i32_0 : i32, i32
  }
  func.func @transform_7(%arg0: i32) -> (i32, i32) {
    %c0_i32 = arith.constant 0 : i32
    %c0_i32_0 = arith.constant 0 : i32
    return %arg0, %c0_i32 : i32, i32
  }
}

module attributes {stable_mosaic.version = 11 : i64} {
  func.func @_ln_linear_kernel(%arg0: i32, %arg1: memref<2x32xbf16, #tpu.memory_space<vmem>>, %arg2: memref<1x32xf32, #tpu.memory_space<vmem>>, %arg3: memref<1x32xf32, #tpu.memory_space<vmem>>, %arg4: memref<32x8xbf16, #tpu.memory_space<vmem>>, %arg5: memref<1x8xf32, #tpu.memory_space<vmem>>, %arg6: memref<2x8xf32, #tpu.memory_space<vmem>>) attributes {dimension_semantics = [#tpu.dimension_semantics<parallel>], iteration_bounds = array<i64: 1>, scalar_prefetch = 0 : i64, scratch_operands = 0 : i64, tpu.core_type = #tpu.core_type<tc>, window_params = [{transform_indices = @transform_0, window_bounds = array<i64: 2, 32>}, {pipeline_mode = #tpu.pipeline_mode<synchronous>, transform_indices = @transform_1, window_bounds = array<i64: 1, 32>}, {pipeline_mode = #tpu.pipeline_mode<synchronous>, transform_indices = @transform_2, window_bounds = array<i64: 1, 32>}, {pipeline_mode = #tpu.pipeline_mode<synchronous>, transform_indices = @transform_3, window_bounds = array<i64: 32, 8>}, {pipeline_mode = #tpu.pipeline_mode<synchronous>, transform_indices = @transform_4, window_bounds = array<i64: 1, 8>}, {transform_indices = @transform_5, window_bounds = array<i64: 2, 8>}]} {
    %c0 = arith.constant 0 : index
    %c0_0 = arith.constant 0 : index
    %0 = vector.load %arg1[%c0, %c0_0] : memref<2x32xbf16, #tpu.memory_space<vmem>>, vector<2x32xbf16>
    %1 = arith.extf %0 : vector<2x32xbf16> to vector<2x32xf32>
    %c0_1 = arith.constant 0 : index
    %c0_2 = arith.constant 0 : index
    %2 = vector.load %arg2[%c0_1, %c0_2] : memref<1x32xf32, #tpu.memory_space<vmem>>, vector<1x32xf32>
    %c0_3 = arith.constant 0 : index
    %c0_4 = arith.constant 0 : index
    %3 = vector.load %arg3[%c0_3, %c0_4] : memref<1x32xf32, #tpu.memory_space<vmem>>, vector<1x32xf32>
    %cst = arith.constant dense<0.000000e+00> : vector<2xf32>
    %4 = vector.multi_reduction <add>, %1, %cst [1] : vector<2x32xf32> to vector<2xf32>
    %5 = vector.shape_cast %4 : vector<2xf32> to vector<2x1xf32>
    %cst_5 = arith.constant 3.200000e+01 : f32
    %6 = vector.broadcast %cst_5 : f32 to vector<2x1xf32>
    %7 = arith.divf %5, %6 : vector<2x1xf32>
    %8 = vector.broadcast %7 : vector<2x1xf32> to vector<2x32xf32>
    %9 = arith.subf %1, %8 : vector<2x32xf32>
    %10 = arith.mulf %9, %9 : vector<2x32xf32>
    %cst_6 = arith.constant dense<0.000000e+00> : vector<2xf32>
    %11 = vector.multi_reduction <add>, %10, %cst_6 [1] : vector<2x32xf32> to vector<2xf32>
    %12 = vector.shape_cast %11 : vector<2xf32> to vector<2x1xf32>
    %cst_7 = arith.constant 3.200000e+01 : f32
    %13 = vector.broadcast %cst_7 : f32 to vector<2x1xf32>
    %14 = arith.divf %12, %13 : vector<2x1xf32>
    %cst_8 = arith.constant 9.99999974E-6 : f32
    %15 = vector.broadcast %cst_8 : f32 to vector<2x1xf32>
    %16 = arith.addf %14, %15 : vector<2x1xf32>
    %17 = math.rsqrt %16 : vector<2x1xf32>
    %18 = vector.broadcast %17 : vector<2x1xf32> to vector<2x32xf32>
    %19 = arith.mulf %9, %18 : vector<2x32xf32>
    %20 = vector.broadcast %2 : vector<1x32xf32> to vector<2x32xf32>
    %21 = arith.mulf %19, %20 : vector<2x32xf32>
    %22 = vector.broadcast %3 : vector<1x32xf32> to vector<2x32xf32>
    %23 = arith.addf %21, %22 : vector<2x32xf32>
    %24 = arith.truncf %23 : vector<2x32xf32> to vector<2x32xbf16>
    %c0_9 = arith.constant 0 : index
    %c0_10 = arith.constant 0 : index
    %25 = vector.load %arg4[%c0_9, %c0_10] : memref<32x8xbf16, #tpu.memory_space<vmem>>, vector<32x8xbf16>
    %cst_11 = arith.constant dense<0.000000e+00> : vector<2x8xf32>
    %26 = tpu.matmul %24, %25, %cst_11 {dimension_numbers = #tpu.dot_dimension_numbers<[1], [0], [0], [1], [0, 0, 1, 1], [], []>} : vector<2x32xbf16>, vector<32x8xbf16>, vector<2x8xf32> -> vector<2x8xf32>
    %c0_12 = arith.constant 0 : index
    %c0_13 = arith.constant 0 : index
    %27 = vector.load %arg5[%c0_12, %c0_13] : memref<1x8xf32, #tpu.memory_space<vmem>>, vector<1x8xf32>
    %28 = vector.broadcast %27 : vector<1x8xf32> to vector<2x8xf32>
    %29 = arith.addf %26, %28 : vector<2x8xf32>
    %c0_14 = arith.constant 0 : index
    %c0_15 = arith.constant 0 : index
    %30 = vector.load %arg6[%c0_14, %c0_15] : memref<2x8xf32, #tpu.memory_space<vmem>>, vector<2x8xf32>
    tpu.vector_store %arg6[%c0_14, %c0_15], %29 {strides = array<i32>} : memref<2x8xf32, #tpu.memory_space<vmem>>, vector<2x8xf32>,
    return
  }
  func.func @transform_0(%arg0: i32) -> (i32, i32) {
    %c0_i32 = arith.constant 0 : i32
    %c0_i32_0 = arith.constant 0 : i32
    return %arg0, %c0_i32 : i32, i32
  }
  func.func @transform_1(%arg0: i32) -> (i32, i32) {
    %c0_i32 = arith.constant 0 : i32
    %c0_i32_0 = arith.constant 0 : i32
    %c0_i32_1 = arith.constant 0 : i32
    return %c0_i32, %c0_i32_0 : i32, i32
  }
  func.func @transform_2(%arg0: i32) -> (i32, i32) {
    %c0_i32 = arith.constant 0 : i32
    %c0_i32_0 = arith.constant 0 : i32
    %c0_i32_1 = arith.constant 0 : i32
    return %c0_i32, %c0_i32_0 : i32, i32
  }
  func.func @transform_3(%arg0: i32) -> (i32, i32) {
    %c0_i32 = arith.constant 0 : i32
    %c0_i32_0 = arith.constant 0 : i32
    %c0_i32_1 = arith.constant 0 : i32
    return %c0_i32, %c0_i32_0 : i32, i32
  }
  func.func @transform_4(%arg0: i32) -> (i32, i32) {
    %c0_i32 = arith.constant 0 : i32
    %c0_i32_0 = arith.constant 0 : i32
    %c0_i32_1 = arith.constant 0 : i32
    return %c0_i32, %c0_i32_0 : i32, i32
  }
  func.func @transform_5(%arg0: i32) -> (i32, i32) {
    %c0_i32 = arith.constant 0 : i32
    %c0_i32_0 = arith.constant 0 : i32
    return %arg0, %c0_i32 : i32, i32
  }
}

</mosaic_0001>

<bundles_post_ra>
// kernel: timesformer_forward.16
= control target key start
LH: loop header
LB: loop body
LE: loop exit
PB: predicated region body
PF: predicated region fallthrough
CT: control target
= control target key end

     0   :  { %s695_s12 = smov 0   ;;  %s697_s13 = smov 0   ;;  %s775_s0 = inlined_call_operand.vmem [shape: bf16[32,192], index: 0, kind: input, shape index: {}]   ;;  %s776_s1 = inlined_call_operand.vmem [shape: bf16[192,32], index: 1, kind: input, shape index: {}]   ;;  %s777_s2 = inlined_call_operand.vmem [shape: f32[1,32], index: 2, kind: input, shape index: {}]   ;;  %s778_s3 = inlined_call_operand.vmem [shape: bf16[32,32], index: 3, kind: output, shape index: {}]  }
   0x1   :  { %s699_s14 = smov 0  }
   0x2 LB: > { %s32_s15 = sadd.s32 1, %s667_s13  ;;  %p579_p0 = scmp.ge.s32.totalorder %s671_s14, 1  ;;  %s671_s14 = sphi %s699_s14, %s13_s14   ;;  %s667_s13 = sphi %s697_s13, %s780_s13   ;;  %s663_s12 = sphi %s695_s12, %s779_s12  }
   0x3   : > { %p34_p1 = scmp.ge.s32.totalorder %s32_s15, 2  ;;  %p191_p2 = scmp.lt.s32.totalorder %s671_s14, 3 }
   0x5   : > { %s782_s15 = smov (%p34_p1, %s32_s15), 0  ;;  %p192_p3 = pnand %p579_p0, %p191_p2 }
   0x6   : > { %v634_v0 = vld [vmem:[%s776_s1] sm:$0xff] (!%p192_p3)   ;;  %v673_v1 = vmov (!%p192_p3), 0   ;;  %s580_s18 = sshll.u32 (!%p192_p3), %s663_s12, 1  ;;  %v635_v2 = vld [vmem:[%s776_s1 + $0x8] sm:$0xff] (!%p192_p3)   ;;  %v636_v3 = vld [vmem:[%s776_s1 + $0x10] sm:$0xff] (!%p192_p3)   ;;  %vm272_vm0 = vcmask (!%p192_p3), 261120  }
   0x7   : > { %195 = sbr.rel (%p192_p3) target bundleno = 284 (0x11c), region = 32  ;;  %388 = vmatprep.subr.bf16.mxu0 (!%p192_p3), %v673_v1  ;;  %p236_p4 = scmp.lt.s32.totalorder (!%p192_p3), %s580_s18, 3  ;;  %v674_v4 = vmov (!%p192_p3), 0.0   ;;  %v637_v5 = vld [vmem:[%s776_s1 + $0x18] sm:$0xff] (!%p192_p3)   ;;  %vm384_vm1 = vcmask (!%p192_p3), 523264   ;;  %v638_v7 = vld [vmem:[%s776_s1 + $0x20] sm:$0xff] (!%p192_p3)  }
   0x8   : > { %389 = vmatpush1.bf16.msra.mxu0 (!%p192_p3), %v634_v0  ;;  %273 = vst.msk [vmem:[#allocation2] sm:$0xff] (!%p192_p3), %vm272_vm0, %v674_v4  ;;  %274 = vst.msk [vmem:[#allocation2 + $0x8] sm:$0xff] (!%p192_p3), %vm272_vm0, %v674_v4  ;;  %v639_v8 = vld [vmem:[%s776_s1 + $0x28] sm:$0xff] (!%p192_p3)   ;;  %v640_v9 = vld [vmem:[%s776_s1 + $0x30] sm:$0xff] (!%p192_p3)   ;;  %vm456_vm2 = vcmask (!%p192_p3), 257024  }
   0x9   : > { %390 = vmatprep.subr.bf16.mxu0 (!%p192_p3), %v673_v1  ;;  %v641_v10 = vld [vmem:[%s776_s1 + $0x38] sm:$0xff] (!%p192_p3)   ;;  %v642_v11 = vld [vmem:[%s776_s1 + $0x40] sm:$0xff] (!%p192_p3)   ;;  %v643_v12 = vld [vmem:[%s776_s1 + $0x48] sm:$0xff] (!%p192_p3)  }
   0xa   : > { %v644_v13 = vld [vmem:[%s776_s1 + $0x50] sm:$0xff] (!%p192_p3)   ;;  %v645_v14 = vld [vmem:[%s776_s1 + $0x58] sm:$0xff] (!%p192_p3)   ;;  %v600_v24 = vld [vmem:[%s777_s2] ss:$0 sm:$0xff] (!%p192_p3) }
   0xc   : > { %391 = vmatpush1.bf16.msra.mxu0 (!%p192_p3), %v635_v2 }
   0xd   : > { %392 = vmatprep.subr.bf16.mxu0 (!%p192_p3), %v673_v1 }
   0xe   : > { %s784_s18 = smov (!%p236_p4, %s580_s18), 3 }
   0xf   : > { %s605_s23 = sshll.u32 %s784_s18, 3  ;;  %v275_v16 = vld [vmem:[#allocation2] sm:$0xff]  ;;  %v276_v18 = vld [vmem:[#allocation2 + $0x8] sm:$0xff]  ;;  %s584_s24 = sshll.u32 %s784_s18, 2 }
  0x10   : > { %393 = vmatpush1.bf16.msra.mxu0 %v636_v3  ;;  %s243_s28 = scalar_lea.vmem %s775_s0, %s605_s23  ;;  %s265_s27 = scalar_lea.vmem %s778_s3, %s584_s24 }
  0x11   : > { %394 = vmatprep.subr.bf16.mxu0 %v673_v1  ;;  %v648_v6 = vld [vmem:[%s243_s28 + $0x4] ss:$8 sps:$4 sm:$0xff]   ;;  %v646_v15 = vld [vmem:[%s243_s28] ss:$8 sps:$4 sm:$0xff]  }
  0x12   : > { %599 = vmatprep.mubr.msk.bf16.mxu0 %vm384_vm1, %v648_v6 }
  0x14   : > { %395 = vmatpush1.bf16.msra.mxu0 %v637_v5 }
  0x15   : > { %396 = vmatprep.subr.bf16.mxu0 %v673_v1 }
  0x18   : > { %397 = vmatpush1.bf16.msra.mxu0 %v638_v7 }
  0x19   : > { %398 = vmatprep.subr.bf16.mxu0 %v673_v1 }
  0x1c   : > { %399 = vmatpush1.bf16.msra.mxu0 %v639_v8 }
  0x1d   : > { %400 = vmatprep.subr.bf16.mxu0 %v673_v1 }
  0x20   : > { %401 = vmatpush1.bf16.msra.mxu0 %v640_v9 }
  0x21   : > { %402 = vmatprep.subr.bf16.mxu0 %v673_v1 }
  0x24   : > { %403 = vmatpush1.bf16.msra.mxu0 %v641_v10 }
  0x25   : > { %404 = vmatprep.subr.bf16.mxu0 %v673_v1 }
  0x28   : > { %405 = vmatpush1.bf16.msra.mxu0 %v642_v11 }
  0x29   : > { %406 = vmatprep.subr.bf16.mxu0 %v673_v1 }
  0x2c   : > { %407 = vmatpush1.bf16.msra.mxu0 %v643_v12 }
  0x2d   : > { %408 = vmatprep.subr.bf16.mxu0 %v673_v1 }
  0x30   : > { %409 = vmatpush1.bf16.msra.mxu0 %v644_v13 }
  0x31   : > { %410 = vmatprep.subr.bf16.mxu0 %v673_v1 }
  0x34   : > { %411 = vmatpush1.bf16.msra.mxu0 %v645_v14 }
  0x37   : > { %421 = vmatmul.mubr.bf16.vlgmr.msra.gmra.mrb[0].mxu0 %v646_v15 }
 0x10a   : > { %v422_v17 = vpop.f32.mrb[0].mxu0 }
 0x10b   : > { %v429_v19 = vadd.f32 %v422_v17, %v275_v16  ;;  %v424_v20 = vpop.f32.mrb[1].mxu0 }
 0x10c   : > { %v425_v21 = vpop.f32.mrb[2].mxu0 }
 0x10d   : > { %432 = vst.msk [vmem:[#allocation2] sm:$0xff] %vm272_vm0, %v429_v19  ;;  %v430_v22 = vadd.f32 %v425_v21, %v276_v18  ;;  %v427_v23 = vpop.f32.mrb[3].mxu0 }
 0x10f   : > { %433 = vst.msk [vmem:[#allocation2 + $0x8] sm:$0xff] %vm272_vm0, %v430_v22 }
 0x114   : > { %v437_v25 = vld [vmem:[#allocation2] sm:$0xff] }
 0x115   : > { %v446_v26 = vadd.f32 %v600_v24, %v437_v25 }
 0x116   : > { %v438_v27 = vld [vmem:[#allocation2 + $0x8] sm:$0xff] }
 0x117   : > { %v606_v28 = vpack.c.bf16 %v446_v26, %v446_v26  ;;  %v447_v29 = vadd.f32 %v600_v24, %v438_v27 }
 0x119   : > { %457 = vst.msk [vmem:[%s265_s27] sm:$0xf] %vm456_vm2, %v606_v28  ;;  %v607_v30 = vpack.c.bf16 %v447_v29, %v447_v29 }
 0x11b   : > { %458 = vst.msk [vmem:[%s265_s27 + $0x4] sm:$0xf] %vm456_vm2, %v607_v30 }
 0x11c PF: > { %s13_s14 = sadd.s32 1, %s671_s14   ;;  %s779_s12 = smov %s667_s13 }
 0x11d   : > { %p10_p5 = scmp.ge.s32.totalorder %s13_s14, 4   ;;  %s780_s13 = smov %s782_s15 }
 0x11f   :  { %12 = sbr.rel (!%p10_p5) target bundleno = 2 (0x2), region = 76 }

// kernel: timesformer_forward.17
= control target key start
LH: loop header
LB: loop body
LE: loop exit
PB: predicated region body
PF: predicated region fallthrough
CT: control target
= control target key end

     0   :  { %s689_s24 = smov 0   ;;  %s744_s0 = inlined_call_operand.vmem [shape: bf16[32,32], index: 0, kind: input, shape index: {}]   ;;  %s745_s1 = inlined_call_operand.vmem [shape: f32[1,32], index: 1, kind: input, shape index: {}]   ;;  %s746_s2 = inlined_call_operand.vmem [shape: f32[1,32], index: 2, kind: input, shape index: {}]   ;;  %s747_s3 = inlined_call_operand.vmem [shape: bf16[32,96], index: 3, kind: input, shape index: {}]   ;;  %s748_s4 = inlined_call_operand.vmem [shape: f32[1,96], index: 4, kind: input, shape index: {}]   ;;  %s749_s5 = inlined_call_operand.vmem [shape: bf16[32,32], index: 5, kind: output, shape index: {0}]   ;;  %s750_s6 = inlined_call_operand.vmem [shape: bf16[32,32], index: 6, kind: output, shape index: {1}]   ;;  %s751_s7 = inlined_call_operand.vmem [shape: bf16[32,32], index: 7, kind: output, shape index: {2}]  }
   0x1 LB: > { %s579_s25 = sadd.s32 4294967295, %s643_s24   ;;  %p583_p0 = scmp.ge.s32.totalorder %s643_s24, 1  ;;  %s643_s24 = sphi %s689_s24, %s18_s24  }
   0x2   : > { %p243_p1 = scmp.lt.s32.totalorder %s643_s24, 3 }
   0x4   : > { %p244_p2 = pnand %p583_p0, %p243_p1 }
   0x5   : > { %s584_s26 = sshll.u32 (!%p244_p2), %s579_s25, 1  ;;  %vm316_vm0 = vcmask (!%p244_p2), 261120   ;;  %v631_v15 = vld [vmem:[%s747_s3] sm:$0xff] (!%p244_p2)   ;;  %v645_v16 = vmov (!%p244_p2), 0.0   ;;  %v632_v17 = vld [vmem:[%s747_s3 + $0x8] sm:$0xff] (!%p244_p2)   ;;  %vm646_vm1 = vmmov (!%p244_p2), 0  }
   0x6   : > { %247 = sbr.rel (%p244_p2) target bundleno = 678 (0x2a6), region = 40  ;;  %p286_p3 = scmp.lt.s32.totalorder (!%p244_p2), %s584_s26, 3  ;;  %611 = vmatprep.subr.bf16.mxu0 (!%p244_p2), %v645_v16  ;;  %615 = vmatprep.mubr.msk.bf16.mxu0 (!%p244_p2), %vm646_vm1, %v645_v16  ;;  %v592_v26 = vld [vmem:[%s745_s1] ss:$0 sm:$0xff] (!%p244_p2)  ;;  %vm436_vm2 = vcmask (!%p244_p2), 257024  }
   0x7   : > { %612 = vmatpush3.bf16.msra.mxu0 (!%p244_p2), %v631_v15  ;;  %v593_v30 = vld [vmem:[%s746_s2] ss:$0 sm:$0xff] (!%p244_p2)  ;;  %s647_s21 = smov (!%p244_p2), 64   ;;  %s648_s22 = smov (!%p244_p2), 96  }
   0x8   : > { %613 = vmatprep.subr.bf16.mxu0 (!%p244_p2), %v645_v16  ;;  %v594_v35 = vld [vmem:[%s748_s4] ss:$0 sm:$0xff] (!%p244_p2) }
   0xb   : > { %614 = vmatpush3.bf16.msra.mxu0 (!%p244_p2), %v632_v17 }
   0xd   : > { %s753_s26 = smov (!%p286_p3, %s584_s26), 3 }
   0xe   : > { %s697_s27 = sshll.u32 %s753_s26, 2 }
   0xf   : > { %s289_s30 = scalar_lea.vmem %s744_s0, %s697_s27  ;;  %s295_s20 = scalar_lea.vmem %s749_s5, %s697_s27 }
  0x10   : > { %v605_v0 = vld [vmem:[%s289_s30] sm:$0xff]   ;;  %s307_s26 = scalar_lea.vmem %s751_s7, %s697_s27  ;;  %s301_s30 = scalar_lea.vmem %s750_s6, %s697_s27 }
  0x11   : > { %v606_v1 = vunpack.c.l.bf16 %v605_v0  ;;  %v607_v2 = vunpack.c.h.bf16 %v605_v0 }
  0x13   : > { %v317_v3 = vsel %vm316_vm0, %v606_v1, 0.0  ;;  %v320_v4 = vsel %vm316_vm0, %v607_v2, 0.0 }
  0x14   : > { %318 = vadd.xlane.f32.xlu0 %v317_v3 }
  0x18   : > { %321 = vadd.xlane.f32.xlu0 %v320_v4 }
  0xa1   : > { %v319_v5 = vpop.xlane.xlu0 %318 }
  0xa2   : > { %v324_v6 = vmul.f32 0.03125, %v319_v5 }
  0xa4   : > { %v326_v7 = vsub.f32 %v606_v1, %v324_v6 }
  0xa5   : > { %v322_v8 = vpop.xlane.xlu0 %321 }
  0xa6   : > { %v325_v9 = vmul.f32 0.03125, %v322_v8  ;;  %v328_v10 = vmul.f32 %v326_v7, %v326_v7 }
  0xa8   : > { %v327_v11 = vsub.f32 %v607_v2, %v325_v9  ;;  %v330_v12 = vsel %vm316_vm0, %v328_v10, 0.0 }
  0xa9   : > { %331 = vadd.xlane.f32.xlu1 %v330_v12 }
  0xaa   : > { %v329_v13 = vmul.f32 %v327_v11, %v327_v11 }
  0xac   : > { %v333_v14 = vsel %vm316_vm0, %v329_v13, 0.0 }
  0xad   : > { %334 = vadd.xlane.f32.xlu1 %v333_v14 }
 0x136   : > { %v332_v18 = vpop.xlane.xlu1 %331 }
 0x137   : > { %v336_v19 = vmul.f32 0.03125, %v332_v18 }
 0x139   : > { %v338_v20 = vadd.f32 1e-05, %v336_v19 }
 0x13a   : > { %v335_v21 = vpop.xlane.xlu1 %334 }
 0x13b   : > { %633 = vrsqrt.f32 %v338_v20  ;;  %v337_v22 = vmul.f32 0.03125, %v335_v21 }
 0x13d   : > { %v339_v23 = vadd.f32 1e-05, %v337_v22 }
 0x13f   : > { %635 = vrsqrt.f32 %v339_v23 }
 0x145   : > { %v634_v24 = vpop.eup %633 }
 0x146   : > { %v342_v25 = vmul.f32 %v634_v24, %v326_v7 }
 0x148   : > { %v350_v29 = vmul.f32 %v592_v26, %v342_v25 }
 0x149   : > { %v636_v27 = vpop.eup %635 }
 0x14a   : > { %v343_v28 = vmul.f32 %v636_v27, %v327_v11  ;;  %v358_v32 = vadd.f32 %v593_v30, %v350_v29 }
 0x14c   : > { %v351_v31 = vmul.f32 %v592_v26, %v343_v28 }
 0x14e   : > { %v359_v33 = vadd.f32 %v593_v30, %v351_v31 }
 0x150   : > { %v360_v34 = vpack.c.bf16 %v359_v33, %v358_v32 }
 0x152   : > { %616 = vmatmul.mubr.msk.bf16.vlgmr.msra.gmra.mrb[0].mxu0 %vm316_vm0, %v360_v34 }
 0x225   : > { %v421_v36 = vpop.f32.mrb[0].mxu0 }
 0x226   : > { %v422_v37 = vadd.f32 %v594_v35, %v421_v36  ;;  %v617_v38 = vpop.f32.mrb[1].mxu0 }
 0x227   : > { %v424_v39 = vpop.f32.mrb[2].mxu0 }
 0x228   : > { %v602_v40 = vpack.c.bf16 %v422_v37, %v422_v37  ;;  %v425_v41 = vadd.f32 %v594_v35, %v424_v39  ;;  %v618_v42 = vpop.f32.mrb[3].mxu0 }
 0x22a   : > { %437 = vst.msk [vmem:[%s295_s20] sm:$0xf] %vm436_vm2, %v602_v40  ;;  %v603_v43 = vpack.c.bf16 %v425_v41, %v425_v41  ;;  %447 = vrot.lane.b32.xlu1 %v602_v40, %s647_s21  ;;  %439 = vrot.lane.b32.xlu0 %v602_v40, %s648_s22 }
 0x22c   : > { %438 = vst.msk [vmem:[%s295_s20 + $0x4] sm:$0xf] %vm436_vm2, %v603_v43 }
 0x22e   : > { %441 = vrot.lane.b32.xlu1 %v603_v43, %s648_s22 }
 0x232   : > { %449 = vrot.lane.b32.xlu1 %v603_v43, %s647_s21 }
 0x29c   : > { %v448_v44 = vpop.permute.xlu1 %447  ;;  %v440_v45 = vpop.permute.xlu0 %439 }
 0x29d   : > { %453 = vst.msk [vmem:[%s307_s26] sm:$0xf] %vm436_vm2, %v448_v44  ;;  %445 = vst.msk [vmem:[%s301_s30] sm:$0xf] %vm436_vm2, %v440_v45 }
 0x2a0   : > { %v442_v46 = vpop.permute.xlu1 %441 }
 0x2a1   : > { %446 = vst.msk [vmem:[%s301_s30 + $0x4] sm:$0xf] %vm436_vm2, %v442_v46 }
 0x2a4   : > { %v450_v47 = vpop.permute.xlu1 %449 }
 0x2a5   : > { %454 = vst.msk [vmem:[%s307_s26 + $0x4] sm:$0xf] %vm436_vm2, %v450_v47 }
 0x2a6 PF: > { %s18_s24 = sadd.s32 1, %s643_s24  }
 0x2a7   : > { %p15_p4 = scmp.ge.s32.totalorder %s18_s24, 4  }
 0x2a9   :  { %17 = sbr.rel (!%p15_p4) target bundleno = 1 (0x1), region = 94 }

// kernel: timesformer_forward.19
= control target key start
LH: loop header
LB: loop body
LE: loop exit
PB: predicated region body
PF: predicated region fallthrough
CT: control target
= control target key end

     0   :  { %s618_s21 = smov 0   ;;  %s663_s0 = inlined_call_operand.vmem [shape: bf16[32,32], index: 0, kind: input, shape index: {}]   ;;  %s664_s1 = inlined_call_operand.vmem [shape: bf16[32,32], index: 1, kind: input, shape index: {}]   ;;  %s665_s2 = inlined_call_operand.vmem [shape: bf16[32,32], index: 2, kind: input, shape index: {}]   ;;  %s666_s3 = inlined_call_operand.vmem [shape: f32[1,32], index: 3, kind: input, shape index: {}]   ;;  %s667_s4 = inlined_call_operand.vmem [shape: bf16[32,32], index: 4, kind: input, shape index: {}]   ;;  %s668_s5 = inlined_call_operand.vmem [shape: f32[1,32], index: 5, kind: input, shape index: {}]   ;;  %s669_s6 = inlined_call_operand.vmem [shape: bf16[32,32], index: 6, kind: output, shape index: {}]  }
   0x1 LB: > { %s506_s22 = sadd.s32 4294967295, %s579_s21   ;;  %p510_p0 = scmp.ge.s32.totalorder %s579_s21, 1  ;;  %s579_s21 = sphi %s618_s21, %s16_s21  }
   0x2   : > { %p224_p1 = scmp.lt.s32.totalorder %s579_s21, 3 }
   0x4   : > { %p225_p2 = pnand %p510_p0, %p224_p1 }
   0x5   : > { %v568_v0 = vld [vmem:[%s665_s2] sm:$0xff] (!%p225_p2)   ;;  %v581_v1 = vmov (!%p225_p2), 0.0   ;;  %v569_v2 = vld [vmem:[%s665_s2 + $0x8] sm:$0xff] (!%p225_p2)   ;;  %vm582_vm0 = vmmov (!%p225_p2), 0   ;;  %s511_s27 = sshll.u32 (!%p225_p2), %s506_s22, 1  ;;  %vm308_vm1 = vcmask (!%p225_p2), 261120  }
   0x6   : > { %228 = sbr.rel (%p225_p2) target bundleno = 456 (0x1c8), region = 44  ;;  %542 = vmatprep.subr.bf16.mxu0 (!%p225_p2), %v581_v1  ;;  %550 = vmatprep.subr.bf16.mxu1 (!%p225_p2), %v581_v1  ;;  %p260_p3 = scmp.lt.s32.totalorder (!%p225_p2), %s511_s27, 3  ;;  %v571_v4 = vld [vmem:[%s667_s4] sm:$0xff] (!%p225_p2)   ;;  %v572_v5 = vld [vmem:[%s667_s4 + $0x8] sm:$0xff] (!%p225_p2)   ;;  %vm435_vm2 = vcmask (!%p225_p2), 257024  }
   0x7   : > { %543 = vmatpush3.bf16.msra.mxu0 (!%p225_p2), %v568_v0  ;;  %546 = vmatprep.mubr.msk.bf16.mxu0 (!%p225_p2), %vm582_vm0, %v581_v1  ;;  %v517_v6 = vld [vmem:[%s666_s3] ss:$0 sm:$0xff] (!%p225_p2) }
   0x8   : > { %544 = vmatprep.subr.bf16.mxu0 (!%p225_p2), %v581_v1  ;;  %554 = vmatprep.mubr.msk.bf16.mxu1 (!%p225_p2), %vm582_vm0, %v581_v1  ;;  %v522_v15 = vld [vmem:[%s668_s5] ss:$0 sm:$0xff] (!%p225_p2) }
   0x9   : > { %551 = vmatpush3.bf16.msra.mxu1 (!%p225_p2), %v571_v4 }
   0xa   : > { %552 = vmatprep.subr.bf16.mxu1 (!%p225_p2), %v581_v1 }
   0xb   : > { %545 = vmatpush3.bf16.msra.mxu0 (!%p225_p2), %v569_v2 }
   0xd   : > { %s671_s27 = smov (!%p260_p3, %s511_s27), 3  ;;  %553 = vmatpush3.bf16.msra.mxu1 %v572_v5 }
   0xe   : > { %s632_s28 = sshll.u32 %s671_s27, 2 }
   0xf   : > { %s263_s7 = scalar_lea.vmem %s663_s0, %s632_s28  ;;  %s269_s16 = scalar_lea.vmem %s664_s1, %s632_s28 }
  0x10   : > { %v570_v3 = vld [vmem:[%s263_s7] sm:$0xff]   ;;  %s275_s22 = scalar_lea.vmem %s669_s6, %s632_s28 }
  0x11   : > { %547 = vmatmul.mubr.msk.bf16.vlgmr.msra.gmra.mrb[0].mxu0 %vm308_vm1, %v570_v3  ;;  %v533_v14 = vld [vmem:[%s269_s16] sm:$0xff]  }
  0x12   : > { %v534_v16 = vunpack.c.l.bf16 %v533_v14  ;;  %v535_v20 = vunpack.c.h.bf16 %v533_v14 }
  0xe4   : > { %v346_v7 = vpop.f32.mrb[0].mxu0 }
  0xe5   : > { %v548_v8 = vpop.f32.mrb[1].mxu0  ;;  %v347_v10 = vadd.f32 %v517_v6, %v346_v7 }
  0xe6   : > { %v349_v9 = vpop.f32.mrb[2].mxu0 }
  0xe7   : > { %v350_v11 = vadd.f32 %v517_v6, %v349_v9  ;;  %v549_v12 = vpop.f32.mrb[3].mxu0 }
  0xe9   : > { %v353_v13 = vpack.c.bf16 %v350_v11, %v347_v10 }
  0xeb   : > { %555 = vmatmul.mubr.msk.bf16.vlgmr.msra.gmra.mrb[0].mxu1 %vm308_vm1, %v353_v13 }
 0x1be   : > { %v414_v17 = vpop.f32.mrb[0].mxu1 }
 0x1bf   : > { %v415_v18 = vadd.f32 %v522_v15, %v414_v17  ;;  %v556_v19 = vpop.f32.mrb[1].mxu1 }
 0x1c0   : > { %v417_v21 = vpop.f32.mrb[2].mxu1 }
 0x1c1   : > { %v425_v22 = vadd.f32 %v534_v16, %v415_v18  ;;  %v418_v23 = vadd.f32 %v522_v15, %v417_v21  ;;  %v557_v24 = vpop.f32.mrb[3].mxu1 }
 0x1c3   : > { %v530_v25 = vpack.c.bf16 %v425_v22, %v425_v22  ;;  %v426_v26 = vadd.f32 %v535_v20, %v418_v23 }
 0x1c5   : > { %436 = vst.msk [vmem:[%s275_s22] sm:$0xf] %vm435_vm2, %v530_v25  ;;  %v531_v27 = vpack.c.bf16 %v426_v26, %v426_v26 }
 0x1c7   : > { %437 = vst.msk [vmem:[%s275_s22 + $0x4] sm:$0xf] %vm435_vm2, %v531_v27 }
 0x1c8 PF: > { %s16_s21 = sadd.s32 1, %s579_s21  }
 0x1c9   : > { %p13_p4 = scmp.ge.s32.totalorder %s16_s21, 4  }
 0x1cb   :  { %15 = sbr.rel (!%p13_p4) target bundleno = 1 (0x1), region = 77 }

// kernel: timesformer_forward.18
= control target key start
LH: loop header
LB: loop body
LE: loop exit
PB: predicated region body
PF: predicated region fallthrough
CT: control target
= control target key end

     0   :  { %s2752_s12 = smov 0   ;;  %s3215_s0 = inlined_call_operand.vmem [shape: bf16[8,4,32], index: 0, kind: input, shape index: {}]   ;;  %s3216_s1 = inlined_call_operand.vmem [shape: bf16[8,4,32], index: 1, kind: input, shape index: {}]   ;;  %s3217_s2 = inlined_call_operand.vmem [shape: bf16[8,4,32], index: 2, kind: input, shape index: {}]   ;;  %s3218_s3 = inlined_call_operand.vmem [shape: bf16[8,4,32], index: 3, kind: output, shape index: {}]  }
   0x1 LB: > { %s2331_s13 = sadd.s32 4294967295, %s2721_s12   ;;  %p2335_p0 = scmp.ge.s32.totalorder %s2721_s12, 1  ;;  %s2721_s12 = sphi %s2752_s12, %s13_s12  }
   0x2   : > { %p160_p1 = scmp.lt.s32.totalorder %s2721_s12, 3 }
   0x4   : > { %p161_p2 = pnand %p2335_p0, %p160_p1 }
   0x5   : > { %s2336_s14 = sshll.u32 (!%p161_p2), %s2331_s13, 2  ;;  %v2723_v0 = vmov (!%p161_p2), 0.0   ;;  %vm2724_vm0 = vmmov (!%p161_p2), 0   ;;  %vm231_vm1 = vcmask (!%p161_p2), 64512   ;;  %vm420_vm2 = vcmask (!%p161_p2), 27648   ;;  %s2726_s22 = smov (!%p161_p2), 120  }
   0x6   : > { %164 = sbr.rel (%p161_p2) target bundleno = 2725 (0xaa5), region = 32  ;;  %2442 = vmatprep.subr.bf16.mxu0 (!%p161_p2), %v2723_v0  ;;  %p195_p3 = scmp.lt.s32.totalorder (!%p161_p2), %s2336_s14, 7  ;;  %2448 = vmatprep.subr.bf16.mxu1 (!%p161_p2), %v2723_v0  ;;  %v2725_v50 = vmov (!%p161_p2), 1983009808   ;;  %v668_v52 = vlaneseq (!%p161_p2)  ;;  %vm473_vm3 = vcmask (!%p161_p2), 1041408   ;;  %vm469_vm4 = vcmask (!%p161_p2), 31744  }
   0x7   : > { %2444 = vmatprep.mubr.msk.bf16.mxu0 (!%p161_p2), %vm2724_vm0, %v2723_v0  ;;  %2450 = vmatprep.mubr.msk.bf16.mxu1 (!%p161_p2), %vm2724_vm0, %v2723_v0  ;;  %v666_v51 = vunpack.c.l.s4 (!%p161_p2), %v2725_v50  ;;  %vm659_vm5 = vcmask (!%p161_p2), 58368   ;;  %s2727_s29 = smov (!%p161_p2), 112   ;;  %s2728_s30 = smov (!%p161_p2), 104   ;;  %vm1252_vm6 = vcmask (!%p161_p2), 123968   ;;  %vm1749_vm7 = vcmask (!%p161_p2), 189568  }
   0x8   : > { %v669_v56 = vshrl.u32 (!%p161_p2), %v668_v52, 7  ;;  %s2729_s4 = smov (!%p161_p2), 8   ;;  %s2730_s5 = smov (!%p161_p2), 16   ;;  %vm2246_vm8 = vcmask (!%p161_p2), 255168  }
   0x9   : > { %v667_v55 = vunpack.c.0.s8 (!%p161_p2), %v666_v51  ;;  %s2731_s6 = smov (!%p161_p2), 24  }
   0xb   : > { %v2827_v57 = vsub.s32 (!%p161_p2), %v667_v55, %v669_v56 }
   0xd   : > { %s3220_s14 = smov (!%p195_p3, %s2336_s14), 7 }
   0xe   : > { %s2766_s15 = sshll.u32 %s3220_s14, 1 }
   0xf   : > { %s204_s18 = scalar_lea.vmem %s3216_s1, %s2766_s15  ;;  %s198_s21 = scalar_lea.vmem %s3215_s0, %s2766_s15 }
  0x10   : > { %v2772_v1 = vld [vmem:[%s204_s18] sm:$0x3]  ;;  %v2774_v2 = vld [vmem:[%s204_s18 + $0x2] sm:$0x3]  ;;  %v2786_v5 = vld [vmem:[%s204_s18 + $0x4] sm:$0x3]  ;;  %s2843_s25 = scalar_lea.vmem %s3217_s2, %s2766_s15  ;;  %s2944_s28 = scalar_lea.vmem %s3218_s3, %s2766_s15 }
  0x11   : > { %v236_v3 = vsel %vm231_vm1, %v2772_v1, 0  ;;  %v282_v4 = vsel %vm231_vm1, %v2774_v2, 0  ;;  %v2788_v6 = vld [vmem:[%s204_s18 + $0x6] sm:$0x3]  ;;  %v2790_v7 = vld [vmem:[%s198_s21] sm:$0x3]  ;;  %v2831_v58 = vrot.slane %v2774_v2, %v2827_v57  ;;  %v2854_v62 = vrot.slane %v2772_v1, %v2827_v57 }
  0x12   : > { %2443 = vmatpush3.bf16.xpose.msra.mxu0 %v236_v3  ;;  %2449 = vmatpush3.bf16.xpose.msra.mxu1 %v282_v4  ;;  %v2792_v8 = vld [vmem:[%s198_s21 + $0x2] sm:$0x3]  ;;  %v328_v9 = vsel %vm231_vm1, %v2786_v5, 0  ;;  %v374_v10 = vsel %vm231_vm1, %v2788_v6, 0  ;;  %v2808_v11 = vld [vmem:[%s198_s21 + $0x4] sm:$0x3]  ;;  %v2837_v59 = vrot.slane %v2790_v7, %v2827_v57 }
  0x13   : > { %2454 = vmatprep.subr.bf16.mxu0 %v2723_v0  ;;  %2460 = vmatprep.subr.bf16.mxu1 %v2723_v0  ;;  %v2810_v12 = vld [vmem:[%s198_s21 + $0x6] sm:$0x3]  ;;  %v2846_v60 = vld [vmem:[%s2843_s25] sm:$0x3]  ;;  %v2858_v63 = vld [vmem:[%s2843_s25 + $0x2] sm:$0x3]  ;;  %v2864_v2 = vrot.slane %v2792_v8, %v2827_v57  ;;  %v2873_v1 = vrot.slane %v2808_v11, %v2827_v57 }
  0x14   : > { %v475_v61 = vsel %vm473_vm3, %v2846_v60, 0  ;;  %v521_v3 = vsel %vm473_vm3, %v2858_v63, 0 }
  0x19   : > { %2445 = vmatmul.mubr.msk.bf16.vlgmr.msra.gmra.mrb[0].mxu0 %vm231_vm1, %v2790_v7  ;;  %2451 = vmatmul.mubr.msk.bf16.vlgmr.msra.gmra.mrb[0].mxu1 %vm231_vm1, %v2792_v8 }
  0x1a   : > { %2455 = vmatpush3.bf16.xpose.msra.mxu0 %v328_v9  ;;  %2461 = vmatpush3.bf16.xpose.msra.mxu1 %v374_v10 }
  0x1b   : > { %2456 = vmatprep.mubr.msk.bf16.mxu0 %vm2724_vm0, %v2723_v0  ;;  %2462 = vmatprep.mubr.msk.bf16.mxu1 %vm2724_vm0, %v2723_v0 }
  0x1c   : > { %2466 = vmatprep.subr.bf16.mxu0 %v2723_v0  ;;  %2472 = vmatprep.subr.bf16.mxu1 %v2723_v0 }
  0x21   : > { %2457 = vmatmul.mubr.msk.bf16.vlgmr.msra.gmra.mrb[4].mxu0 %vm231_vm1, %v2808_v11  ;;  %2463 = vmatmul.mubr.msk.bf16.vlgmr.msra.gmra.mrb[4].mxu1 %vm231_vm1, %v2810_v12  ;;  %v2886_v11 = vrot.slane %v2788_v6, %v2827_v57  ;;  %v2897_v6 = vld [vmem:[%s2843_s25 + $0x4] sm:$0x3] }
  0x22   : > { %2468 = vmatprep.mubr.msk.bf16.mxu0 %vm2724_vm0, %v2723_v0  ;;  %2474 = vmatprep.mubr.msk.bf16.mxu1 %vm2724_vm0, %v2723_v0 }
  0x23   : > { %2467 = vmatpush3.bf16.msra.mxu0 %v475_v61  ;;  %2473 = vmatpush3.bf16.msra.mxu1 %v521_v3 }
  0x24   : > { %2478 = vmatprep.subr.bf16.mxu0 %v2723_v0  ;;  %2484 = vmatprep.subr.bf16.mxu1 %v2723_v0 }
  0xec   : > { %v272_v13 = vpop.f32.mrb[0].mxu0  ;;  %v318_v14 = vpop.f32.mrb[0].mxu1 }
  0xed   : > { %v416_v15 = vmul.f32 0.35355338, %v272_v13  ;;  %v2446_v16 = vpop.f32.mrb[1].mxu0  ;;  %v417_v17 = vmul.f32 0.35355338, %v318_v14  ;;  %v2452_v18 = vpop.f32.mrb[1].mxu1  ;;  %v2880_v13 = vrot.slane %v2786_v5, %v2827_v57  ;;  %v2892_v14 = vrot.slane %v2810_v12, %v2827_v57 }
  0xee   : > { %v275_v19 = vpop.f32.mrb[2].mxu0  ;;  %v321_v20 = vpop.f32.mrb[2].mxu1 }
  0xef   : > { %v2447_v21 = vpop.f32.mrb[3].mxu0  ;;  %v2453_v22 = vpop.f32.mrb[3].mxu1  ;;  %v421_v23 = vsel %vm420_vm2, %v416_v15, -inf  ;;  %v424_v24 = vsel %vm420_vm2, %v417_v17, -inf  ;;  %v567_v20 = vsel %vm473_vm3, %v2897_v6, 0 }
  0xf0   : > { %422 = vmax.xlane.f32.xlu0 %v421_v23  ;;  %v2902_v21 = vld [vmem:[%s2843_s25 + $0x6] sm:$0x3] }
  0xf4   : > { %425 = vmax.xlane.f32.xlu0 %v424_v24  ;;  %v364_v25 = vpop.f32.mrb[4].mxu0  ;;  %v410_v26 = vpop.f32.mrb[4].mxu1  ;;  %v613_v24 = vsel %vm473_vm3, %v2902_v21, 0 }
  0xf5   : > { %v418_v27 = vmul.f32 0.35355338, %v364_v25  ;;  %v419_v28 = vmul.f32 0.35355338, %v410_v26  ;;  %v2458_v29 = vpop.f32.mrb[5].mxu0  ;;  %v2464_v30 = vpop.f32.mrb[5].mxu1 }
  0xf6   : > { %v367_v31 = vpop.f32.mrb[6].mxu0  ;;  %v413_v32 = vpop.f32.mrb[6].mxu1 }
  0xf7   : > { %v427_v33 = vsel %vm420_vm2, %v418_v27, -inf  ;;  %v2459_v34 = vpop.f32.mrb[7].mxu0  ;;  %v2465_v35 = vpop.f32.mrb[7].mxu1  ;;  %v430_v36 = vsel %vm420_vm2, %v419_v28, -inf }
  0xf8   : > { %428 = vmax.xlane.f32.xlu1 %v427_v33 }
  0xfc   : > { %431 = vmax.xlane.f32.xlu1 %v430_v36 }
 0x17d   : > { %v423_v37 = vpop.xlane.xlu0 %422 }
 0x17e   : > { %v433_v38 = vsub.f32 %v416_v15, %v423_v37 }
 0x180   : > { %v437_v39 = vmul.f32 1.442695, %v433_v38 }
 0x181   : > { %v426_v40 = vpop.xlane.xlu0 %425 }
 0x182   : > { %2651 = vpow2.f32 %v437_v39  ;;  %v434_v41 = vsub.f32 %v417_v17, %v426_v40 }
 0x184   : > { %v439_v42 = vmul.f32 1.442695, %v434_v41 }
 0x185   : > { %v429_v43 = vpop.xlane.xlu1 %428 }
 0x186   : > { %2653 = vpow2.f32 %v439_v42  ;;  %v435_v44 = vsub.f32 %v418_v27, %v429_v43 }
 0x188   : > { %v441_v45 = vmul.f32 1.442695, %v435_v44 }
 0x189   : > { %v432_v4 = vpop.xlane.xlu1 %431 }
 0x18a   : > { %2655 = vpow2.f32 %v441_v45  ;;  %v436_v7 = vsub.f32 %v419_v28, %v432_v4 }
 0x18c   : > { %v2652_v46 = vpop.eup %2651  ;;  %v443_v8 = vmul.f32 1.442695, %v436_v7 }
 0x18d   : > { %v445_v47 = vsel %vm420_vm2, %v2652_v46, 0.0 }
 0x18e   : > { %446 = vadd.xlane.f32.xlu0 %v445_v47  ;;  %2657 = vpow2.f32 %v443_v8 }
 0x190   : > { %v2654_v48 = vpop.eup %2653 }
 0x191   : > { %v448_v49 = vsel %vm420_vm2, %v2654_v48, 0.0 }
 0x192   : > { %449 = vadd.xlane.f32.xlu1 %v448_v49 }
 0x194   : > { %v2656_v53 = vpop.eup %2655 }
 0x195   : > { %v451_v54 = vsel %vm420_vm2, %v2656_v53, 0.0 }
 0x196   : > { %452 = vadd.xlane.f32.xlu0 %v451_v54 }
 0x198   : > { %v2658_v9 = vpop.eup %2657 }
 0x199   : > { %v454_v10 = vsel %vm420_vm2, %v2658_v9, 0.0 }
 0x1a3   : > { %748 = vrot.lane.b32.xlu1 %v2831_v58, %s2726_s22 }
 0x1a7   : > { %672 = vrot.lane.b32.xlu1 %v2837_v59, %s2726_s22 }
 0x1ac   : > { %682 = vrot.lane.b32.xlu0 %v2854_v62, %s2726_s22 }
 0x1b0   : > { %738 = vrot.lane.b32.xlu0 %v2864_v2, %s2726_s22 }
 0x1b4   : > { %804 = vrot.lane.b32.xlu0 %v2873_v1, %s2726_s22 }
 0x1cb   : > { %455 = vadd.xlane.f32.xlu1 %v454_v10 }
 0x1dc   : > { %814 = vrot.lane.b32.xlu1 %v2880_v13, %s2726_s22 }
 0x1e0   : > { %880 = vrot.lane.b32.xlu1 %v2886_v11, %s2726_s22 }
 0x1e4   : > { %870 = vrot.lane.b32.xlu1 %v2892_v14, %s2726_s22 }
 0x21b   : > { %v447_v5 = vpop.xlane.xlu0 %446 }
 0x21c   : > { %2659 = vrcp.f32 %v447_v5 }
 0x21f   : > { %v450_v15 = vpop.xlane.xlu1 %449 }
 0x220   : > { %2661 = vrcp.f32 %v450_v15 }
 0x223   : > { %v453_v16 = vpop.xlane.xlu0 %452  ;;  %v749_v30 = vpop.permute.xlu1 %748 }
 0x224   : > { %2663 = vrcp.f32 %v453_v16  ;;  %v754_v40 = vsel %vm231_vm1, %v749_v30, 0 }
 0x226   : > { %v2660_v17 = vpop.eup %2659 }
 0x227   : > { %v461_v18 = vmul.f32 %v2660_v17, %v2652_v46  ;;  %v683_v27 = vpop.permute.xlu0 %682  ;;  %v673_v31 = vpop.permute.xlu1 %672 }
 0x228   : > { %v688_v29 = vsel %vm231_vm1, %v683_v27, 0 }
 0x229   : > { %v465_v19 = vpack.c.bf16 %v461_v18, %v461_v18 }
 0x22a   : > { %v2662_v12 = vpop.eup %2661 }
 0x22b   : > { %v462_v22 = vmul.f32 %v2662_v12, %v2654_v48  ;;  %2469 = vmatmul.mubr.msk.bf16.vlgmr.msra.gmra.mrb[8].mxu0 %vm469_vm4, %v465_v19  ;;  %v739_v34 = vpop.permute.xlu0 %738 }
 0x22c   : > { %2479 = vmatpush3.bf16.msra.mxu0 %v567_v20  ;;  %2480 = vmatprep.mubr.msk.bf16.mxu0 %vm2724_vm0, %v2723_v0 }
 0x22d   : > { %v466_v23 = vpack.c.bf16 %v462_v22, %v462_v22  ;;  %2490 = vmatprep.subr.bf16.mxu0 %v2723_v0 }
 0x22e   : > { %v2664_v25 = vpop.eup %2663 }
 0x22f   : > { %v463_v26 = vmul.f32 %v2664_v25, %v2656_v53  ;;  %2475 = vmatmul.mubr.msk.bf16.vlgmr.msra.gmra.mrb[8].mxu1 %vm469_vm4, %v466_v23  ;;  %v805_v36 = vpop.permute.xlu0 %804 }
 0x230   : > { %2485 = vmatpush3.bf16.msra.mxu1 %v613_v24  ;;  %2486 = vmatprep.mubr.msk.bf16.mxu1 %vm2724_vm0, %v2723_v0 }
 0x231   : > { %v467_v28 = vpack.c.bf16 %v463_v26, %v463_v26  ;;  %2496 = vmatprep.subr.bf16.mxu1 %v2723_v0 }
 0x233   : > { %2481 = vmatmul.mubr.msk.bf16.vlgmr.msra.gmra.mrb[12].mxu0 %vm469_vm4, %v467_v28 }
 0x234   : > { %2492 = vmatprep.mubr.msk.bf16.mxu0 %vm2724_vm0, %v2723_v0 }
 0x235   : > { %2491 = vmatpush3.bf16.xpose.msra.mxu0 %v688_v29 }
 0x236   : > { %2502 = vmatprep.subr.bf16.mxu0 %v2723_v0 }
 0x23c   : > { %2493 = vmatmul.mubr.msk.bf16.vlgmr.msra.gmra.mrb[16].mxu0 %vm231_vm1, %v673_v31 }
 0x23d   : > { %2504 = vmatprep.mubr.msk.bf16.mxu0 %vm2724_vm0, %v2723_v0 }
 0x258   : > { %v456_v32 = vpop.xlane.xlu1 %455 }
 0x259   : > { %2665 = vrcp.f32 %v456_v32 }
 0x25c   : > { %v815_v33 = vpop.permute.xlu1 %814 }
 0x25d   : > { %v820_v35 = vsel %vm231_vm1, %v815_v33, 0 }
 0x25e   : > { %2503 = vmatpush3.bf16.xpose.msra.mxu0 %v820_v35 }
 0x25f   : > { %2514 = vmatprep.subr.bf16.mxu0 %v2723_v0 }
 0x260   : > { %v881_v41 = vpop.permute.xlu1 %880 }
 0x261   : > { %v886_v42 = vsel %vm231_vm1, %v881_v41, 0 }
 0x263   : > { %v2666_v37 = vpop.eup %2665 }
 0x264   : > { %v464_v38 = vmul.f32 %v2666_v37, %v2658_v9  ;;  %v871_v43 = vpop.permute.xlu1 %870 }
 0x265   : > { %2505 = vmatmul.mubr.msk.bf16.vlgmr.msra.gmra.mrb[20].mxu0 %vm231_vm1, %v805_v36 }
 0x266   : > { %v468_v39 = vpack.c.bf16 %v464_v38, %v464_v38  ;;  %2516 = vmatprep.mubr.msk.bf16.mxu0 %vm2724_vm0, %v2723_v0  ;;  %v2960_v38 = vrot.slane %v2858_v63, %v2827_v57 }
 0x268   : > { %2487 = vmatmul.mubr.msk.bf16.vlgmr.msra.gmra.mrb[12].mxu1 %vm469_vm4, %v468_v39  ;;  %v2966_v39 = vrot.slane %v2897_v6, %v2827_v57  ;;  %v2979_v6 = vrot.slane %v2846_v60, %v2827_v57 }
 0x269   : > { %2497 = vmatpush3.bf16.xpose.msra.mxu1 %v754_v40  ;;  %2498 = vmatprep.mubr.msk.bf16.mxu1 %vm2724_vm0, %v2723_v0  ;;  %v2972_v40 = vrot.slane %v2902_v21, %v2827_v57 }
 0x26a   : > { %2508 = vmatprep.subr.bf16.mxu1 %v2723_v0 }
 0x270   : > { %2499 = vmatmul.mubr.msk.bf16.vlgmr.msra.gmra.mrb[16].mxu1 %vm231_vm1, %v739_v34 }
 0x271   : > { %2509 = vmatpush3.bf16.xpose.msra.mxu1 %v886_v42  ;;  %2510 = vmatprep.mubr.msk.bf16.mxu1 %vm2724_vm0, %v2723_v0 }
 0x272   : > { %2520 = vmatprep.subr.bf16.mxu1 %v2723_v0 }
 0x278   : > { %2511 = vmatmul.mubr.msk.bf16.vlgmr.msra.gmra.mrb[20].mxu1 %vm231_vm1, %v871_v43 }
 0x279   : > { %2522 = vmatprep.mubr.msk.bf16.mxu1 %vm2724_vm0, %v2723_v0 }
 0x2fe   : > { %v511_v44 = vpop.f32.mrb[8].mxu0 }
 0x2ff   : > { %v655_v45 = vpack.c.bf16 %v511_v44, %v511_v44  ;;  %v2470_v46 = vpop.f32.mrb[9].mxu0 }
 0x300   : > { %v514_v47 = vpop.f32.mrb[10].mxu0 }
 0x301   : > { %660 = vst.msk [vmem:[%s2944_s28] sm:$0x3] %vm659_vm5, %v655_v45  ;;  %v2471_v48 = vpop.f32.mrb[11].mxu0 }
 0x302   : > { %v557_v49 = vpop.f32.mrb[8].mxu1 }
 0x303   : > { %v656_v50 = vpack.c.bf16 %v557_v49, %v557_v49  ;;  %v2476_v51 = vpop.f32.mrb[9].mxu1 }
 0x304   : > { %v560_v52 = vpop.f32.mrb[10].mxu1 }
 0x305   : > { %661 = vst.msk [vmem:[%s2944_s28 + $0x2] sm:$0x3] %vm659_vm5, %v656_v50  ;;  %v2477_v53 = vpop.f32.mrb[11].mxu1 }
 0x306   : > { %v603_v54 = vpop.f32.mrb[12].mxu0 }
 0x307   : > { %v657_v55 = vpack.c.bf16 %v603_v54, %v603_v54  ;;  %v2482_v56 = vpop.f32.mrb[13].mxu0 }
 0x308   : > { %v606_v61 = vpop.f32.mrb[14].mxu0 }
 0x309   : > { %662 = vst.msk [vmem:[%s2944_s28 + $0x4] sm:$0x3] %vm659_vm5, %v657_v55  ;;  %v2483_v3 = vpop.f32.mrb[15].mxu0 }
 0x30f   : > { %v724_v4 = vpop.f32.mrb[16].mxu0 }
 0x310   : > { %v928_v7 = vmul.f32 0.35355338, %v724_v4  ;;  %v2494_v8 = vpop.f32.mrb[17].mxu0 }
 0x311   : > { %v727_v9 = vpop.f32.mrb[18].mxu0 }
 0x312   : > { %v2495_v10 = vpop.f32.mrb[19].mxu0  ;;  %v932_v5 = vsel %vm420_vm2, %v928_v7, -inf }
 0x313   : > { %933 = vmax.xlane.f32.xlu0 %v932_v5 }
 0x338   : > { %v856_v15 = vpop.f32.mrb[20].mxu0 }
 0x339   : > { %v930_v16 = vmul.f32 0.35355338, %v856_v15  ;;  %v2506_v17 = vpop.f32.mrb[21].mxu0 }
 0x33a   : > { %v859_v18 = vpop.f32.mrb[22].mxu0 }
 0x33b   : > { %v649_v19 = vpop.f32.mrb[12].mxu1  ;;  %v938_v20 = vsel %vm420_vm2, %v930_v16, -inf  ;;  %v2507_v12 = vpop.f32.mrb[23].mxu0 }
 0x33c   : > { %v658_v22 = vpack.c.bf16 %v649_v19, %v649_v19  ;;  %v2488_v23 = vpop.f32.mrb[13].mxu1  ;;  %939 = vmax.xlane.f32.xlu0 %v938_v20 }
 0x33d   : > { %v652_v24 = vpop.f32.mrb[14].mxu1 }
 0x33e   : > { %663 = vst.msk [vmem:[%s2944_s28 + $0x6] sm:$0x3] %vm659_vm5, %v658_v22  ;;  %v2489_v25 = vpop.f32.mrb[15].mxu1 }
 0x343   : > { %v790_v26 = vpop.f32.mrb[16].mxu1 }
 0x344   : > { %v929_v27 = vmul.f32 0.35355338, %v790_v26  ;;  %v2500_v28 = vpop.f32.mrb[17].mxu1 }
 0x345   : > { %v793_v29 = vpop.f32.mrb[18].mxu1 }
 0x346   : > { %v2501_v30 = vpop.f32.mrb[19].mxu1  ;;  %v935_v31 = vsel %vm420_vm2, %v929_v27, -inf }
 0x347   : > { %936 = vmax.xlane.f32.xlu1 %v935_v31 }
 0x34b   : > { %v922_v32 = vpop.f32.mrb[20].mxu1 }
 0x34c   : > { %v931_v33 = vmul.f32 0.35355338, %v922_v32  ;;  %v2512_v34 = vpop.f32.mrb[21].mxu1 }
 0x34d   : > { %v925_v35 = vpop.f32.mrb[22].mxu1 }
 0x34e   : > { %v941_v36 = vsel %vm420_vm2, %v931_v33, -inf  ;;  %v2513_v37 = vpop.f32.mrb[23].mxu1 }
 0x34f   : > { %942 = vmax.xlane.f32.xlu0 %v941_v36 }
 0x358   : > { %1044 = vrot.lane.b32.xlu1 %v2960_v38, %s2726_s22 }
 0x35c   : > { %1100 = vrot.lane.b32.xlu1 %v2966_v39, %s2726_s22 }
 0x360   : > { %1156 = vrot.lane.b32.xlu1 %v2972_v40, %s2726_s22 }
 0x3a0   : > { %v934_v41 = vpop.xlane.xlu0 %933 }
 0x3a1   : > { %v944_v63 = vsub.f32 %v928_v7, %v934_v41 }
 0x3a3   : > { %v948_v42 = vmul.f32 1.442695, %v944_v63 }
 0x3a5   : > { %2667 = vpow2.f32 %v948_v42 }
 0x3af   : > { %v2668_v43 = vpop.eup %2667 }
 0x3b0   : > { %v956_v44 = vsel %vm420_vm2, %v2668_v43, 0.0 }
 0x3b1   : > { %957 = vadd.xlane.f32.xlu0 %v956_v44 }
 0x3c7   : > { %988 = vrot.lane.b32.xlu0 %v2979_v6, %s2726_s22 }
 0x3c9   : > { %v940_v21 = vpop.xlane.xlu0 %939 }
 0x3ca   : > { %v946_v45 = vsub.f32 %v930_v16, %v940_v21 }
 0x3cc   : > { %v952_v46 = vmul.f32 1.442695, %v946_v45 }
 0x3ce   : > { %2669 = vpow2.f32 %v952_v46 }
 0x3d4   : > { %v937_v47 = vpop.xlane.xlu1 %936 }
 0x3d5   : > { %v945_v48 = vsub.f32 %v929_v27, %v937_v47 }
 0x3d7   : > { %v950_v49 = vmul.f32 1.442695, %v945_v48 }
 0x3d8   : > { %v1045_v50 = vpop.permute.xlu1 %1044  ;;  %v2670_v52 = vpop.eup %2669 }
 0x3d9   : > { %2671 = vpow2.f32 %v950_v49  ;;  %v1050_v51 = vsel %vm473_vm3, %v1045_v50, 0  ;;  %v962_v54 = vsel %vm420_vm2, %v2670_v52, 0.0 }
 0x3da   : > { %2521 = vmatpush3.bf16.msra.mxu1 %v1050_v51 }
 0x3db   : > { %2532 = vmatprep.subr.bf16.mxu1 %v2723_v0 }
 0x3dc   : > { %v943_v55 = vpop.xlane.xlu0 %942  ;;  %v1101_v15 = vpop.permute.xlu1 %1100 }
 0x3dd   : > { %v947_v56 = vsub.f32 %v931_v33, %v943_v55  ;;  %v1106_v17 = vsel %vm473_vm3, %v1101_v15, 0 }
 0x3df   : > { %v954_v61 = vmul.f32 1.442695, %v947_v56 }
 0x3e0   : > { %v1157_v18 = vpop.permute.xlu1 %1156 }
 0x3e1   : > { %2673 = vpow2.f32 %v954_v61  ;;  %v1162_v29 = vsel %vm473_vm3, %v1157_v18, 0 }
 0x3e3   : > { %v2672_v60 = vpop.eup %2671 }
 0x3e4   : > { %v959_v53 = vsel %vm420_vm2, %v2672_v60, 0.0 }
 0x3e5   : > { %960 = vadd.xlane.f32.xlu1 %v959_v53 }
 0x3e6   : > { %963 = vadd.xlane.f32.xlu0 %v962_v54 }
 0x3eb   : > { %v2674_v3 = vpop.eup %2673 }
 0x3ec   : > { %v965_v4 = vsel %vm420_vm2, %v2674_v3, 0.0 }
 0x3f6   : > { %1309 = vrot.lane.b32.xlu1 %v2831_v58, %s2727_s29 }
 0x3fc   : > { %1259 = vrot.lane.b32.xlu0 %v2854_v62, %s2727_s29 }
 0x400   : > { %1257 = vrot.lane.b32.xlu0 %v2837_v59, %s2727_s29 }
 0x404   : > { %1307 = vrot.lane.b32.xlu0 %v2864_v2, %s2727_s29 }
 0x408   : > { %1357 = vrot.lane.b32.xlu0 %v2873_v1, %s2727_s29 }
 0x41a   : > { %966 = vadd.xlane.f32.xlu1 %v965_v4 }
 0x42b   : > { %1359 = vrot.lane.b32.xlu1 %v2880_v13, %s2727_s29 }
 0x42f   : > { %1409 = vrot.lane.b32.xlu1 %v2886_v11, %s2727_s29 }
 0x433   : > { %1407 = vrot.lane.b32.xlu1 %v2892_v14, %s2727_s29 }
 0x43e   : > { %v958_v7 = vpop.xlane.xlu0 %957 }
 0x43f   : > { %2675 = vrcp.f32 %v958_v7 }
 0x442   : > { %v989_v8 = vpop.permute.xlu0 %988 }
 0x443   : > { %v994_v9 = vsel %vm473_vm3, %v989_v8, 0 }
 0x444   : > { %2515 = vmatpush3.bf16.msra.mxu0 %v994_v9 }
 0x445   : > { %2526 = vmatprep.subr.bf16.mxu0 %v2723_v0 }
 0x449   : > { %v2676_v10 = vpop.eup %2675 }
 0x44a   : > { %v972_v5 = vmul.f32 %v2676_v10, %v2668_v43 }
 0x44c   : > { %v976_v16 = vpack.c.bf16 %v972_v5, %v972_v5 }
 0x44e   : > { %2517 = vmatmul.mubr.msk.bf16.vlgmr.msra.gmra.mrb[24].mxu0 %vm469_vm4, %v976_v16 }
 0x44f   : > { %2527 = vmatpush3.bf16.msra.mxu0 %v1106_v17  ;;  %2528 = vmatprep.mubr.msk.bf16.mxu0 %vm2724_vm0, %v2723_v0 }
 0x450   : > { %2538 = vmatprep.subr.bf16.mxu0 %v2723_v0 }
 0x472   : > { %v961_v19 = vpop.xlane.xlu1 %960 }
 0x473   : > { %2677 = vrcp.f32 %v961_v19  ;;  %v964_v20 = vpop.xlane.xlu0 %963 }
 0x474   : > { %2679 = vrcp.f32 %v964_v20 }
 0x476   : > { %v1310_v31 = vpop.permute.xlu1 %1309 }
 0x477   : > { %v1260_v24 = vpop.permute.xlu0 %1259  ;;  %v1315_v42 = vsel %vm231_vm1, %v1310_v31, 0 }
 0x478   : > { %v1265_v27 = vsel %vm231_vm1, %v1260_v24, 0 }
 0x47b   : > { %v1258_v30 = vpop.permute.xlu0 %1257 }
 0x47d   : > { %v2678_v12 = vpop.eup %2677 }
 0x47e   : > { %v2680_v22 = vpop.eup %2679  ;;  %v973_v23 = vmul.f32 %v2678_v12, %v2672_v60 }
 0x47f   : > { %v974_v25 = vmul.f32 %v2680_v22, %v2670_v52  ;;  %v1308_v34 = vpop.permute.xlu0 %1307 }
 0x480   : > { %v977_v26 = vpack.c.bf16 %v973_v23, %v973_v23 }
 0x481   : > { %v978_v28 = vpack.c.bf16 %v974_v25, %v974_v25 }
 0x482   : > { %2523 = vmatmul.mubr.msk.bf16.vlgmr.msra.gmra.mrb[24].mxu1 %vm469_vm4, %v977_v26 }
 0x483   : > { %2529 = vmatmul.mubr.msk.bf16.vlgmr.msra.gmra.mrb[28].mxu0 %vm469_vm4, %v978_v28  ;;  %2533 = vmatpush3.bf16.msra.mxu1 %v1162_v29  ;;  %v1358_v36 = vpop.permute.xlu0 %1357 }
 0x484   : > { %2539 = vmatpush3.bf16.xpose.msra.mxu0 %v1265_v27  ;;  %2540 = vmatprep.mubr.msk.bf16.mxu0 %vm2724_vm0, %v2723_v0 }
 0x485   : > { %2550 = vmatprep.subr.bf16.mxu0 %v2723_v0  ;;  %2534 = vmatprep.mubr.msk.bf16.mxu1 %vm2724_vm0, %v2723_v0 }
 0x486   : > { %2544 = vmatprep.subr.bf16.mxu1 %v2723_v0 }
 0x48b   : > { %2541 = vmatmul.mubr.msk.bf16.vlgmr.msra.gmra.mrb[32].mxu0 %vm231_vm1, %v1258_v30 }
 0x48c   : > { %2552 = vmatprep.mubr.msk.bf16.mxu0 %vm2724_vm0, %v2723_v0 }
 0x4a7   : > { %v967_v32 = vpop.xlane.xlu1 %966 }
 0x4a8   : > { %2681 = vrcp.f32 %v967_v32 }
 0x4ab   : > { %v1360_v33 = vpop.permute.xlu1 %1359 }
 0x4ac   : > { %v1365_v35 = vsel %vm231_vm1, %v1360_v33, 0 }
 0x4ad   : > { %2551 = vmatpush3.bf16.xpose.msra.mxu0 %v1365_v35 }
 0x4ae   : > { %2562 = vmatprep.subr.bf16.mxu0 %v2723_v0 }
 0x4af   : > { %v1410_v43 = vpop.permute.xlu1 %1409 }
 0x4b0   : > { %v1415_v44 = vsel %vm231_vm1, %v1410_v43, 0 }
 0x4b2   : > { %v2682_v37 = vpop.eup %2681 }
 0x4b3   : > { %v975_v41 = vmul.f32 %v2682_v37, %v2674_v3  ;;  %v1408_v21 = vpop.permute.xlu1 %1407 }
 0x4b4   : > { %2553 = vmatmul.mubr.msk.bf16.vlgmr.msra.gmra.mrb[36].mxu0 %vm231_vm1, %v1358_v36 }
 0x4b5   : > { %v979_v63 = vpack.c.bf16 %v975_v41, %v975_v41  ;;  %2564 = vmatprep.mubr.msk.bf16.mxu0 %vm2724_vm0, %v2723_v0 }
 0x4b7   : > { %2535 = vmatmul.mubr.msk.bf16.vlgmr.msra.gmra.mrb[28].mxu1 %vm469_vm4, %v979_v63 }
 0x4b8   : > { %2545 = vmatpush3.bf16.xpose.msra.mxu1 %v1315_v42  ;;  %2546 = vmatprep.mubr.msk.bf16.mxu1 %vm2724_vm0, %v2723_v0 }
 0x4b9   : > { %2556 = vmatprep.subr.bf16.mxu1 %v2723_v0 }
 0x4bf   : > { %2547 = vmatmul.mubr.msk.bf16.vlgmr.msra.gmra.mrb[32].mxu1 %vm231_vm1, %v1308_v34 }
 0x4c0   : > { %2557 = vmatpush3.bf16.xpose.msra.mxu1 %v1415_v44  ;;  %2558 = vmatprep.mubr.msk.bf16.mxu1 %vm2724_vm0, %v2723_v0 }
 0x4c1   : > { %2568 = vmatprep.subr.bf16.mxu1 %v2723_v0 }
 0x4c7   : > { %2559 = vmatmul.mubr.msk.bf16.vlgmr.msra.gmra.mrb[36].mxu1 %vm231_vm1, %v1408_v21 }
 0x4c8   : > { %2570 = vmatprep.mubr.msk.bf16.mxu1 %vm2724_vm0, %v2723_v0 }
 0x521   : > { %v3042_v45 = vpop.f32.mrb[24].mxu0 }
 0x522   : > { %v2518_v46 = vpop.f32.mrb[25].mxu0 }
 0x523   : > { %v1033_v47 = vpop.f32.mrb[26].mxu0 }
 0x524   : > { %v2519_v48 = vpop.f32.mrb[27].mxu0 }
 0x555   : > { %v3044_v49 = vpop.f32.mrb[24].mxu1 }
 0x556   : > { %v3046_v50 = vpop.f32.mrb[28].mxu0  ;;  %v2524_v51 = vpop.f32.mrb[25].mxu1 }
 0x557   : > { %v2530_v52 = vpop.f32.mrb[29].mxu0  ;;  %v1089_v60 = vpop.f32.mrb[26].mxu1 }
 0x558   : > { %v1145_v53 = vpop.f32.mrb[30].mxu0  ;;  %v2525_v54 = vpop.f32.mrb[27].mxu1 }
 0x559   : > { %v2531_v55 = vpop.f32.mrb[31].mxu0 }
 0x55e   : > { %v1301_v56 = vpop.f32.mrb[32].mxu0 }
 0x55f   : > { %v1457_v61 = vmul.f32 0.35355338, %v1301_v56  ;;  %v2542_v3 = vpop.f32.mrb[33].mxu0 }
 0x560   : > { %v1304_v4 = vpop.f32.mrb[34].mxu0 }
 0x561   : > { %v1461_v7 = vsel %vm420_vm2, %v1457_v61, -inf  ;;  %v2543_v8 = vpop.f32.mrb[35].mxu0 }
 0x562   : > { %1462 = vmax.xlane.f32.xlu0 %v1461_v7 }
 0x587   : > { %v1401_v9 = vpop.f32.mrb[36].mxu0 }
 0x588   : > { %v1459_v10 = vmul.f32 0.35355338, %v1401_v9  ;;  %v2554_v5 = vpop.f32.mrb[37].mxu0 }
 0x589   : > { %v1404_v15 = vpop.f32.mrb[38].mxu0 }
 0x58a   : > { %v3049_v16 = vpop.f32.mrb[28].mxu1  ;;  %v1467_v17 = vsel %vm420_vm2, %v1459_v10, -inf  ;;  %v2555_v18 = vpop.f32.mrb[39].mxu0 }
 0x58b   : > { %v2536_v19 = vpop.f32.mrb[29].mxu1  ;;  %1468 = vmax.xlane.f32.xlu0 %v1467_v17 }
 0x58c   : > { %v1201_v20 = vpop.f32.mrb[30].mxu1 }
 0x58d   : > { %v2537_v12 = vpop.f32.mrb[31].mxu1 }
 0x592   : > { %v1351_v22 = vpop.f32.mrb[32].mxu1 }
 0x593   : > { %v1458_v23 = vmul.f32 0.35355338, %v1351_v22  ;;  %v2548_v24 = vpop.f32.mrb[33].mxu1 }
 0x594   : > { %v1354_v25 = vpop.f32.mrb[34].mxu1 }
 0x595   : > { %v2549_v26 = vpop.f32.mrb[35].mxu1  ;;  %v1464_v27 = vsel %vm420_vm2, %v1458_v23, -inf }
 0x596   : > { %1465 = vmax.xlane.f32.xlu1 %v1464_v27 }
 0x59a   : > { %v1451_v28 = vpop.f32.mrb[36].mxu1 }
 0x59b   : > { %v1460_v29 = vmul.f32 0.35355338, %v1451_v28  ;;  %v2560_v30 = vpop.f32.mrb[37].mxu1 }
 0x59c   : > { %v1454_v31 = vpop.f32.mrb[38].mxu1 }
 0x59d   : > { %v1470_v32 = vsel %vm420_vm2, %v1460_v29, -inf  ;;  %v2561_v33 = vpop.f32.mrb[39].mxu1 }
 0x59e   : > { %1471 = vmax.xlane.f32.xlu0 %v1470_v32 }
 0x5a7   : > { %1557 = vrot.lane.b32.xlu1 %v2960_v38, %s2727_s29 }
 0x5ab   : > { %1605 = vrot.lane.b32.xlu1 %v2966_v39, %s2727_s29 }
 0x5af   : > { %1653 = vrot.lane.b32.xlu1 %v2972_v40, %s2727_s29 }
 0x5ef   : > { %v1463_v34 = vpop.xlane.xlu0 %1462 }
 0x5f0   : > { %v1473_v35 = vsub.f32 %v1457_v61, %v1463_v34 }
 0x5f2   : > { %v1477_v36 = vmul.f32 1.442695, %v1473_v35 }
 0x5f4   : > { %2683 = vpow2.f32 %v1477_v36 }
 0x5fe   : > { %v2684_v37 = vpop.eup %2683 }
 0x5ff   : > { %v1485_v41 = vsel %vm420_vm2, %v2684_v37, 0.0 }
 0x600   : > { %1486 = vadd.xlane.f32.xlu0 %v1485_v41 }
 0x616   : > { %1509 = vrot.lane.b32.xlu0 %v2979_v6, %s2727_s29 }
 0x618   : > { %v1469_v63 = vpop.xlane.xlu0 %1468 }
 0x619   : > { %v1475_v42 = vsub.f32 %v1459_v10, %v1469_v63 }
 0x61b   : > { %v1481_v43 = vmul.f32 1.442695, %v1475_v42 }
 0x61d   : > { %2685 = vpow2.f32 %v1481_v43 }
 0x623   : > { %v1466_v44 = vpop.xlane.xlu1 %1465 }
 0x624   : > { %v1474_v21 = vsub.f32 %v1458_v23, %v1466_v44 }
 0x626   : > { %v1479_v46 = vmul.f32 1.442695, %v1474_v21 }
 0x627   : > { %v1558_v47 = vpop.permute.xlu1 %1557  ;;  %v2686_v51 = vpop.eup %2685 }
 0x628   : > { %2687 = vpow2.f32 %v1479_v46  ;;  %v1563_v48 = vsel %vm473_vm3, %v1558_v47, 0  ;;  %v1491_v53 = vsel %vm420_vm2, %v2686_v51, 0.0 }
 0x629   : > { %2569 = vmatpush3.bf16.msra.mxu1 %v1563_v48 }
 0x62a   : > { %2580 = vmatprep.subr.bf16.mxu1 %v2723_v0 }
 0x62b   : > { %v1472_v54 = vpop.xlane.xlu0 %1471  ;;  %v1606_v4 = vpop.permute.xlu1 %1605 }
 0x62c   : > { %v1476_v55 = vsub.f32 %v1460_v29, %v1472_v54 }
 0x62e   : > { %v1483_v56 = vmul.f32 1.442695, %v1476_v55 }
 0x630   : > { %2689 = vpow2.f32 %v1483_v56 }
 0x632   : > { %v2688_v52 = vpop.eup %2687 }
 0x633   : > { %v1488_v60 = vsel %vm420_vm2, %v2688_v52, 0.0 }
 0x634   : > { %1489 = vadd.xlane.f32.xlu1 %v1488_v60 }
 0x635   : > { %1492 = vadd.xlane.f32.xlu0 %v1491_v53 }
 0x63a   : > { %v2690_v61 = vpop.eup %2689 }
 0x63b   : > { %v1494_v3 = vsel %vm420_vm2, %v2690_v61, 0.0 }
 0x645   : > { %1806 = vrot.lane.b32.xlu1 %v2831_v58, %s2728_s30 }
 0x64b   : > { %1756 = vrot.lane.b32.xlu0 %v2854_v62, %s2728_s30 }
 0x64f   : > { %1754 = vrot.lane.b32.xlu0 %v2837_v59, %s2728_s30 }
 0x653   : > { %1804 = vrot.lane.b32.xlu0 %v2864_v2, %s2728_s30 }
 0x657   : > { %1854 = vrot.lane.b32.xlu0 %v2873_v1, %s2728_s30 }
 0x669   : > { %1495 = vadd.xlane.f32.xlu1 %v1494_v3 }
 0x67a   : > { %1856 = vrot.lane.b32.xlu1 %v2880_v13, %s2728_s30  ;;  %v1611_v13 = vsel %vm473_vm3, %v1606_v4, 0 }
 0x67e   : > { %1906 = vrot.lane.b32.xlu1 %v2886_v11, %s2728_s30  ;;  %v1654_v11 = vpop.permute.xlu1 %1653 }
 0x67f   : > { %v1659_v12 = vsel %vm473_vm3, %v1654_v11, 0 }
 0x682   : > { %1904 = vrot.lane.b32.xlu1 %v2892_v14, %s2728_s30 }
 0x68d   : > { %v1487_v58 = vpop.xlane.xlu0 %1486 }
 0x68e   : > { %2691 = vrcp.f32 %v1487_v58 }
 0x691   : > { %v1510_v59 = vpop.permute.xlu0 %1509 }
 0x692   : > { %v1515_v62 = vsel %vm473_vm3, %v1510_v59, 0 }
 0x693   : > { %2563 = vmatpush3.bf16.msra.mxu0 %v1515_v62 }
 0x694   : > { %2574 = vmatprep.subr.bf16.mxu0 %v2723_v0 }
 0x698   : > { %v2692_v2 = vpop.eup %2691 }
 0x699   : > { %v1501_v1 = vmul.f32 %v2692_v2, %v2684_v37 }
 0x69b   : > { %v1505_v7 = vpack.c.bf16 %v1501_v1, %v1501_v1 }
 0x69d   : > { %2565 = vmatmul.mubr.msk.bf16.vlgmr.msra.gmra.mrb[40].mxu0 %vm469_vm4, %v1505_v7 }
 0x69e   : > { %2575 = vmatpush3.bf16.msra.mxu0 %v1611_v13  ;;  %2576 = vmatprep.mubr.msk.bf16.mxu0 %vm2724_vm0, %v2723_v0 }
 0x69f   : > { %2586 = vmatprep.subr.bf16.mxu0 %v2723_v0 }
 0x6c1   : > { %v1490_v14 = vpop.xlane.xlu1 %1489 }
 0x6c2   : > { %2693 = vrcp.f32 %v1490_v14  ;;  %v1493_v8 = vpop.xlane.xlu0 %1492 }
 0x6c3   : > { %2695 = vrcp.f32 %v1493_v8 }
 0x6c5   : > { %v1807_v23 = vpop.permute.xlu1 %1806 }
 0x6c6   : > { %v1757_v15 = vpop.permute.xlu0 %1756  ;;  %v1812_v32 = vsel %vm231_vm1, %v1807_v23, 0 }
 0x6c7   : > { %v1762_v19 = vsel %vm231_vm1, %v1757_v15, 0 }
 0x6ca   : > { %v1755_v22 = vpop.permute.xlu0 %1754 }
 0x6cc   : > { %v2694_v9 = vpop.eup %2693 }
 0x6cd   : > { %v2696_v10 = vpop.eup %2695  ;;  %v1502_v5 = vmul.f32 %v2694_v9, %v2688_v52 }
 0x6ce   : > { %v1503_v17 = vmul.f32 %v2696_v10, %v2686_v51  ;;  %v1805_v26 = vpop.permute.xlu0 %1804 }
 0x6cf   : > { %v1506_v18 = vpack.c.bf16 %v1502_v5, %v1502_v5 }
 0x6d0   : > { %v1507_v20 = vpack.c.bf16 %v1503_v17, %v1503_v17 }
 0x6d1   : > { %2571 = vmatmul.mubr.msk.bf16.vlgmr.msra.gmra.mrb[40].mxu1 %vm469_vm4, %v1506_v18 }
 0x6d2   : > { %2577 = vmatmul.mubr.msk.bf16.vlgmr.msra.gmra.mrb[44].mxu0 %vm469_vm4, %v1507_v20  ;;  %2581 = vmatpush3.bf16.msra.mxu1 %v1659_v12  ;;  %v1855_v28 = vpop.permute.xlu0 %1854 }
 0x6d3   : > { %2587 = vmatpush3.bf16.xpose.msra.mxu0 %v1762_v19  ;;  %2588 = vmatprep.mubr.msk.bf16.mxu0 %vm2724_vm0, %v2723_v0 }
 0x6d4   : > { %2598 = vmatprep.subr.bf16.mxu0 %v2723_v0  ;;  %2582 = vmatprep.mubr.msk.bf16.mxu1 %vm2724_vm0, %v2723_v0 }
 0x6d5   : > { %2592 = vmatprep.subr.bf16.mxu1 %v2723_v0 }
 0x6da   : > { %2589 = vmatmul.mubr.msk.bf16.vlgmr.msra.gmra.mrb[48].mxu0 %vm231_vm1, %v1755_v22 }
 0x6db   : > { %2600 = vmatprep.mubr.msk.bf16.mxu0 %vm2724_vm0, %v2723_v0 }
 0x6f6   : > { %v1496_v24 = vpop.xlane.xlu1 %1495 }
 0x6f7   : > { %2697 = vrcp.f32 %v1496_v24 }
 0x6fa   : > { %v1857_v25 = vpop.permute.xlu1 %1856 }
 0x6fb   : > { %v1862_v27 = vsel %vm231_vm1, %v1857_v25, 0 }
 0x6fc   : > { %2599 = vmatpush3.bf16.xpose.msra.mxu0 %v1862_v27 }
 0x6fd   : > { %2610 = vmatprep.subr.bf16.mxu0 %v2723_v0 }
 0x6fe   : > { %v1907_v33 = vpop.permute.xlu1 %1906 }
 0x6ff   : > { %v1912_v34 = vsel %vm231_vm1, %v1907_v33, 0 }
 0x701   : > { %v2698_v29 = vpop.eup %2697 }
 0x702   : > { %v1504_v30 = vmul.f32 %v2698_v29, %v2690_v61  ;;  %v1905_v35 = vpop.permute.xlu1 %1904 }
 0x703   : > { %2601 = vmatmul.mubr.msk.bf16.vlgmr.msra.gmra.mrb[52].mxu0 %vm231_vm1, %v1855_v28 }
 0x704   : > { %v1508_v31 = vpack.c.bf16 %v1504_v30, %v1504_v30  ;;  %2612 = vmatprep.mubr.msk.bf16.mxu0 %vm2724_vm0, %v2723_v0 }
 0x706   : > { %2583 = vmatmul.mubr.msk.bf16.vlgmr.msra.gmra.mrb[44].mxu1 %vm469_vm4, %v1508_v31 }
 0x707   : > { %2593 = vmatpush3.bf16.xpose.msra.mxu1 %v1812_v32  ;;  %2594 = vmatprep.mubr.msk.bf16.mxu1 %vm2724_vm0, %v2723_v0 }
 0x708   : > { %2604 = vmatprep.subr.bf16.mxu1 %v2723_v0 }
 0x70e   : > { %2595 = vmatmul.mubr.msk.bf16.vlgmr.msra.gmra.mrb[48].mxu1 %vm231_vm1, %v1805_v26 }
 0x70f   : > { %2605 = vmatpush3.bf16.xpose.msra.mxu1 %v1912_v34  ;;  %2606 = vmatprep.mubr.msk.bf16.mxu1 %vm2724_vm0, %v2723_v0 }
 0x710   : > { %2616 = vmatprep.subr.bf16.mxu1 %v2723_v0 }
 0x716   : > { %2607 = vmatmul.mubr.msk.bf16.vlgmr.msra.gmra.mrb[52].mxu1 %vm231_vm1, %v1905_v35 }
 0x717   : > { %2618 = vmatprep.mubr.msk.bf16.mxu1 %vm2724_vm0, %v2723_v0 }
 0x770   : > { %v3122_v36 = vpop.f32.mrb[40].mxu0 }
 0x771   : > { %v2566_v37 = vpop.f32.mrb[41].mxu0 }
 0x772   : > { %v1554_v41 = vpop.f32.mrb[42].mxu0 }
 0x773   : > { %v2567_v63 = vpop.f32.mrb[43].mxu0  ;;  %v1204_v41 = vpack.c.bf16 %v3042_v45, %v3042_v45 }
 0x775   : > { %v1218_v63 = vrot.slane %v1204_v41, %v2827_v57 }
 0x7a4   : > { %v3124_v42 = vpop.f32.mrb[40].mxu1 }
 0x7a5   : > { %v3126_v43 = vpop.f32.mrb[44].mxu0  ;;  %v2572_v44 = vpop.f32.mrb[41].mxu1 }
 0x7a6   : > { %v2578_v21 = vpop.f32.mrb[45].mxu0  ;;  %v1602_v46 = vpop.f32.mrb[42].mxu1  ;;  %v1206_v44 = vpack.c.bf16 %v3046_v50, %v3046_v50 }
 0x7a7   : > { %v1650_v47 = vpop.f32.mrb[46].mxu0  ;;  %v2573_v48 = vpop.f32.mrb[43].mxu1  ;;  %v1701_v46 = vpack.c.bf16 %v3122_v36, %v3122_v36 }
 0x7a8   : > { %v2579_v51 = vpop.f32.mrb[47].mxu0  ;;  %v1232_v21 = vrot.slane %v1206_v44, %v2827_v57 }
 0x7a9   : > { %v1715_v45 = vrot.slane %v1701_v46, %v2827_v57 }
 0x7ad   : > { %v1798_v52 = vpop.f32.mrb[48].mxu0 }
 0x7ae   : > { %v1954_v60 = vmul.f32 0.35355338, %v1798_v52  ;;  %v2590_v53 = vpop.f32.mrb[49].mxu0  ;;  %v1205_v52 = vpack.c.bf16 %v3044_v49, %v3044_v49 }
 0x7af   : > { %v1801_v54 = vpop.f32.mrb[50].mxu0  ;;  %v1702_v53 = vpack.c.bf16 %v3124_v42, %v3124_v42 }
 0x7b0   : > { %v1958_v55 = vsel %vm420_vm2, %v1954_v60, -inf  ;;  %v2591_v56 = vpop.f32.mrb[51].mxu0 }
 0x7b1   : > { %1959 = vmax.xlane.f32.xlu0 %v1958_v55  ;;  %v1722_v54 = vrot.slane %v1702_v53, %v2827_v57 }
 0x7d6   : > { %v1898_v61 = vpop.f32.mrb[52].mxu0 }
 0x7d7   : > { %v1956_v3 = vmul.f32 0.35355338, %v1898_v61  ;;  %v2602_v58 = vpop.f32.mrb[53].mxu0 }
 0x7d8   : > { %v1901_v59 = vpop.f32.mrb[54].mxu0 }
 0x7d9   : > { %v3129_v62 = vpop.f32.mrb[44].mxu1  ;;  %v1964_v2 = vsel %vm420_vm2, %v1956_v3, -inf  ;;  %v2603_v1 = vpop.f32.mrb[55].mxu0 }
 0x7da   : > { %v2584_v4 = vpop.f32.mrb[45].mxu1  ;;  %1965 = vmax.xlane.f32.xlu0 %v1964_v2  ;;  %v1704_v49 = vpack.c.bf16 %v3129_v62, %v3129_v62 }
 0x7db   : > { %v1698_v7 = vpop.f32.mrb[46].mxu1 }
 0x7dc   : > { %v2585_v13 = vpop.f32.mrb[47].mxu1 }
 0x7e1   : > { %v1848_v11 = vpop.f32.mrb[48].mxu1 }
 0x7e2   : > { %v1955_v14 = vmul.f32 0.35355338, %v1848_v11  ;;  %v2596_v8 = vpop.f32.mrb[49].mxu1 }
 0x7e3   : > { %v1851_v9 = vpop.f32.mrb[50].mxu1 }
 0x7e4   : > { %v2597_v10 = vpop.f32.mrb[51].mxu1  ;;  %v1961_v5 = vsel %vm420_vm2, %v1955_v14, -inf }
 0x7e5   : > { %1962 = vmax.xlane.f32.xlu1 %v1961_v5 }
 0x7e9   : > { %v1948_v15 = vpop.f32.mrb[52].mxu1 }
 0x7ea   : > { %v1957_v17 = vmul.f32 0.35355338, %v1948_v15  ;;  %v2608_v18 = vpop.f32.mrb[53].mxu1 }
 0x7eb   : > { %v1951_v19 = vpop.f32.mrb[54].mxu1 }
 0x7ec   : > { %v1967_v20 = vsel %vm420_vm2, %v1957_v17, -inf  ;;  %v2609_v12 = vpop.f32.mrb[55].mxu1 }
 0x7ed   : > { %1968 = vmax.xlane.f32.xlu0 %v1967_v20 }
 0x83e   : > { %v1960_v22 = vpop.xlane.xlu0 %1959 }
 0x83f   : > { %v1970_v23 = vsub.f32 %v1954_v60, %v1960_v22 }
 0x841   : > { %v1974_v24 = vmul.f32 1.442695, %v1970_v23 }
 0x843   : > { %2699 = vpow2.f32 %v1974_v24 }
 0x84d   : > { %v2700_v25 = vpop.eup %2699 }
 0x84e   : > { %v1982_v26 = vsel %vm420_vm2, %v2700_v25, 0.0 }
 0x84f   : > { %1983 = vadd.xlane.f32.xlu0 %v1982_v26 }
 0x867   : > { %v1966_v27 = vpop.xlane.xlu0 %1965 }
 0x868   : > { %v1972_v28 = vsub.f32 %v1956_v3, %v1966_v27 }
 0x86a   : > { %v1978_v29 = vmul.f32 1.442695, %v1972_v28 }
 0x86c   : > { %2701 = vpow2.f32 %v1978_v29 }
 0x872   : > { %v1963_v30 = vpop.xlane.xlu1 %1962 }
 0x873   : > { %v1971_v31 = vsub.f32 %v1955_v14, %v1963_v30 }
 0x875   : > { %v1976_v32 = vmul.f32 1.442695, %v1971_v31 }
 0x876   : > { %v3135_v33 = vpop.eup %2701 }
 0x877   : > { %2703 = vpow2.f32 %v1976_v32  ;;  %v1988_v34 = vsel %vm420_vm2, %v3135_v33, 0.0 }
 0x878   : > { %1989 = vadd.xlane.f32.xlu0 %v1988_v34 }
 0x87a   : > { %v1969_v47 = vpop.xlane.xlu0 %1968 }
 0x87b   : > { %v1973_v48 = vsub.f32 %v1957_v17, %v1969_v47 }
 0x87d   : > { %v1980_v36 = vmul.f32 1.442695, %v1973_v48 }
 0x87f   : > { %2705 = vpow2.f32 %v1980_v36 }
 0x881   : > { %v3139_v35 = vpop.eup %2703 }
 0x882   : > { %v1985_v37 = vsel %vm420_vm2, %v3139_v35, 0.0 }
 0x883   : > { %1986 = vadd.xlane.f32.xlu1 %v1985_v37 }
 0x889   : > { %v2706_v51 = vpop.eup %2705 }
 0x88e   : > { %2006 = vrot.lane.b32.xlu0 %v2979_v6, %s2728_s30  ;;  %v1703_v6 = vpack.c.bf16 %v3126_v43, %v3126_v43  ;;  %v1207_v43 = vpack.c.bf16 %v3049_v16, %v3049_v16 }
 0x890   : > { %v1729_v50 = vrot.slane %v1703_v6, %v2827_v57  ;;  %v1239_v60 = vrot.slane %v1207_v43, %v2827_v57 }
 0x892   : > { %1240 = vrot.lane.b32.xlu0 %v1218_v63, %s2729_s4 }
 0x894   : > { %2054 = vrot.lane.b32.xlu1 %v2960_v38, %s2728_s30  ;;  %v1991_v38 = vsel %vm420_vm2, %v2706_v51, 0.0 }
 0x896   : > { %1244 = vrot.lane.b32.xlu0 %v1232_v21, %s2729_s4 }
 0x898   : > { %2102 = vrot.lane.b32.xlu1 %v2966_v39, %s2728_s30  ;;  %v1225_v39 = vrot.slane %v1205_v52, %v2827_v57 }
 0x89a   : > { %1737 = vrot.lane.b32.xlu0 %v1715_v45, %s2730_s5 }
 0x89e   : > { %1741 = vrot.lane.b32.xlu0 %v1729_v50, %s2730_s5 }
 0x8bc   : > { %1992 = vadd.xlane.f32.xlu1 %v1991_v38 }
 0x8cd   : > { %2150 = vrot.lane.b32.xlu1 %v2972_v40, %s2728_s30  ;;  %v1736_v40 = vrot.slane %v1704_v49, %v2827_v57 }
 0x8d1   : > { %1242 = vrot.lane.b32.xlu1 %v1225_v39, %s2729_s4 }
 0x8d5   : > { %1246 = vrot.lane.b32.xlu1 %v1239_v60, %s2729_s4 }
 0x8d9   : > { %1739 = vrot.lane.b32.xlu1 %v1722_v54, %s2730_s5 }
 0x8dc   : > { %v1984_v55 = vpop.xlane.xlu0 %1983 }
 0x8dd   : > { %1743 = vrot.lane.b32.xlu1 %v1736_v40, %s2730_s5  ;;  %2707 = vrcp.f32 %v1984_v55 }
 0x8e7   : > { %v2708_v16 = vpop.eup %2707 }
 0x8e8   : > { %v1998_v61 = vmul.f32 %v2708_v16, %v2700_v25 }
 0x8ea   : > { %v2002_v58 = vpack.c.bf16 %v1998_v61, %v1998_v61 }
 0x905   : > { %v1990_v56 = vpop.xlane.xlu0 %1989 }
 0x906   : > { %2709 = vrcp.f32 %v1990_v56 }
 0x909   : > { %v2007_v3 = vpop.permute.xlu0 %2006 }
 0x90a   : > { %v2012_v42 = vsel %vm473_vm3, %v2007_v3, 0 }
 0x90b   : > { %2611 = vmatpush3.bf16.msra.mxu0 %v2012_v42 }
 0x90c   : > { %2622 = vmatprep.subr.bf16.mxu0 %v2723_v0 }
 0x90d   : > { %v1241_v59 = vpop.permute.xlu0 %1240 }
 0x90e   : > { %1253 = vst.msk [vmem:[%s2944_s28] sm:$0x3] %vm1252_vm6, %v1241_v59  ;;  %2613 = vmatmul.mubr.msk.bf16.vlgmr.msra.gmra.mrb[56].mxu0 %vm469_vm4, %v2002_v58 }
 0x90f   : > { %2624 = vmatprep.mubr.msk.bf16.mxu0 %vm2724_vm0, %v2723_v0 }
 0x910   : > { %v1987_v62 = vpop.xlane.xlu1 %1986  ;;  %v2710_v2 = vpop.eup %2709 }
 0x911   : > { %2711 = vrcp.f32 %v1987_v62  ;;  %v2000_v7 = vmul.f32 %v2710_v2, %v3135_v33  ;;  %v1245_v17 = vpop.permute.xlu0 %1244 }
 0x912   : > { %1255 = vst.msk [vmem:[%s2944_s28 + $0x4] sm:$0x3] %vm1252_vm6, %v1245_v17 }
 0x913   : > { %v2004_v8 = vpack.c.bf16 %v2000_v7, %v2000_v7 }
 0x914   : > { %v2055_v1 = vpop.permute.xlu1 %2054 }
 0x915   : > { %v2060_v4 = vsel %vm473_vm3, %v2055_v1, 0  ;;  %v1738_v12 = vpop.permute.xlu0 %1737 }
 0x916   : > { %2617 = vmatpush3.bf16.msra.mxu1 %v2060_v4  ;;  %1750 = vst.msk [vmem:[%s2944_s28] sm:$0x3] %vm1749_vm7, %v1738_v12 }
 0x917   : > { %2628 = vmatprep.subr.bf16.mxu1 %v2723_v0 }
 0x918   : > { %v2103_v13 = vpop.permute.xlu1 %2102 }
 0x919   : > { %v2108_v11 = vsel %vm473_vm3, %v2103_v13, 0  ;;  %v1742_v25 = vpop.permute.xlu0 %1741 }
 0x91a   : > { %2623 = vmatpush3.bf16.msra.mxu0 %v2108_v11  ;;  %1752 = vst.msk [vmem:[%s2944_s28 + $0x4] sm:$0x3] %vm1749_vm7, %v1742_v25 }
 0x91b   : > { %v2712_v14 = vpop.eup %2711 }
 0x91c   : > { %v1999_v9 = vmul.f32 %v2712_v14, %v3139_v35 }
 0x91d   : > { %2625 = vmatmul.mubr.msk.bf16.vlgmr.msra.gmra.mrb[60].mxu0 %vm469_vm4, %v2004_v8 }
 0x91e   : > { %v2003_v10 = vpack.c.bf16 %v1999_v9, %v1999_v9 }
 0x920   : > { %2619 = vmatmul.mubr.msk.bf16.vlgmr.msra.gmra.mrb[56].mxu1 %vm469_vm4, %v2003_v10 }
 0x921   : > { %2630 = vmatprep.mubr.msk.bf16.mxu1 %vm2724_vm0, %v2723_v0 }
 0x949   : > { %v1993_v5 = vpop.xlane.xlu1 %1992 }
 0x94a   : > { %2713 = vrcp.f32 %v1993_v5 }
 0x94d   : > { %v2151_v15 = vpop.permute.xlu1 %2150 }
 0x94e   : > { %v2156_v18 = vsel %vm473_vm3, %v2151_v15, 0 }
 0x94f   : > { %2629 = vmatpush3.bf16.msra.mxu1 %v2156_v18 }
 0x951   : > { %v1243_v19 = vpop.permute.xlu1 %1242 }
 0x952   : > { %1254 = vst.msk [vmem:[%s2944_s28 + $0x2] sm:$0x3] %vm1252_vm6, %v1243_v19 }
 0x954   : > { %v2714_v20 = vpop.eup %2713 }
 0x955   : > { %v2001_v0 = vmul.f32 %v2714_v20, %v2706_v51  ;;  %v1247_v22 = vpop.permute.xlu1 %1246 }
 0x956   : > { %1256 = vst.msk [vmem:[%s2944_s28 + $0x6] sm:$0x3] %vm1252_vm6, %v1247_v22 }
 0x957   : > { %v2005_v23 = vpack.c.bf16 %v2001_v0, %v2001_v0 }
 0x959   : > { %2631 = vmatmul.mubr.msk.bf16.vlgmr.msra.gmra.mrb[60].mxu1 %vm469_vm4, %v2005_v23  ;;  %v1740_v24 = vpop.permute.xlu1 %1739 }
 0x95a   : > { %1751 = vst.msk [vmem:[%s2944_s28 + $0x2] sm:$0x3] %vm1749_vm7, %v1740_v24 }
 0x95d   : > { %v1744_v26 = vpop.permute.xlu1 %1743 }
 0x95e   : > { %1753 = vst.msk [vmem:[%s2944_s28 + $0x6] sm:$0x3] %vm1749_vm7, %v1744_v26 }
 0x9e1   : > { %v2048_v27 = vpop.f32.mrb[56].mxu0 }
 0x9e2   : > { %v2198_v28 = vpack.c.bf16 %v2048_v27, %v2048_v27  ;;  %v2614_v29 = vpop.f32.mrb[57].mxu0 }
 0x9e3   : > { %v2051_v30 = vpop.f32.mrb[58].mxu0 }
 0x9e4   : > { %v2212_v31 = vrot.slane %v2198_v28, %v2827_v57  ;;  %v2615_v32 = vpop.f32.mrb[59].mxu0 }
 0x9e6   : > { %2234 = vrot.lane.b32.xlu0 %v2212_v31, %s2731_s6 }
 0x9f0   : > { %v2144_v33 = vpop.f32.mrb[60].mxu0 }
 0x9f1   : > { %v2200_v34 = vpack.c.bf16 %v2144_v33, %v2144_v33  ;;  %v2626_v35 = vpop.f32.mrb[61].mxu0 }
 0x9f2   : > { %v2147_v37 = vpop.f32.mrb[62].mxu0 }
 0x9f3   : > { %v2226_v41 = vrot.slane %v2200_v34, %v2827_v57  ;;  %v2096_v63 = vpop.f32.mrb[56].mxu1  ;;  %v2627_v44 = vpop.f32.mrb[63].mxu0 }
 0x9f4   : > { %v2199_v21 = vpack.c.bf16 %v2096_v63, %v2096_v63  ;;  %v2620_v46 = vpop.f32.mrb[57].mxu1 }
 0x9f5   : > { %v2099_v45 = vpop.f32.mrb[58].mxu1  ;;  %2238 = vrot.lane.b32.xlu0 %v2226_v41, %s2731_s6 }
 0x9f6   : > { %v2219_v6 = vrot.slane %v2199_v21, %v2827_v57  ;;  %v2621_v50 = vpop.f32.mrb[59].mxu1 }
 0x9f8   : > { %2236 = vrot.lane.b32.xlu1 %v2219_v6, %s2731_s6 }
 0xa2c   : > { %v2192_v47 = vpop.f32.mrb[60].mxu1 }
 0xa2d   : > { %v2201_v48 = vpack.c.bf16 %v2192_v47, %v2192_v47  ;;  %v2632_v36 = vpop.f32.mrb[61].mxu1 }
 0xa2e   : > { %v2195_v51 = vpop.f32.mrb[62].mxu1 }
 0xa2f   : > { %v2233_v38 = vrot.slane %v2201_v48, %v2827_v57  ;;  %v2633_v52 = vpop.f32.mrb[63].mxu1 }
 0xa31   : > { %2240 = vrot.lane.b32.xlu1 %v2233_v38, %s2731_s6 }
 0xa58   : > { %v2235_v39 = vpop.permute.xlu0 %2234 }
 0xa59   : > { %2247 = vst.msk [vmem:[%s2944_s28] sm:$0x3] %vm2246_vm8, %v2235_v39 }
 0xa67   : > { %v2239_v60 = vpop.permute.xlu0 %2238 }
 0xa68   : > { %2249 = vst.msk [vmem:[%s2944_s28 + $0x4] sm:$0x3] %vm2246_vm8, %v2239_v60 }
 0xa6a   : > { %v2237_v43 = vpop.permute.xlu1 %2236 }
 0xa6b   : > { %2248 = vst.msk [vmem:[%s2944_s28 + $0x2] sm:$0x3] %vm2246_vm8, %v2237_v43 }
 0xaa3   : > { %v2241_v53 = vpop.permute.xlu1 %2240 }
 0xaa4   : > { %2250 = vst.msk [vmem:[%s2944_s28 + $0x6] sm:$0x3] %vm2246_vm8, %v2241_v53 }
 0xaa5 PF: > { %s13_s12 = sadd.s32 1, %s2721_s12  }
 0xaa6   : > { %p10_p4 = scmp.ge.s32.totalorder %s13_s12, 4  }
 0xaa8   :  { %12 = sbr.rel (!%p10_p4) target bundleno = 1 (0x1), region = 68 }

// kernel: timesformer_forward.22
= control target key start
LH: loop header
LB: loop body
LE: loop exit
PB: predicated region body
PF: predicated region fallthrough
CT: control target
= control target key end

     0   :  { %s982_s12 = smov 0   ;;  %s984_s13 = smov 0   ;;  %s1120_s0 = inlined_call_operand.vmem [shape: bf16[40,32], index: 0, kind: input, shape index: {}]   ;;  %s1121_s1 = inlined_call_operand.vmem [shape: bf16[32,32], index: 1, kind: input, shape index: {}]   ;;  %s1122_s2 = inlined_call_operand.vmem [shape: f32[1,32], index: 2, kind: input, shape index: {}]   ;;  %s1123_s3 = inlined_call_operand.vmem [shape: bf16[40,32], index: 3, kind: output, shape index: {}]  }
   0x1   :  { %s986_s14 = smov 0   ;;  %s988_s15 = smov 0  }
   0x2   :  { %s990_s16 = smov 0  }
   0x3 LB: > { %s691_s17 = sadd.s32 4294967295, %s927_s16   ;;  %s32_s18 = sadd.s32 1, %s923_s15  ;;  %s927_s16 = sphi %s990_s16, %s13_s16   ;;  %s923_s15 = sphi %s988_s15, %s1131_s15   ;;  %s919_s14 = sphi %s986_s14, %s1130_s14   ;;  %s915_s13 = sphi %s984_s13, %s1129_s13   ;;  %s911_s12 = sphi %s982_s12, %s1128_s12  }
   0x4   : > { %p34_p0 = scmp.ge.s32.totalorder %s32_s18, 2  ;;  %s123_s19 = sadd.s32 1, %s915_s13 }
   0x5   : > { %p133_p1 = scmp.ne.s32.totalorder %s915_s13, %s911_s12  ;;  %p134_p2 = scmp.eq.s32.totalorder %s691_s17, 1 }
   0x6   : > { %s1133_s18 = smov (%p34_p0, %s32_s18), 0  ;;  %p697_p4 = scmp.ge.s32.totalorder %s927_s16, 1 }
   0x7   : > { %p1014_p3 = por %p134_p2, %p133_p1  ;;  %s118_s21 = ssub.s32 %s923_s15, %s1133_s18 }
   0x8   : > { %p196_p5 = scmp.lt.s32.totalorder %s927_s16, 3  ;;  %p121_p6 = scmp.eq.s32.totalorder %s118_s21, 0 }
   0xa   : > { %p197_p7 = pnand %p697_p4, %p196_p5 }
   0xb   : > { %s1023_s22 = scalar_select %p121_p6, %s915_s13, %s123_s19  }
   0xc   : > { %200 = sbr.rel (%p197_p7) target bundleno = 308 (0x134), region = 32  ;;  %v853_v0 = vld [vmem:[%s1121_s1] sm:$0xff] (!%p197_p7)   ;;  %s1029_s25 = sshll.u32 (!%p197_p7), %s919_s14, 2  ;;  %v854_v1 = vld [vmem:[%s1121_s1 + $0x8] sm:$0xff] (!%p197_p7)   ;;  %vm276_vm0 = vcmask (!%p197_p7), 261120   ;;  %v961_v2 = vmov (!%p197_p7), 0.0  }
   0xd   : > { %p242_p8 = scmp.lt.s32.totalorder (!%p197_p7), %s1029_s25, 4  ;;  %740 = vmatprep.subr.bf16.mxu0 (!%p197_p7), %v853_v0  ;;  %279 = vst.msk [vmem:[#allocation2 + $0x10] sm:$0xff] (!%p197_p7), %vm276_vm0, %v961_v2  ;;  %277 = vst.msk [vmem:[#allocation2] sm:$0xff] (!%p197_p7), %vm276_vm0, %v961_v2  ;;  %s234_s6 = sand.u32 (!%p197_p7), 1, %s911_s12   ;;  %v707_v17 = vld [vmem:[%s1122_s2] ss:$0 sm:$0xff] (!%p197_p7) }
   0xe   : > { %741 = vmatpush3.bf16.msra.mxu0 (!%p197_p7), %v853_v0  ;;  %278 = vst.msk [vmem:[#allocation2 + $0x8] sm:$0xff] (!%p197_p7), %vm276_vm0, %v961_v2  ;;  %280 = vst.msk [vmem:[#allocation2 + $0x18] sm:$0xff] (!%p197_p7), %vm276_vm0, %v961_v2  ;;  %s698_s9 = sshll.u32 (!%p197_p7), %s234_s6, 4  ;;  %vm413_vm1 = vcmask (!%p197_p7), 257024  }
   0xf   : > { %742 = vmatprep.subr.bf16.mxu0 (!%p197_p7), %v854_v1  ;;  %s1053_s10 = scalar_lea.vmem (!%p197_p7), [#allocation3], %s698_s9  }
  0x12   : > { %743 = vmatpush3.bf16.msra.mxu0 (!%p197_p7), %v854_v1 }
  0x13   : > { %s243_s28 = scalar_select %p242_p8, %s1029_s25, 4 }
  0x14   : > { %v283_v5 = vld [vmem:[#allocation2 + $0x10] sm:$0xff]  ;;  %v281_v6 = vld [vmem:[#allocation2] sm:$0xff]  ;;  %s426_s11 = ssub.s32 (%p1014_p3), 5, %s1029_s25  ;;  %s733_s12 = sshll.u32 (%p1014_p3), %s919_s14, 4 }
  0x15   : > { %s700_s29 = sshll.u32 %s243_s28, 2  ;;  %v284_v8 = vld [vmem:[#allocation2 + $0x18] sm:$0xff]  ;;  %v282_v11 = vld [vmem:[#allocation2 + $0x8] sm:$0xff]  ;;  %p427_p9 = scmp.lt.s32.totalorder (%p1014_p3), %s426_s11, 4 }
  0x16   : > { %s248_s5 = scalar_lea.vmem %s1120_s0, %s700_s29  ;;  %s1066_s21 = scalar_lea.vmem (%p1014_p3), %s1123_s3, %s733_s12  }
  0x17   : > { %v855_v3 = vld [vmem:[%s248_s5] sm:$0xff]   ;;  %v856_v4 = vld [vmem:[%s248_s5 + $0x8] sm:$0xff]  }
  0x18   : > { %744 = vmatprep.mubr.msk.bf16.mxu0 %vm276_vm0, %v855_v3 }
  0x19   : > { %745 = vmatmul.mubr.msk.bf16.vlgmr.msra.gmra.mrb[0].mxu0 %vm276_vm0, %v856_v4 }
  0xec   : > { %v746_v7 = vpop.f32.mrb[0].mxu0 }
  0xed   : > { %v373_v9 = vadd.f32 %v746_v7, %v283_v5  ;;  %v356_v10 = vpop.f32.mrb[1].mxu0 }
  0xee   : > { %v371_v12 = vadd.f32 %v356_v10, %v281_v6  ;;  %v747_v13 = vpop.f32.mrb[2].mxu0 }
  0xef   : > { %377 = vst.msk [vmem:[#allocation2 + $0x10] sm:$0xff] %vm276_vm0, %v373_v9  ;;  %v374_v14 = vadd.f32 %v747_v13, %v284_v8  ;;  %v359_v15 = vpop.f32.mrb[3].mxu0 }
  0xf0   : > { %375 = vst.msk [vmem:[#allocation2] sm:$0xff] %vm276_vm0, %v371_v12  ;;  %v372_v16 = vadd.f32 %v359_v15, %v282_v11 }
  0xf1   : > { %378 = vst.msk [vmem:[#allocation2 + $0x18] sm:$0xff] %vm276_vm0, %v374_v14 }
  0xf2   : > { %376 = vst.msk [vmem:[#allocation2 + $0x8] sm:$0xff] %vm276_vm0, %v372_v16 }
  0xf6   : > { %v384_v18 = vld [vmem:[#allocation2 + $0x10] sm:$0xff] }
  0xf7   : > { %v395_v19 = vadd.f32 %v707_v17, %v384_v18  ;;  %v382_v20 = vld [vmem:[#allocation2] sm:$0xff] }
  0xf8   : > { %v393_v21 = vadd.f32 %v707_v17, %v382_v20  ;;  %v385_v22 = vld [vmem:[#allocation2 + $0x18] sm:$0xff]  ;;  %424 = sbr.rel (!%p1014_p3) target bundleno = 308 (0x134), region = 44 }
  0xf9   : > { %v731_v23 = vpack.c.bf16 %v395_v19, %v395_v19  ;;  %v396_v24 = vadd.f32 %v707_v17, %v385_v22  ;;  %v383_v25 = vld [vmem:[#allocation2 + $0x8] sm:$0xff] }
  0xfa   : > { %v729_v26 = vpack.c.bf16 %v393_v21, %v393_v21  ;;  %v394_v27 = vadd.f32 %v707_v17, %v383_v25 }
  0xfb   : > { %416 = vst.msk [vmem:[%s1053_s10 + $0x8] sm:$0xf] %vm413_vm1, %v731_v23  ;;  %v732_v28 = vpack.c.bf16 %v396_v24, %v396_v24 }
  0xfc   : > { %414 = vst.msk [vmem:[%s1053_s10] sm:$0xf] %vm413_vm1, %v729_v26  ;;  %v730_v29 = vpack.c.bf16 %v394_v27, %v394_v27 }
  0xfd   : > { %417 = vst.msk [vmem:[%s1053_s10 + $0xc] sm:$0xf] %vm413_vm1, %v732_v28 }
  0xfe   : > { %415 = vst.msk [vmem:[%s1053_s10 + $0x4] sm:$0xf] %vm413_vm1, %v730_v29 }
  0xff   : > { %s1135_s11 = smov (!%p427_p9, %s426_s11), 4 }
 0x100   : > { %s714_s23 = sshll.u32 %s1135_s11, 6 }
 0x101   : > { %p717_p10 = scmp.eq.s32.totalorder %s714_s23, 0 }
 0x102   : > { %s1072_s24 = sshrl.u32 (!%p717_p10), %s1135_s11, 2 }
 0x103   : > { %436 = sbr.rel (%p717_p10) target bundleno = 308 (0x134), region = 48  ;;  %p718_p11 = scmp.le.s32.totalorder (!%p717_p10), %s1072_s24, 0 }
 0x10a   : > { %618 = sbr.rel (%p718_p11) target bundleno = 287 (0x11f), region = 126  ;;  %s1125_s14 = smov (!%p718_p11), %s1066_s21 }
 0x10b   : > { %s1126_s20 = smov (!%p718_p11), %s1053_s10  ;;  %s1081_s25 = smov (!%p718_p11), 0  }
 0x10c   : > { %s941_s26 = smov (!%p718_p11), 0  }
 0x111 LB: >> { %v452_v30 = vld [vmem:[%s935_s20] sm:$0xf]  ;;  %v454_v31 = vld [vmem:[%s935_s20 + $0x4] sm:$0xf]  ;;  %v456_v32 = vld [vmem:[%s935_s20 + $0x8] sm:$0xf]  ;;  %s943_s26 = sphi %s941_s26, %s446_s26   ;;  %s939_s25 = sphi %s1081_s25, %s1127_s25   ;;  %s935_s20 = sphi %s1126_s20, %s465_s20   ;;  %s931_s14 = sphi %s1125_s14, %s466_s14  }
 0x112   : >> { %453 = vst [vmem:[%s931_s14] sm:$0xf] %v452_v30  ;;  %455 = vst [vmem:[%s931_s14 + $0x4] sm:$0xf] %v454_v31  ;;  %v458_v33 = vld [vmem:[%s935_s20 + $0xc] sm:$0xf]  ;;  %s460_s27 = sadd.s32 1, %s939_s25 }
 0x113   : >> { %457 = vst [vmem:[%s931_s14 + $0x8] sm:$0xf] %v456_v32  ;;  %459 = vst [vmem:[%s931_s14 + $0xc] sm:$0xf] %v458_v33  ;;  %p461_p12 = scmp.ge.s32.totalorder %s460_s27, %s1072_s24  ;;  %s446_s26 = sadd.s32 1, %s943_s26  }
 0x114   : >> { %p445_p13 = scmp.ge.s32.totalorder %s446_s26, %s1072_s24 }
 0x115   : >> { %s1137_s27 = smov (%p461_p12, %s460_s27), 0 }
 0x116   : >> { %s719_s28 = sshll.u32 %s1137_s27, 4  ;;  %s1127_s25 = smov %s1137_s27 }
 0x117   : >> { %s465_s20 = scalar_lea.vmem %s1053_s10, %s719_s28 [#allocation3]   ;;  %s466_s14 = scalar_lea.vmem %s1066_s21, %s719_s28  }
 0x118   : > { %448 = sbr.rel (!%p445_p13) target bundleno = 273 (0x111), region = 132 }
 0x11f PF: > { %s1097_s29 = sand.u32 3, %s1135_s11   ;;  %s734_s30 = sshll.u32 %s1072_s24, 4 }
 0x120   : > { %s471_s4 = scalar_lea.vmem %s1053_s10, %s734_s30 [#allocation3]   ;;  %s473_s5 = scalar_lea.vmem %s1066_s21, %s734_s30  }
 0x121   : > { %p724_p0 = scmp.le.s32.totalorder %s1097_s29, 0 }
 0x122   : > { %s945_s6 = smov (!%p724_p0), %s473_s5   ;;  %s949_s7 = smov (!%p724_p0), %s471_s4  }
 0x123   : > { %632 = sbr.rel (%p724_p0) target bundleno = 308 (0x134), region = 137  ;;  %s953_s8 = smov (!%p724_p0), 0  }
 0x124   : > { %s957_s9 = smov (!%p724_p0), 0  }
 0x12a LB: >> { %v483_v34 = vld [vmem:[%s951_s7] sm:$0xf]  ;;  %s485_s11 = sadd.s32 1, %s955_s8  ;;  %s477_s9 = sadd.s32 1, %s959_s9   ;;  %s959_s9 = sphi %s957_s9, %s477_s9   ;;  %s955_s8 = sphi %s953_s8, %s954_s8   ;;  %s951_s7 = sphi %s949_s7, %s490_s7   ;;  %s947_s6 = sphi %s945_s6, %s491_s6  }
 0x12b   : >> { %484 = vst [vmem:[%s947_s6] sm:$0xf] %v483_v34  ;;  %p486_p1 = scmp.ge.s32.totalorder %s485_s11, %s1097_s29  ;;  %p476_p2 = scmp.ge.s32.totalorder %s477_s9, %s1097_s29 }
 0x12d   : >> { %s1139_s11 = smov (%p486_p1, %s485_s11), 0  ;;  %479 = sbr.rel (!%p476_p2) target bundleno = 298 (0x12a), region = 143 }
 0x12e   : >> { %s725_s10 = sshll.u32 %s1139_s11, 2  ;;  %s954_s8 = smov %s1139_s11  }
 0x12f   : >> { %s490_s7 = scalar_lea.vmem %s471_s4, %s725_s10 [#allocation3]   ;;  %s491_s6 = scalar_lea.vmem %s473_s5, %s725_s10  }
 0x134 PF: > { %s13_s16 = sadd.s32 1, %s927_s16   ;;  %s1128_s12 = smov %s915_s13 }
 0x135   : > { %p10_p3 = scmp.ge.s32.totalorder %s13_s16, 4   ;;  %s1129_s13 = smov %s1023_s22 }
 0x136   : > { %s1130_s14 = smov %s923_s15  ;;  %s1131_s15 = smov %s1133_s18 }
 0x137   :  { %12 = sbr.rel (!%p10_p3) target bundleno = 3 (0x3), region = 154 }

// kernel: timesformer_forward.20
= control target key start
LH: loop header
LB: loop body
LE: loop exit
PB: predicated region body
PF: predicated region fallthrough
CT: control target
= control target key end

     0   :  { %s2006_s0 = inlined_call_operand.vmem [shape: bf16[40,32], index: 0, kind: input, shape index: {}]   ;;  %s2007_s1 = inlined_call_operand.vmem [shape: f32[1,32], index: 1, kind: input, shape index: {}]   ;;  %s2008_s2 = inlined_call_operand.vmem [shape: f32[1,32], index: 2, kind: input, shape index: {}]   ;;  %s2009_s3 = inlined_call_operand.vmem [shape: bf16[32,96], index: 3, kind: input, shape index: {}]   ;;  %s2010_s4 = inlined_call_operand.vmem [shape: f32[1,96], index: 4, kind: input, shape index: {}]   ;;  %s2011_s5 = inlined_call_operand.vmem [shape: bf16[40,32], index: 5, kind: output, shape index: {0}]   ;;  %s2012_s6 = inlined_call_operand.vmem [shape: bf16[40,32], index: 6, kind: output, shape index: {1}]   ;;  %s2013_s7 = inlined_call_operand.vmem [shape: bf16[40,32], index: 7, kind: output, shape index: {2}]  }
   0x1   :  { %2014 = sst [smem:[#allocation5_spill]] %s2006_s0 }
   0x2   :  { %s1760_s24 = smov 0   ;;  %s1762_s25 = smov 0  }
   0x3   :  { %s1764_s26 = smov 0  }
   0x4 LB: > { %s1773_s27 = sadd.s32 4294967295, %s1620_s26   ;;  %s1775_s28 = sadd.s32 1, %s1620_s26   ;;  %s1620_s26 = sphi %s1764_s26, %s2028_s26   ;;  %s1616_s25 = sphi %s1762_s25, %s2027_s25   ;;  %s1612_s24 = sphi %s1760_s24, %s2026_s24  }
   0x5   : > { %s132_s29 = ssub.s32 %s1620_s26, %s1775_s28  ;;  %s135_s30 = sadd.s32 1, %s1616_s25 }
   0x6   : > { %p133_p0 = scmp.eq.s32.totalorder %s132_s29, 0  ;;  %p145_p1 = scmp.ne.s32.totalorder %s1616_s25, %s1612_s24 }
   0x7   : > { %p146_p2 = scmp.eq.s32.totalorder %s1773_s27, 1  ;;  %p1176_p3 = scmp.ge.s32.totalorder %s1620_s26, 1 }
   0x8   : > { %s1783_s8 = scalar_select %p133_p0, %s1616_s25, %s135_s30  }
   0x9   : > { %p1785_p4 = por %p146_p2, %p145_p1  ;;  %p251_p5 = scmp.lt.s32.totalorder %s1620_s26, 3 }
   0xb   : > { %p252_p6 = pnand %p1176_p3, %p251_p5 }
   0xc   : > { %s1790_s10 = sshll.u32 (!%p252_p6), %s1773_s27, 2  ;;  %s2016_s0 = sld [smem:[#allocation5_spill]] (!%p252_p6)  ;;  %vm334_vm0 = vcmask (!%p252_p6), 261120   ;;  %v1492_v30 = vld [vmem:[%s2009_s3] sm:$0xff] (!%p252_p6)   ;;  %v1493_v31 = vld [vmem:[%s2009_s3 + $0x8] sm:$0xff] (!%p252_p6)   ;;  %vm504_vm1 = vcmask (!%p252_p6), 257024  }
   0xd   : > { %255 = sbr.rel (%p252_p6) target bundleno = 871 (0x367), region = 40  ;;  %p299_p7 = scmp.lt.s32.totalorder (!%p252_p6), %s1790_s10, 4  ;;  %1266 = vmatprep.subr.bf16.mxu0 (!%p252_p6), %v1492_v30  ;;  %v1182_v46 = vld [vmem:[%s2007_s1] ss:$0 sm:$0xff] (!%p252_p6) }
   0xe   : > { %1267 = vmatpush3.bf16.msra.mxu0 (!%p252_p6), %v1492_v30  ;;  %v1183_v52 = vld [vmem:[%s2008_s2] ss:$0 sm:$0xff] (!%p252_p6)  ;;  %s279_s26 = sand.u32 (!%p252_p6), 1, %s1612_s24   ;;  %s1718_s24 = smov (!%p252_p6), 96  }
   0xf   : > { %1268 = vmatprep.subr.bf16.mxu0 (!%p252_p6), %v1493_v31  ;;  %s1719_s13 = smov (!%p252_p6), 64  }
  0x12   : > { %1269 = vmatpush3.bf16.msra.mxu0 (!%p252_p6), %v1493_v31 }
  0x14   : > { %s300_s11 = scalar_select %p299_p7, %s1790_s10, 4 }
  0x15   : > { %s557_s16 = ssub.s32 (%p1785_p4), 5, %s1790_s10  ;;  %s1244_s17 = sshll.u32 (%p1785_p4), %s1773_s27, 4 }
  0x16   : > { %s1181_s12 = sshll.u32 %s300_s11, 2  ;;  %s1823_s11 = sshll.u32 %s279_s26, 4 }
  0x17   : > { %s302_s15 = scalar_lea.vmem %s2016_s0, %s1181_s12  ;;  %s1826_s12 = scalar_lea.vmem [#allocation2], %s1823_s11  }
  0x18   : > { %v1254_v0 = vld [vmem:[%s302_s15] sm:$0xff]   ;;  %v1261_v1 = vld [vmem:[%s302_s15 + $0x8] sm:$0xff]   ;;  %s1837_s14 = scalar_lea.vmem [#allocation3], %s1823_s11   ;;  %s1846_s15 = scalar_lea.vmem [#allocation4], %s1823_s11  }
  0x19   : > { %v1255_v2 = vunpack.c.l.bf16 %v1254_v0  ;;  %v1259_v3 = vunpack.c.l.bf16 %v1261_v1  ;;  %v1256_v4 = vunpack.c.h.bf16 %v1254_v0  ;;  %v1260_v5 = vunpack.c.h.bf16 %v1261_v1  ;;  %v1184_v0 = vld [vmem:[%s2010_s4] ss:$0 sm:$0xff]  ;;  %p558_p8 = scmp.lt.s32.totalorder (%p1785_p4), %s557_s16, 4  ;;  %s1865_s20 = scalar_lea.vmem (%p1785_p4), %s2011_s5, %s1244_s17  }
  0x1b   : > { %v335_v6 = vsel %vm334_vm0, %v1255_v2, 0.0  ;;  %v341_v7 = vsel %vm334_vm0, %v1259_v3, 0.0  ;;  %v338_v8 = vsel %vm334_vm0, %v1256_v4, 0.0  ;;  %v344_v9 = vsel %vm334_vm0, %v1260_v5, 0.0 }
  0x1c   : > { %336 = vadd.xlane.f32.xlu0 %v335_v6  ;;  %342 = vadd.xlane.f32.xlu1 %v341_v7 }
  0x20   : > { %339 = vadd.xlane.f32.xlu0 %v338_v8  ;;  %345 = vadd.xlane.f32.xlu1 %v344_v9 }
  0xa9   : > { %v337_v10 = vpop.xlane.xlu0 %336  ;;  %v343_v11 = vpop.xlane.xlu1 %342 }
  0xaa   : > { %v348_v12 = vmul.f32 0.03125, %v337_v10  ;;  %v350_v13 = vmul.f32 0.03125, %v343_v11 }
  0xac   : > { %v352_v14 = vsub.f32 %v1255_v2, %v348_v12  ;;  %v354_v15 = vsub.f32 %v1259_v3, %v350_v13 }
  0xad   : > { %v340_v16 = vpop.xlane.xlu0 %339  ;;  %v346_v17 = vpop.xlane.xlu1 %345 }
  0xae   : > { %v349_v18 = vmul.f32 0.03125, %v340_v16  ;;  %v351_v19 = vmul.f32 0.03125, %v346_v17  ;;  %v356_v20 = vmul.f32 %v352_v14, %v352_v14  ;;  %v358_v21 = vmul.f32 %v354_v15, %v354_v15 }
  0xb0   : > { %v353_v22 = vsub.f32 %v1256_v4, %v349_v18  ;;  %v355_v23 = vsub.f32 %v1260_v5, %v351_v19  ;;  %v360_v24 = vsel %vm334_vm0, %v356_v20, 0.0  ;;  %v366_v25 = vsel %vm334_vm0, %v358_v21, 0.0 }
  0xb1   : > { %361 = vadd.xlane.f32.xlu0 %v360_v24 }
  0xb2   : > { %v357_v26 = vmul.f32 %v353_v22, %v353_v22  ;;  %v359_v27 = vmul.f32 %v355_v23, %v355_v23 }
  0xb4   : > { %v363_v28 = vsel %vm334_vm0, %v357_v26, 0.0  ;;  %v369_v29 = vsel %vm334_vm0, %v359_v27, 0.0 }
  0xb5   : > { %367 = vadd.xlane.f32.xlu0 %v366_v25  ;;  %364 = vadd.xlane.f32.xlu1 %v363_v28 }
  0xb9   : > { %370 = vadd.xlane.f32.xlu1 %v369_v29 }
 0x13e   : > { %v362_v32 = vpop.xlane.xlu0 %361 }
 0x13f   : > { %v372_v33 = vmul.f32 0.03125, %v362_v32 }
 0x141   : > { %v376_v34 = vadd.f32 1e-05, %v372_v33 }
 0x142   : > { %v365_v35 = vpop.xlane.xlu1 %364  ;;  %v368_v36 = vpop.xlane.xlu0 %367 }
 0x143   : > { %1494 = vrsqrt.f32 %v376_v34  ;;  %v373_v37 = vmul.f32 0.03125, %v365_v35  ;;  %v374_v38 = vmul.f32 0.03125, %v368_v36 }
 0x145   : > { %v377_v39 = vadd.f32 1e-05, %v373_v37  ;;  %v378_v40 = vadd.f32 1e-05, %v374_v38 }
 0x146   : > { %v371_v41 = vpop.xlane.xlu1 %370 }
 0x147   : > { %1496 = vrsqrt.f32 %v377_v39  ;;  %v375_v42 = vmul.f32 0.03125, %v371_v41 }
 0x148   : > { %1498 = vrsqrt.f32 %v378_v40 }
 0x149   : > { %v379_v43 = vadd.f32 1e-05, %v375_v42 }
 0x14b   : > { %1500 = vrsqrt.f32 %v379_v43 }
 0x14d   : > { %v1495_v44 = vpop.eup %1494 }
 0x14e   : > { %v384_v45 = vmul.f32 %v1495_v44, %v352_v14 }
 0x150   : > { %v394_v50 = vmul.f32 %v1182_v46, %v384_v45 }
 0x151   : > { %v1497_v47 = vpop.eup %1496 }
 0x152   : > { %v1499_v48 = vpop.eup %1498  ;;  %v385_v49 = vmul.f32 %v1497_v47, %v353_v22  ;;  %v404_v56 = vadd.f32 %v1183_v52, %v394_v50 }
 0x153   : > { %v386_v51 = vmul.f32 %v1499_v48, %v354_v15 }
 0x154   : > { %v395_v53 = vmul.f32 %v1182_v46, %v385_v49 }
 0x155   : > { %v1501_v54 = vpop.eup %1500  ;;  %v396_v58 = vmul.f32 %v1182_v46, %v386_v51 }
 0x156   : > { %v387_v55 = vmul.f32 %v1501_v54, %v355_v23  ;;  %v405_v57 = vadd.f32 %v1183_v52, %v395_v53 }
 0x157   : > { %v406_v61 = vadd.f32 %v1183_v52, %v396_v58 }
 0x158   : > { %v408_v59 = vpack.c.bf16 %v405_v57, %v404_v56  ;;  %v397_v60 = vmul.f32 %v1182_v46, %v387_v55 }
 0x15a   : > { %1270 = vmatprep.mubr.msk.bf16.mxu0 %vm334_vm0, %v408_v59  ;;  %v407_v62 = vadd.f32 %v1183_v52, %v397_v60 }
 0x15c   : > { %v409_v63 = vpack.c.bf16 %v407_v62, %v406_v61 }
 0x15e   : > { %1271 = vmatmul.mubr.msk.bf16.vlgmr.msra.gmra.mrb[0].mxu0 %vm334_vm0, %v409_v63 }
 0x231   : > { %v1272_v1 = vpop.f32.mrb[0].mxu0 }
 0x232   : > { %v482_v2 = vadd.f32 %v1272_v1, %v1184_v0  ;;  %v473_v3 = vpop.f32.mrb[1].mxu0 }
 0x233   : > { %v474_v4 = vadd.f32 %v1184_v0, %v473_v3  ;;  %v1273_v5 = vpop.f32.mrb[2].mxu0 }
 0x234   : > { %v1242_v6 = vpack.c.bf16 %v482_v2, %v482_v2  ;;  %v485_v7 = vadd.f32 %v1273_v5, %v1184_v0  ;;  %v476_v8 = vpop.f32.mrb[3].mxu0 }
 0x235   : > { %v1240_v9 = vpack.c.bf16 %v474_v4, %v474_v4  ;;  %v477_v10 = vadd.f32 %v1184_v0, %v476_v8 }
 0x236   : > { %507 = vst.msk [vmem:[%s1826_s12 + $0x8] sm:$0xf] %vm504_vm1, %v1242_v6  ;;  %v1243_v11 = vpack.c.bf16 %v485_v7, %v485_v7  ;;  %513 = vrot.lane.b32.xlu1 %v1242_v6, %s1718_s24 }
 0x237   : > { %505 = vst.msk [vmem:[%s1826_s12] sm:$0xf] %vm504_vm1, %v1240_v9  ;;  %v1241_v12 = vpack.c.bf16 %v477_v10, %v477_v10  ;;  %509 = vrot.lane.b32.xlu0 %v1240_v9, %s1718_s24 }
 0x238   : > { %508 = vst.msk [vmem:[%s1826_s12 + $0xc] sm:$0xf] %vm504_vm1, %v1243_v11 }
 0x239   : > { %506 = vst.msk [vmem:[%s1826_s12 + $0x4] sm:$0xf] %vm504_vm1, %v1241_v12 }
 0x23a   : > { %515 = vrot.lane.b32.xlu1 %v1243_v11, %s1718_s24 }
 0x23b   : > { %525 = vrot.lane.b32.xlu0 %v1240_v9, %s1719_s13 }
 0x23e   : > { %511 = vrot.lane.b32.xlu1 %v1241_v12, %s1718_s24 }
 0x23f   : > { %529 = vrot.lane.b32.xlu0 %v1242_v6, %s1719_s13 }
 0x242   : > { %527 = vrot.lane.b32.xlu1 %v1241_v12, %s1719_s13 }
 0x246   : > { %531 = vrot.lane.b32.xlu1 %v1243_v11, %s1719_s13 }
 0x2a8   : > { %v514_v13 = vpop.permute.xlu1 %513 }
 0x2a9   : > { %523 = vst.msk [vmem:[%s1837_s14 + $0x8] sm:$0xf] %vm504_vm1, %v514_v13  ;;  %v510_v14 = vpop.permute.xlu0 %509 }
 0x2aa   : > { %521 = vst.msk [vmem:[%s1837_s14] sm:$0xf] %vm504_vm1, %v510_v14 }
 0x2ac   : > { %v516_v15 = vpop.permute.xlu1 %515 }
 0x2ad   : > { %524 = vst.msk [vmem:[%s1837_s14 + $0xc] sm:$0xf] %vm504_vm1, %v516_v15  ;;  %v526_v16 = vpop.permute.xlu0 %525 }
 0x2ae   : > { %537 = vst.msk [vmem:[%s1846_s15] sm:$0xf] %vm504_vm1, %v526_v16 }
 0x2b0   : > { %v512_v17 = vpop.permute.xlu1 %511 }
 0x2b1   : > { %522 = vst.msk [vmem:[%s1837_s14 + $0x4] sm:$0xf] %vm504_vm1, %v512_v17  ;;  %v530_v18 = vpop.permute.xlu0 %529 }
 0x2b2   : > { %539 = vst.msk [vmem:[%s1846_s15 + $0x8] sm:$0xf] %vm504_vm1, %v530_v18 }
 0x2b3   : > { %555 = sbr.rel (!%p1785_p4) target bundleno = 751 (0x2ef), region = 44 }
 0x2b4   : > { %v528_v19 = vpop.permute.xlu1 %527 }
 0x2b5   : > { %538 = vst.msk [vmem:[%s1846_s15 + $0x4] sm:$0xf] %vm504_vm1, %v528_v19 }
 0x2b8   : > { %v532_v20 = vpop.permute.xlu1 %531 }
 0x2b9   : > { %540 = vst.msk [vmem:[%s1846_s15 + $0xc] sm:$0xf] %vm504_vm1, %v532_v20 }
 0x2ba   : > { %s2030_s16 = smov (!%p558_p8, %s557_s16), 4 }
 0x2bb   : > { %s1197_s21 = sshll.u32 %s2030_s16, 6 }
 0x2bc   : > { %p1200_p9 = scmp.eq.s32.totalorder %s1197_s21, 0 }
 0x2bd   : > { %s1871_s22 = sshrl.u32 (!%p1200_p9), %s2030_s16, 2 }
 0x2be   : > { %566 = sbr.rel (%p1200_p9) target bundleno = 751 (0x2ef), region = 48  ;;  %p1201_p10 = scmp.le.s32.totalorder (!%p1200_p9), %s1871_s22, 0 }
 0x2c5   : > { %1055 = sbr.rel (%p1201_p10) target bundleno = 730 (0x2da), region = 256  ;;  %s2017_s23 = smov (!%p1201_p10), %s1865_s20 }
 0x2c6   : > { %s2018_s26 = smov (!%p1201_p10), %s1826_s12  ;;  %s1880_s29 = smov (!%p1201_p10), 0  }
 0x2c7   : > { %s1634_s30 = smov (!%p1201_p10), 0  }
 0x2cc LB: >> { %v582_v21 = vld [vmem:[%s1628_s26] sm:$0xf]  ;;  %v584_v22 = vld [vmem:[%s1628_s26 + $0x4] sm:$0xf]  ;;  %v586_v23 = vld [vmem:[%s1628_s26 + $0x8] sm:$0xf]  ;;  %s1636_s30 = sphi %s1634_s30, %s576_s30   ;;  %s1632_s29 = sphi %s1880_s29, %s2019_s29   ;;  %s1628_s26 = sphi %s2018_s26, %s595_s26   ;;  %s1624_s23 = sphi %s2017_s23, %s596_s23  }
 0x2cd   : >> { %583 = vst [vmem:[%s1624_s23] sm:$0xf] %v582_v21  ;;  %585 = vst [vmem:[%s1624_s23 + $0x4] sm:$0xf] %v584_v22  ;;  %v588_v24 = vld [vmem:[%s1628_s26 + $0xc] sm:$0xf]  ;;  %s590_s11 = sadd.s32 1, %s1632_s29 }
 0x2ce   : >> { %587 = vst [vmem:[%s1624_s23 + $0x8] sm:$0xf] %v586_v23  ;;  %589 = vst [vmem:[%s1624_s23 + $0xc] sm:$0xf] %v588_v24  ;;  %p591_p11 = scmp.ge.s32.totalorder %s590_s11, %s1871_s22  ;;  %s576_s30 = sadd.s32 1, %s1636_s30  }
 0x2cf   : >> { %p575_p12 = scmp.ge.s32.totalorder %s576_s30, %s1871_s22 }
 0x2d0   : >> { %s2032_s11 = smov (%p591_p11, %s590_s11), 0 }
 0x2d1   : >> { %s1202_s24 = sshll.u32 %s2032_s11, 4  ;;  %s2019_s29 = smov %s2032_s11 }
 0x2d2   : >> { %s595_s26 = scalar_lea.vmem %s1826_s12, %s1202_s24 [#allocation2]   ;;  %s596_s23 = scalar_lea.vmem %s1865_s20, %s1202_s24  }
 0x2d3   : > { %578 = sbr.rel (!%p575_p12) target bundleno = 716 (0x2cc), region = 262 }
 0x2da PF: > { %s1896_s13 = sand.u32 3, %s2030_s16   ;;  %s1245_s17 = sshll.u32 %s1871_s22, 4 }
 0x2db   : > { %s601_s18 = scalar_lea.vmem %s1826_s12, %s1245_s17 [#allocation2]   ;;  %s603_s19 = scalar_lea.vmem %s1865_s20, %s1245_s17  }
 0x2dc   : > { %p1207_p13 = scmp.le.s32.totalorder %s1896_s13, 0 }
 0x2dd   : > { %s1638_s21 = smov (!%p1207_p13), %s603_s19   ;;  %s1642_s29 = smov (!%p1207_p13), %s601_s18  }
 0x2de   : > { %1069 = sbr.rel (%p1207_p13) target bundleno = 751 (0x2ef), region = 267  ;;  %s1646_s24 = smov (!%p1207_p13), 0  }
 0x2df   : > { %s1650_s0 = smov (!%p1207_p13), 0  }
 0x2e5 LB: >> { %v613_v25 = vld [vmem:[%s1644_s29] sm:$0xf]  ;;  %s615_s16 = sadd.s32 1, %s1648_s24  ;;  %s607_s0 = sadd.s32 1, %s1652_s0   ;;  %s1652_s0 = sphi %s1650_s0, %s607_s0   ;;  %s1648_s24 = sphi %s1646_s24, %s1647_s24   ;;  %s1644_s29 = sphi %s1642_s29, %s620_s29   ;;  %s1640_s21 = sphi %s1638_s21, %s621_s21  }
 0x2e6   : >> { %614 = vst [vmem:[%s1640_s21] sm:$0xf] %v613_v25  ;;  %p616_p0 = scmp.ge.s32.totalorder %s615_s16, %s1896_s13  ;;  %p606_p1 = scmp.ge.s32.totalorder %s607_s0, %s1896_s13 }
 0x2e8   : >> { %s2034_s16 = smov (%p616_p0, %s615_s16), 0  ;;  %609 = sbr.rel (!%p606_p1) target bundleno = 741 (0x2e5), region = 273 }
 0x2e9   : >> { %s1208_s12 = sshll.u32 %s2034_s16, 2  ;;  %s1647_s24 = smov %s2034_s16  }
 0x2ea   : >> { %s620_s29 = scalar_lea.vmem %s601_s18, %s1208_s12 [#allocation2]   ;;  %s621_s21 = scalar_lea.vmem %s603_s19, %s1208_s12  }
 0x2ef PF: > { %678 = sbr.rel (!%p1785_p4) target bundleno = 811 (0x32b), region = 92  ;;  %s680_s20 = ssub.s32 (%p1785_p4), 5, %s1790_s10 }
 0x2f0   : > { %s1247_s22 = sshll.u32 (%p1785_p4), %s1773_s27, 4  ;;  %p681_p2 = scmp.lt.s32.totalorder (%p1785_p4), %s680_s20, 4 }
 0x2f1   : > { %s1911_s30 = scalar_lea.vmem (%p1785_p4), %s2012_s6, %s1247_s22  }
 0x2f6   : > { %s2036_s20 = smov (!%p681_p2, %s680_s20), 4 }
 0x2f7   : > { %s1211_s0 = sshll.u32 %s2036_s20, 6 }
 0x2f8   : > { %p1214_p3 = scmp.eq.s32.totalorder %s1211_s0, 0 }
 0x2f9   : > { %s1917_s11 = sshrl.u32 (!%p1214_p3), %s2036_s20, 2 }
 0x2fa   : > { %689 = sbr.rel (%p1214_p3) target bundleno = 811 (0x32b), region = 96  ;;  %p1215_p5 = scmp.le.s32.totalorder (!%p1214_p3), %s1917_s11, 0 }
 0x301   : > { %1083 = sbr.rel (%p1215_p5) target bundleno = 790 (0x316), region = 278  ;;  %s2020_s13 = smov (!%p1215_p5), %s1911_s30 }
 0x302   : > { %s2021_s17 = smov (!%p1215_p5), %s1837_s14  ;;  %s1926_s18 = smov (!%p1215_p5), 0  }
 0x303   : > { %s1666_s19 = smov (!%p1215_p5), 0  }
 0x308 LB: >> { %v705_v26 = vld [vmem:[%s1660_s17] sm:$0xf]  ;;  %v707_v27 = vld [vmem:[%s1660_s17 + $0x4] sm:$0xf]  ;;  %v709_v28 = vld [vmem:[%s1660_s17 + $0x8] sm:$0xf]  ;;  %s1668_s19 = sphi %s1666_s19, %s699_s19   ;;  %s1664_s18 = sphi %s1926_s18, %s2022_s18   ;;  %s1660_s17 = sphi %s2021_s17, %s718_s17   ;;  %s1656_s13 = sphi %s2020_s13, %s719_s13  }
 0x309   : >> { %706 = vst [vmem:[%s1656_s13] sm:$0xf] %v705_v26  ;;  %708 = vst [vmem:[%s1656_s13 + $0x4] sm:$0xf] %v707_v27  ;;  %v711_v29 = vld [vmem:[%s1660_s17 + $0xc] sm:$0xf]  ;;  %s713_s21 = sadd.s32 1, %s1664_s18 }
 0x30a   : >> { %710 = vst [vmem:[%s1656_s13 + $0x8] sm:$0xf] %v709_v28  ;;  %712 = vst [vmem:[%s1656_s13 + $0xc] sm:$0xf] %v711_v29  ;;  %p714_p6 = scmp.ge.s32.totalorder %s713_s21, %s1917_s11  ;;  %s699_s19 = sadd.s32 1, %s1668_s19  }
 0x30b   : >> { %p698_p7 = scmp.ge.s32.totalorder %s699_s19, %s1917_s11 }
 0x30c   : >> { %s2038_s21 = smov (%p714_p6, %s713_s21), 0 }
 0x30d   : >> { %s1216_s29 = sshll.u32 %s2038_s21, 4  ;;  %s2022_s18 = smov %s2038_s21 }
 0x30e   : >> { %s718_s17 = scalar_lea.vmem %s1837_s14, %s1216_s29 [#allocation3]   ;;  %s719_s13 = scalar_lea.vmem %s1911_s30, %s1216_s29  }
 0x30f   : > { %701 = sbr.rel (!%p698_p7) target bundleno = 776 (0x308), region = 284 }
 0x316 PF: > { %s1942_s24 = sand.u32 3, %s2036_s20   ;;  %s1248_s16 = sshll.u32 %s1917_s11, 4 }
 0x317   : > { %s724_s12 = scalar_lea.vmem %s1837_s14, %s1248_s16 [#allocation3]   ;;  %s726_s22 = scalar_lea.vmem %s1911_s30, %s1248_s16  }
 0x318   : > { %p1221_p8 = scmp.le.s32.totalorder %s1942_s24, 0 }
 0x319   : > { %s1670_s23 = smov (!%p1221_p8), %s726_s22   ;;  %s1674_s26 = smov (!%p1221_p8), %s724_s12  }
 0x31a   : > { %1097 = sbr.rel (%p1221_p8) target bundleno = 811 (0x32b), region = 289  ;;  %s1678_s0 = smov (!%p1221_p8), 0  }
 0x31b   : > { %s1682_s18 = smov (!%p1221_p8), 0  }
 0x321 LB: >> { %v736_v30 = vld [vmem:[%s1676_s26] sm:$0xf]  ;;  %s738_s20 = sadd.s32 1, %s1680_s0  ;;  %s730_s18 = sadd.s32 1, %s1684_s18   ;;  %s1684_s18 = sphi %s1682_s18, %s730_s18   ;;  %s1680_s0 = sphi %s1678_s0, %s1679_s0   ;;  %s1676_s26 = sphi %s1674_s26, %s743_s26   ;;  %s1672_s23 = sphi %s1670_s23, %s744_s23  }
 0x322   : >> { %737 = vst [vmem:[%s1672_s23] sm:$0xf] %v736_v30  ;;  %p739_p9 = scmp.ge.s32.totalorder %s738_s20, %s1942_s24  ;;  %p729_p10 = scmp.ge.s32.totalorder %s730_s18, %s1942_s24 }
 0x324   : >> { %s2040_s20 = smov (%p739_p9, %s738_s20), 0  ;;  %732 = sbr.rel (!%p729_p10) target bundleno = 801 (0x321), region = 295 }
 0x325   : >> { %s1222_s14 = sshll.u32 %s2040_s20, 2  ;;  %s1679_s0 = smov %s2040_s20  }
 0x326   : >> { %s743_s26 = scalar_lea.vmem %s724_s12, %s1222_s14 [#allocation3]   ;;  %s744_s23 = scalar_lea.vmem %s726_s22, %s1222_s14  }
 0x32b PF: > { %801 = sbr.rel (!%p1785_p4) target bundleno = 871 (0x367), region = 140  ;;  %s803_s30 = ssub.s32 (%p1785_p4), 5, %s1790_s10 }
 0x32c   : > { %s1250_s11 = sshll.u32 (%p1785_p4), %s1773_s27, 4  ;;  %p804_p11 = scmp.lt.s32.totalorder (%p1785_p4), %s803_s30, 4 }
 0x32d   : > { %s1957_s19 = scalar_lea.vmem (%p1785_p4), %s2013_s7, %s1250_s11  }
 0x332   : > { %s2042_s30 = smov (!%p804_p11, %s803_s30), 4 }
 0x333   : > { %s1225_s21 = sshll.u32 %s2042_s30, 6 }
 0x334   : > { %p1228_p12 = scmp.eq.s32.totalorder %s1225_s21, 0 }
 0x335   : > { %s1963_s29 = sshrl.u32 (!%p1228_p12), %s2042_s30, 2 }
 0x336   : > { %812 = sbr.rel (%p1228_p12) target bundleno = 871 (0x367), region = 144  ;;  %p1229_p4 = scmp.le.s32.totalorder (!%p1228_p12), %s1963_s29, 0 }
 0x33d   : > { %1111 = sbr.rel (%p1229_p4) target bundleno = 850 (0x352), region = 300  ;;  %s2023_s27 = smov (!%p1229_p4), %s1957_s19 }
 0x33e   : > { %s2024_s9 = smov (!%p1229_p4), %s1846_s15  ;;  %s1972_s10 = smov (!%p1229_p4), 0  }
 0x33f   : > { %s1698_s24 = smov (!%p1229_p4), 0  }
 0x344 LB: >> { %v828_v31 = vld [vmem:[%s1692_s9] sm:$0xf]  ;;  %v830_v32 = vld [vmem:[%s1692_s9 + $0x4] sm:$0xf]  ;;  %v832_v33 = vld [vmem:[%s1692_s9 + $0x8] sm:$0xf]  ;;  %s1700_s24 = sphi %s1698_s24, %s822_s24   ;;  %s1696_s10 = sphi %s1972_s10, %s2025_s10   ;;  %s1692_s9 = sphi %s2024_s9, %s841_s9   ;;  %s1688_s27 = sphi %s2023_s27, %s842_s27  }
 0x345   : >> { %829 = vst [vmem:[%s1688_s27] sm:$0xf] %v828_v31  ;;  %831 = vst [vmem:[%s1688_s27 + $0x4] sm:$0xf] %v830_v32  ;;  %v834_v34 = vld [vmem:[%s1692_s9 + $0xc] sm:$0xf]  ;;  %s836_s16 = sadd.s32 1, %s1696_s10 }
 0x346   : >> { %833 = vst [vmem:[%s1688_s27 + $0x8] sm:$0xf] %v832_v33  ;;  %835 = vst [vmem:[%s1688_s27 + $0xc] sm:$0xf] %v834_v34  ;;  %p837_p13 = scmp.ge.s32.totalorder %s836_s16, %s1963_s29  ;;  %s822_s24 = sadd.s32 1, %s1700_s24  }
 0x347   : >> { %p821_p0 = scmp.ge.s32.totalorder %s822_s24, %s1963_s29 }
 0x348   : >> { %s2044_s16 = smov (%p837_p13, %s836_s16), 0 }
 0x349   : >> { %s1230_s12 = sshll.u32 %s2044_s16, 4  ;;  %s2025_s10 = smov %s2044_s16 }
 0x34a   : >> { %s841_s9 = scalar_lea.vmem %s1846_s15, %s1230_s12 [#allocation4]   ;;  %s842_s27 = scalar_lea.vmem %s1957_s19, %s1230_s12  }
 0x34b   : > { %824 = sbr.rel (!%p821_p0) target bundleno = 836 (0x344), region = 306 }
 0x352 PF: > { %s1988_s22 = sand.u32 3, %s2042_s30   ;;  %s1251_s23 = sshll.u32 %s1963_s29, 4 }
 0x353   : > { %s847_s26 = scalar_lea.vmem %s1846_s15, %s1251_s23 [#allocation4]   ;;  %s849_s0 = scalar_lea.vmem %s1957_s19, %s1251_s23  }
 0x354   : > { %p1235_p1 = scmp.le.s32.totalorder %s1988_s22, 0 }
 0x355   : > { %s1702_s18 = smov (!%p1235_p1), %s849_s0   ;;  %s1706_s20 = smov (!%p1235_p1), %s847_s26  }
 0x356   : > { %1125 = sbr.rel (%p1235_p1) target bundleno = 871 (0x367), region = 311  ;;  %s1710_s14 = smov (!%p1235_p1), 0  }
 0x357   : > { %s1714_s11 = smov (!%p1235_p1), 0  }
 0x35d LB: >> { %v859_v35 = vld [vmem:[%s1708_s20] sm:$0xf]  ;;  %s861_s30 = sadd.s32 1, %s1712_s14  ;;  %s853_s11 = sadd.s32 1, %s1716_s11   ;;  %s1716_s11 = sphi %s1714_s11, %s853_s11   ;;  %s1712_s14 = sphi %s1710_s14, %s1711_s14   ;;  %s1708_s20 = sphi %s1706_s20, %s866_s20   ;;  %s1704_s18 = sphi %s1702_s18, %s867_s18  }
 0x35e   : >> { %860 = vst [vmem:[%s1704_s18] sm:$0xf] %v859_v35  ;;  %p862_p2 = scmp.ge.s32.totalorder %s861_s30, %s1988_s22  ;;  %p852_p3 = scmp.ge.s32.totalorder %s853_s11, %s1988_s22 }
 0x360   : >> { %s2046_s30 = smov (%p862_p2, %s861_s30), 0  ;;  %855 = sbr.rel (!%p852_p3) target bundleno = 861 (0x35d), region = 317 }
 0x361   : >> { %s1236_s15 = sshll.u32 %s2046_s30, 2  ;;  %s1711_s14 = smov %s2046_s30  }
 0x362   : >> { %s866_s20 = scalar_lea.vmem %s847_s26, %s1236_s15 [#allocation4]   ;;  %s867_s18 = scalar_lea.vmem %s849_s0, %s1236_s15  }
 0x367 PF: > { %p15_p5 = scmp.ge.s32.totalorder %s1775_s28, 4   ;;  %s2026_s24 = smov %s1616_s25 }
 0x368   : > { %s2027_s25 = smov %s1783_s8  ;;  %s2028_s26 = smov %s1775_s28 }
 0x369   :  { %17 = sbr.rel (!%p15_p5) target bundleno = 4 (0x4), region = 328 }

// kernel: timesformer_forward.21
= control target key start
LH: loop header
LB: loop body
LE: loop exit
PB: predicated region body
PF: predicated region fallthrough
CT: control target
= control target key end

     0   :  { %s2720_s12 = smov 0   ;;  %s3233_s0 = inlined_call_operand.vmem [shape: bf16[8,5,32], index: 0, kind: input, shape index: {}]   ;;  %s3234_s1 = inlined_call_operand.vmem [shape: bf16[8,5,32], index: 1, kind: input, shape index: {}]   ;;  %s3235_s2 = inlined_call_operand.vmem [shape: bf16[8,5,32], index: 2, kind: input, shape index: {}]   ;;  %s3236_s3 = inlined_call_operand.vmem [shape: bf16[8,5,32], index: 3, kind: output, shape index: {}]  }
   0x1 LB: > { %s2251_s13 = sadd.s32 4294967295, %s2689_s12   ;;  %p2255_p0 = scmp.ge.s32.totalorder %s2689_s12, 1  ;;  %s2689_s12 = sphi %s2720_s12, %s13_s12  }
   0x2   : > { %p160_p1 = scmp.lt.s32.totalorder %s2689_s12, 3 }
   0x4   : > { %p161_p2 = pnand %p2255_p0, %p160_p1 }
   0x5   : > { %s2256_s14 = sshll.u32 (!%p161_p2), %s2251_s13, 2  ;;  %v2691_v0 = vmov (!%p161_p2), 0.0   ;;  %vm2692_vm0 = vmmov (!%p161_p2), 0   ;;  %vm231_vm1 = vcmask (!%p161_p2), 64512   ;;  %vm420_vm2 = vcmask (!%p161_p2), 36864   ;;  %s2693_s22 = smov (!%p161_p2), 120  }
   0x6   : > { %164 = sbr.rel (%p161_p2) target bundleno = 2623 (0xa3f), region = 32  ;;  %2398 = vmatprep.subr.bf16.mxu0 (!%p161_p2), %v2691_v0  ;;  %2404 = vmatprep.subr.bf16.mxu1 (!%p161_p2), %v2691_v0  ;;  %p195_p3 = scmp.lt.s32.totalorder (!%p161_p2), %s2256_s14, 7  ;;  %vm473_vm3 = vcmask (!%p161_p2), 1041408   ;;  %vm474_vm4 = vcmask (!%p161_p2), 1042432   ;;  %v2694_v59 = vmov (!%p161_p2), 65535   ;;  %vm469_vm5 = vcmask (!%p161_p2), 39936  }
   0x7   : > { %2400 = vmatprep.mubr.msk.bf16.mxu0 (!%p161_p2), %vm2692_vm0, %v2691_v0  ;;  %2406 = vmatprep.mubr.msk.bf16.mxu1 (!%p161_p2), %vm2692_vm0, %v2691_v0  ;;  %v475_v60 = vsel (!%p161_p2), %vm473_vm3, 4294967295, %v2694_v59  ;;  %vm662_vm6 = vcmask (!%p161_p2), 59392   ;;  %vm663_vm7 = vsmask.f32 (!%p161_p2), 2304  ;;  %s2695_s29 = smov (!%p161_p2), 112   ;;  %s2696_s30 = smov (!%p161_p2), 104  }
   0x8   : > { %v2814_v63 = vsel (!%p161_p2), %vm474_vm4, %v475_v60, 0  ;;  %vm2909_vm8 = vmand (!%p161_p2), %vm662_vm6, %vm663_vm7  ;;  %s2697_s4 = smov (!%p161_p2), 8   ;;  %s2698_s5 = smov (!%p161_p2), 16   ;;  %vm1185_vm9 = vcmask (!%p161_p2), 124992   ;;  %vm1671_vm11 = vcmask (!%p161_p2), 190592   ;;  %vm2157_vm13 = vcmask (!%p161_p2), 256192  }
   0x9   : > { %vm3160_vm10 = vmand (!%p161_p2), %vm1185_vm9, %vm663_vm7  ;;  %s2699_s6 = smov (!%p161_p2), 24  }
   0xa   : > { %vm3189_vm12 = vmand (!%p161_p2), %vm1671_vm11, %vm663_vm7 }
   0xb   : > { %vm3210_vm14 = vmand (!%p161_p2), %vm2157_vm13, %vm663_vm7 }
   0xd   : > { %s3246_s14 = smov (!%p195_p3, %s2256_s14), 7 }
   0xe   : > { %s2734_s15 = sshll.u32 %s3246_s14, 2 }
   0xf   : > { %s204_s18 = scalar_lea.vmem %s3234_s1, %s2734_s15  ;;  %s198_s21 = scalar_lea.vmem %s3233_s0, %s2734_s15 }
  0x10   : > { %v2740_v1 = vld [vmem:[%s204_s18] sm:$0x7]  ;;  %v2742_v2 = vld [vmem:[%s204_s18 + $0x4] sm:$0x7]  ;;  %v225_v5 = vld [vmem:[%s204_s18 + $0x8] sm:$0x7]  ;;  %s2805_s25 = scalar_lea.vmem %s3235_s2, %s2734_s15  ;;  %s2906_s28 = scalar_lea.vmem %s3236_s3, %s2734_s15 }
  0x11   : > { %v236_v3 = vsel %vm231_vm1, %v2740_v1, 0  ;;  %v282_v4 = vsel %vm231_vm1, %v2742_v2, 0  ;;  %v2754_v6 = vld [vmem:[%s204_s18 + $0xc] sm:$0x7]  ;;  %v219_v7 = vld [vmem:[%s198_s21] sm:$0x7]  ;;  %v2790_v38 = vcombine.low %v225_v5, %v225_v5  ;;  %v2809_v61 = vcombine.low %v2740_v1, %v2740_v1 }
  0x12   : > { %2399 = vmatpush3.bf16.xpose.msra.mxu0 %v236_v3  ;;  %2405 = vmatpush3.bf16.xpose.msra.mxu1 %v282_v4  ;;  %v2756_v8 = vld [vmem:[%s198_s21 + $0x4] sm:$0x7]  ;;  %v328_v9 = vsel %vm231_vm1, %v225_v5, 0  ;;  %v374_v10 = vsel %vm231_vm1, %v2754_v6, 0  ;;  %v2770_v11 = vld [vmem:[%s198_s21 + $0x8] sm:$0x7]  ;;  %v2786_v37 = vcombine.low %v219_v7, %v219_v7  ;;  %v2820_v4 = vcombine.low %v2742_v2, %v2742_v2 }
  0x13   : > { %2410 = vmatprep.subr.bf16.mxu0 %v2691_v0  ;;  %2416 = vmatprep.subr.bf16.mxu1 %v2691_v0  ;;  %v2772_v12 = vld [vmem:[%s198_s21 + $0xc] sm:$0x7]  ;;  %v2812_v62 = vld [vmem:[%s2805_s25] sm:$0x7]  ;;  %v2826_v5 = vcombine.low %v2770_v11, %v2770_v11  ;;  %v2830_v1 = vld [vmem:[%s2805_s25 + $0x4] sm:$0x7]  ;;  %v2838_v2 = vcombine.low %v2756_v8, %v2756_v8 }
  0x14   : > { %v478_v3 = vand.u32 %v2814_v63, %v2812_v62  ;;  %v668_v59 = vld [vmem:[%s2906_s28 + $0x4] sm:$0x7] }
  0x19   : > { %2401 = vmatmul.mubr.msk.bf16.vlgmr.msra.gmra.mrb[0].mxu0 %vm231_vm1, %v219_v7  ;;  %2407 = vmatmul.mubr.msk.bf16.vlgmr.msra.gmra.mrb[0].mxu1 %vm231_vm1, %v2756_v8  ;;  %v524_v7 = vand.u32 %v2814_v63, %v2830_v1 }
  0x1a   : > { %2411 = vmatpush3.bf16.xpose.msra.mxu0 %v328_v9  ;;  %2417 = vmatpush3.bf16.xpose.msra.mxu1 %v374_v10  ;;  %v2844_v9 = vcombine.low %v2754_v6, %v2754_v6  ;;  %v2851_v10 = vcombine.low %v2772_v12, %v2772_v12 }
  0x1b   : > { %2412 = vmatprep.mubr.msk.bf16.mxu0 %vm2692_vm0, %v2691_v0  ;;  %2418 = vmatprep.mubr.msk.bf16.mxu1 %vm2692_vm0, %v2691_v0 }
  0x1c   : > { %2422 = vmatprep.subr.bf16.mxu0 %v2691_v0  ;;  %2428 = vmatprep.subr.bf16.mxu1 %v2691_v0 }
  0x21   : > { %2413 = vmatmul.mubr.msk.bf16.vlgmr.msra.gmra.mrb[4].mxu0 %vm231_vm1, %v2770_v11  ;;  %2419 = vmatmul.mubr.msk.bf16.vlgmr.msra.gmra.mrb[4].mxu1 %vm231_vm1, %v2772_v12 }
  0x22   : > { %2424 = vmatprep.mubr.msk.bf16.mxu0 %vm2692_vm0, %v2691_v0  ;;  %2430 = vmatprep.mubr.msk.bf16.mxu1 %vm2692_vm0, %v2691_v0 }
  0x23   : > { %2423 = vmatpush3.bf16.msra.mxu0 %v478_v3  ;;  %2429 = vmatpush3.bf16.msra.mxu1 %v524_v7 }
  0x24   : > { %2434 = vmatprep.subr.bf16.mxu0 %v2691_v0  ;;  %2440 = vmatprep.subr.bf16.mxu1 %v2691_v0 }
  0xec   : > { %v272_v13 = vpop.f32.mrb[0].mxu0  ;;  %v318_v14 = vpop.f32.mrb[0].mxu1 }
  0xed   : > { %v416_v15 = vmul.f32 0.35355338, %v272_v13  ;;  %v417_v16 = vmul.f32 0.35355338, %v318_v14  ;;  %v2402_v17 = vpop.f32.mrb[1].mxu0  ;;  %v2408_v18 = vpop.f32.mrb[1].mxu1 }
  0xee   : > { %v275_v19 = vpop.f32.mrb[2].mxu0  ;;  %v321_v20 = vpop.f32.mrb[2].mxu1 }
  0xef   : > { %v2403_v21 = vpop.f32.mrb[3].mxu0  ;;  %v424_v22 = vsel %vm420_vm2, %v417_v16, -inf  ;;  %v421_v23 = vsel %vm420_vm2, %v416_v15, -inf  ;;  %v2409_v24 = vpop.f32.mrb[3].mxu1  ;;  %v2863_v20 = vld [vmem:[%s2805_s25 + $0xc] sm:$0x7] }
  0xf0   : > { %425 = vmax.xlane.f32.xlu1 %v424_v22  ;;  %422 = vmax.xlane.f32.xlu0 %v421_v23  ;;  %v616_v23 = vand.u32 %v2814_v63, %v2863_v20 }
  0xf4   : > { %v364_v25 = vpop.f32.mrb[4].mxu0  ;;  %v410_v26 = vpop.f32.mrb[4].mxu1 }
  0xf5   : > { %v418_v27 = vmul.f32 0.35355338, %v364_v25  ;;  %v419_v28 = vmul.f32 0.35355338, %v410_v26  ;;  %v2414_v29 = vpop.f32.mrb[5].mxu0  ;;  %v2420_v30 = vpop.f32.mrb[5].mxu1 }
  0xf6   : > { %v367_v31 = vpop.f32.mrb[6].mxu0  ;;  %v413_v32 = vpop.f32.mrb[6].mxu1 }
  0xf7   : > { %v2415_v33 = vpop.f32.mrb[7].mxu0  ;;  %v430_v34 = vsel %vm420_vm2, %v419_v28, -inf  ;;  %v427_v35 = vsel %vm420_vm2, %v418_v27, -inf  ;;  %v2421_v36 = vpop.f32.mrb[7].mxu1 }
  0xf8   : > { %431 = vmax.xlane.f32.xlu1 %v430_v34  ;;  %428 = vmax.xlane.f32.xlu0 %v427_v35 }
 0x109   : > { %680 = vrot.lane.b32.xlu1 %v2786_v37, %s2693_s22 }
 0x10d   : > { %797 = vrot.lane.b32.xlu1 %v2790_v38, %s2693_s22 }
 0x17d   : > { %v426_v39 = vpop.xlane.xlu1 %425  ;;  %v423_v40 = vpop.xlane.xlu0 %422 }
 0x17e   : > { %v434_v41 = vsub.f32 %v417_v16, %v426_v39  ;;  %v433_v42 = vsub.f32 %v416_v15, %v423_v40  ;;  %v2858_v15 = vld [vmem:[%s2805_s25 + $0x8] sm:$0x7] }
 0x17f   : > { %v570_v18 = vand.u32 %v2814_v63, %v2858_v15 }
 0x180   : > { %v437_v43 = vmul.f32 1.442695, %v433_v42  ;;  %v439_v44 = vmul.f32 1.442695, %v434_v41 }
 0x182   : > { %2619 = vpow2.f32 %v437_v43 }
 0x183   : > { %2621 = vpow2.f32 %v439_v44  ;;  %v2950_v44 = vcombine.low %v2863_v20, %v2863_v20 }
 0x185   : > { %v432_v45 = vpop.xlane.xlu1 %431  ;;  %v429_v46 = vpop.xlane.xlu0 %428 }
 0x186   : > { %v436_v47 = vsub.f32 %v419_v28, %v432_v45  ;;  %v435_v48 = vsub.f32 %v418_v27, %v429_v46  ;;  %v665_v45 = vld [vmem:[%s2906_s28] sm:$0x7] }
 0x188   : > { %v441_v49 = vmul.f32 1.442695, %v435_v48  ;;  %v443_v50 = vmul.f32 1.442695, %v436_v47 }
 0x189   : > { %v681_v8 = vpop.permute.xlu1 %680 }
 0x18a   : > { %2623 = vpow2.f32 %v441_v49 }
 0x18b   : > { %2625 = vpow2.f32 %v443_v50 }
 0x18c   : > { %v2620_v51 = vpop.eup %2619 }
 0x18d   : > { %v445_v52 = vsel %vm420_vm2, %v2620_v51, 0.0  ;;  %v2622_v53 = vpop.eup %2621  ;;  %v798_v6 = vpop.permute.xlu1 %797 }
 0x18e   : > { %446 = vadd.xlane.f32.xlu0 %v445_v52  ;;  %v448_v54 = vsel %vm420_vm2, %v2622_v53, 0.0  ;;  %v803_v39 = vsel %vm231_vm1, %v798_v6, 0 }
 0x192   : > { %449 = vadd.xlane.f32.xlu0 %v448_v54 }
 0x194   : > { %v2624_v55 = vpop.eup %2623 }
 0x195   : > { %v451_v56 = vsel %vm420_vm2, %v2624_v55, 0.0  ;;  %v2797_v57 = vpop.eup %2625 }
 0x196   : > { %452 = vadd.xlane.f32.xlu1 %v451_v56  ;;  %v454_v58 = vsel %vm420_vm2, %v2797_v57, 0.0 }
 0x19a   : > { %455 = vadd.xlane.f32.xlu1 %v454_v58 }
 0x1a8   : > { %685 = vrot.lane.b32.xlu0 %v2809_v61, %s2693_s22 }
 0x1ab   : > { %741 = vrot.lane.b32.xlu1 %v2820_v4, %s2693_s22 }
 0x1ac   : > { %792 = vrot.lane.b32.xlu0 %v2826_v5, %s2693_s22 }
 0x1af   : > { %736 = vrot.lane.b32.xlu1 %v2838_v2, %s2693_s22 }
 0x1b0   : > { %853 = vrot.lane.b32.xlu0 %v2844_v9, %s2693_s22 }
 0x1b3   : > { %848 = vrot.lane.b32.xlu1 %v2851_v10, %s2693_s22 }
 0x21b   : > { %v447_v11 = vpop.xlane.xlu0 %446 }
 0x21c   : > { %2627 = vrcp.f32 %v447_v11 }
 0x21f   : > { %v450_v13 = vpop.xlane.xlu0 %449 }
 0x220   : > { %2629 = vrcp.f32 %v450_v13 }
 0x223   : > { %v453_v14 = vpop.xlane.xlu1 %452  ;;  %v686_v27 = vpop.permute.xlu0 %685 }
 0x224   : > { %2631 = vrcp.f32 %v453_v14  ;;  %v691_v30 = vsel %vm231_vm1, %v686_v27, 0 }
 0x226   : > { %v2628_v16 = vpop.eup %2627 }
 0x227   : > { %v461_v12 = vmul.f32 %v2628_v16, %v2620_v51  ;;  %v456_v17 = vpop.xlane.xlu1 %455  ;;  %v793_v34 = vpop.permute.xlu0 %792 }
 0x228   : > { %2633 = vrcp.f32 %v456_v17 }
 0x229   : > { %v465_v19 = vpack.c.bf16 %v461_v12, %v461_v12 }
 0x22a   : > { %v2630_v21 = vpop.eup %2629 }
 0x22b   : > { %v462_v22 = vmul.f32 %v2630_v21, %v2622_v53  ;;  %2425 = vmatmul.mubr.msk.bf16.vlgmr.msra.gmra.mrb[8].mxu0 %vm469_vm5, %v465_v19  ;;  %v742_v32 = vpop.permute.xlu1 %741  ;;  %v854_v36 = vpop.permute.xlu0 %853 }
 0x22c   : > { %2435 = vmatpush3.bf16.msra.mxu0 %v570_v18  ;;  %2436 = vmatprep.mubr.msk.bf16.mxu0 %vm2692_vm0, %v2691_v0  ;;  %v747_v35 = vsel %vm231_vm1, %v742_v32, 0  ;;  %v859_v41 = vsel %vm231_vm1, %v854_v36, 0  ;;  %v671_v18 = vld [vmem:[%s2906_s28 + $0x8] sm:$0x7]  ;;  %v674_v36 = vld [vmem:[%s2906_s28 + $0xc] sm:$0x7] }
 0x22d   : > { %v466_v24 = vpack.c.bf16 %v462_v22, %v462_v22  ;;  %2446 = vmatprep.subr.bf16.mxu0 %v2691_v0 }
 0x22e   : > { %v2632_v25 = vpop.eup %2631 }
 0x22f   : > { %v463_v26 = vmul.f32 %v2632_v25, %v2624_v55  ;;  %2431 = vmatmul.mubr.msk.bf16.vlgmr.msra.gmra.mrb[8].mxu1 %vm469_vm5, %v466_v24  ;;  %v737_v40 = vpop.permute.xlu1 %736 }
 0x230   : > { %2441 = vmatpush3.bf16.msra.mxu1 %v616_v23  ;;  %2442 = vmatprep.mubr.msk.bf16.mxu1 %vm2692_vm0, %v2691_v0 }
 0x231   : > { %v467_v28 = vpack.c.bf16 %v463_v26, %v463_v26  ;;  %2452 = vmatprep.subr.bf16.mxu1 %v2691_v0 }
 0x232   : > { %v2634_v29 = vpop.eup %2633 }
 0x233   : > { %v464_v31 = vmul.f32 %v2634_v29, %v2797_v57  ;;  %2437 = vmatmul.mubr.msk.bf16.vlgmr.msra.gmra.mrb[12].mxu0 %vm469_vm5, %v467_v28  ;;  %v849_v42 = vpop.permute.xlu1 %848 }
 0x234   : > { %2448 = vmatprep.mubr.msk.bf16.mxu0 %vm2692_vm0, %v2691_v0 }
 0x235   : > { %2447 = vmatpush3.bf16.xpose.msra.mxu0 %v691_v30  ;;  %v468_v33 = vpack.c.bf16 %v464_v31, %v464_v31 }
 0x236   : > { %2458 = vmatprep.subr.bf16.mxu0 %v2691_v0 }
 0x237   : > { %2443 = vmatmul.mubr.msk.bf16.vlgmr.msra.gmra.mrb[12].mxu1 %vm469_vm5, %v468_v33 }
 0x238   : > { %2454 = vmatprep.mubr.msk.bf16.mxu1 %vm2692_vm0, %v2691_v0 }
 0x239   : > { %2453 = vmatpush3.bf16.xpose.msra.mxu1 %v747_v35 }
 0x23a   : > { %2464 = vmatprep.subr.bf16.mxu1 %v2691_v0 }
 0x23c   : > { %2449 = vmatmul.mubr.msk.bf16.vlgmr.msra.gmra.mrb[16].mxu0 %vm231_vm1, %v681_v8 }
 0x23d   : > { %2459 = vmatpush3.bf16.xpose.msra.mxu0 %v803_v39  ;;  %2460 = vmatprep.mubr.msk.bf16.mxu0 %vm2692_vm0, %v2691_v0 }
 0x23e   : > { %2470 = vmatprep.subr.bf16.mxu0 %v2691_v0 }
 0x240   : > { %2455 = vmatmul.mubr.msk.bf16.vlgmr.msra.gmra.mrb[16].mxu1 %vm231_vm1, %v737_v40 }
 0x241   : > { %2465 = vmatpush3.bf16.xpose.msra.mxu1 %v859_v41  ;;  %2466 = vmatprep.mubr.msk.bf16.mxu1 %vm2692_vm0, %v2691_v0 }
 0x242   : > { %2476 = vmatprep.subr.bf16.mxu1 %v2691_v0 }
 0x244   : > { %2461 = vmatmul.mubr.msk.bf16.vlgmr.msra.gmra.mrb[20].mxu0 %vm231_vm1, %v793_v34 }
 0x245   : > { %2472 = vmatprep.mubr.msk.bf16.mxu0 %vm2692_vm0, %v2691_v0 }
 0x248   : > { %2467 = vmatmul.mubr.msk.bf16.vlgmr.msra.gmra.mrb[20].mxu1 %vm231_vm1, %v849_v42 }
 0x249   : > { %2478 = vmatprep.mubr.msk.bf16.mxu1 %vm2692_vm0, %v2691_v0 }
 0x2fe   : > { %v514_v43 = vpop.f32.mrb[8].mxu0 }
 0x2ff   : > { %v658_v46 = vpack.c.bf16 %v514_v43, %v514_v43  ;;  %v2426_v47 = vpop.f32.mrb[9].mxu0 }
 0x300   : > { %v517_v48 = vpop.f32.mrb[10].mxu0  ;;  %v2938_v47 = vcombine.low %v2858_v15, %v2858_v15 }
 0x301   : > { %v666_v49 = vsel %vm2909_vm8, %v658_v46, %v665_v45  ;;  %v2427_v50 = vpop.f32.mrb[11].mxu0  ;;  %v2944_v48 = vcombine.low %v2830_v1, %v2830_v1 }
 0x302   : > { %667 = vst [vmem:[%s2906_s28] sm:$0x7] %v666_v49  ;;  %v560_v51 = vpop.f32.mrb[8].mxu1 }
 0x303   : > { %v2432_v52 = vpop.f32.mrb[9].mxu1  ;;  %v659_v57 = vpack.c.bf16 %v560_v51, %v560_v51 }
 0x304   : > { %v563_v53 = vpop.f32.mrb[10].mxu1 }
 0x305   : > { %v2433_v54 = vpop.f32.mrb[11].mxu1  ;;  %v669_v3 = vsel %vm2909_vm8, %v659_v57, %v668_v59 }
 0x306   : > { %v606_v55 = vpop.f32.mrb[12].mxu0  ;;  %670 = vst [vmem:[%s2906_s28 + $0x4] sm:$0x7] %v669_v3 }
 0x307   : > { %v2438_v56 = vpop.f32.mrb[13].mxu0  ;;  %v660_v12 = vpack.c.bf16 %v606_v55, %v606_v55 }
 0x308   : > { %v609_v58 = vpop.f32.mrb[14].mxu0 }
 0x309   : > { %v2439_v60 = vpop.f32.mrb[15].mxu0  ;;  %v672_v22 = vsel %vm2909_vm8, %v660_v12, %v671_v18 }
 0x30a   : > { %v652_v7 = vpop.f32.mrb[12].mxu1  ;;  %673 = vst [vmem:[%s2906_s28 + $0x8] sm:$0x7] %v672_v22 }
 0x30b   : > { %v2444_v8 = vpop.f32.mrb[13].mxu1  ;;  %v661_v33 = vpack.c.bf16 %v652_v7, %v652_v7 }
 0x30c   : > { %v655_v11 = vpop.f32.mrb[14].mxu1 }
 0x30d   : > { %v2445_v6 = vpop.f32.mrb[15].mxu1  ;;  %v675_v40 = vsel %vm2909_vm8, %v661_v33, %v674_v36 }
 0x30e   : > { %676 = vst [vmem:[%s2906_s28 + $0xc] sm:$0x7] %v675_v40  ;;  %v2966_v6 = vcombine.low %v2812_v62, %v2812_v62 }
 0x30f   : > { %v727_v13 = vpop.f32.mrb[16].mxu0 }
 0x310   : > { %v901_v14 = vmul.f32 0.35355338, %v727_v13  ;;  %v2450_v16 = vpop.f32.mrb[17].mxu0 }
 0x311   : > { %v730_v17 = vpop.f32.mrb[18].mxu0 }
 0x312   : > { %v2451_v19 = vpop.f32.mrb[19].mxu0  ;;  %v905_v21 = vsel %vm420_vm2, %v901_v14, -inf }
 0x313   : > { %v783_v23 = vpop.f32.mrb[16].mxu1  ;;  %906 = vmax.xlane.f32.xlu0 %v905_v21 }
 0x314   : > { %v2926_v24 = vmul.f32 0.35355338, %v783_v23  ;;  %v2456_v25 = vpop.f32.mrb[17].mxu1 }
 0x315   : > { %v786_v26 = vpop.f32.mrb[18].mxu1 }
 0x316   : > { %v908_v27 = vsel %vm420_vm2, %v2926_v24, -inf  ;;  %v2457_v28 = vpop.f32.mrb[19].mxu1 }
 0x317   : > { %909 = vmax.xlane.f32.xlu0 %v908_v27  ;;  %v839_v29 = vpop.f32.mrb[20].mxu0 }
 0x318   : > { %v903_v30 = vmul.f32 0.35355338, %v839_v29  ;;  %v2462_v31 = vpop.f32.mrb[21].mxu0 }
 0x319   : > { %v842_v32 = vpop.f32.mrb[22].mxu0 }
 0x31a   : > { %v911_v34 = vsel %vm420_vm2, %v903_v30, -inf  ;;  %v2463_v35 = vpop.f32.mrb[23].mxu0 }
 0x31b   : > { %v895_v39 = vpop.f32.mrb[20].mxu1  ;;  %912 = vmax.xlane.f32.xlu1 %v911_v34 }
 0x31c   : > { %v904_v41 = vmul.f32 0.35355338, %v895_v39  ;;  %v2468_v42 = vpop.f32.mrb[21].mxu1 }
 0x31d   : > { %v898_v43 = vpop.f32.mrb[22].mxu1 }
 0x31e   : > { %v914_v45 = vsel %vm420_vm2, %v904_v41, -inf  ;;  %v2469_v46 = vpop.f32.mrb[23].mxu1 }
 0x31f   : > { %915 = vmax.xlane.f32.xlu0 %v914_v45 }
 0x32c   : > { %1058 = vrot.lane.b32.xlu1 %v2938_v47, %s2693_s22 }
 0x330   : > { %1007 = vrot.lane.b32.xlu1 %v2944_v48, %s2693_s22 }
 0x334   : > { %1109 = vrot.lane.b32.xlu1 %v2950_v44, %s2693_s22 }
 0x338   : > { %1199 = vrot.lane.b32.xlu1 %v2786_v37, %s2695_s29 }
 0x3a0   : > { %v907_v15 = vpop.xlane.xlu0 %906 }
 0x3a1   : > { %v917_v49 = vsub.f32 %v901_v14, %v907_v15 }
 0x3a3   : > { %v921_v50 = vmul.f32 1.442695, %v917_v49 }
 0x3a4   : > { %v910_v1 = vpop.xlane.xlu0 %909 }
 0x3a5   : > { %2635 = vpow2.f32 %v921_v50  ;;  %v918_v13 = vsub.f32 %v2926_v24, %v910_v1 }
 0x3a7   : > { %v923_v14 = vmul.f32 1.442695, %v918_v13 }
 0x3a8   : > { %v913_v51 = vpop.xlane.xlu1 %912 }
 0x3a9   : > { %v919_v52 = vsub.f32 %v903_v30, %v913_v51 }
 0x3ab   : > { %v925_v53 = vmul.f32 1.442695, %v919_v52 }
 0x3ac   : > { %v916_v54 = vpop.xlane.xlu0 %915  ;;  %v1059_v55 = vpop.permute.xlu1 %1058 }
 0x3ad   : > { %2637 = vpow2.f32 %v925_v53  ;;  %v920_v20 = vsub.f32 %v904_v41, %v916_v54  ;;  %v1064_v26 = vand.u32 %v1059_v55, %v2814_v63 }
 0x3af   : > { %v2636_v56 = vpop.eup %2635  ;;  %v927_v57 = vmul.f32 1.442695, %v920_v20 }
 0x3b0   : > { %v929_v58 = vsel %vm420_vm2, %v2636_v56, 0.0  ;;  %v1008_v59 = vpop.permute.xlu1 %1007 }
 0x3b1   : > { %2639 = vpow2.f32 %v927_v57  ;;  %930 = vadd.xlane.f32.xlu0 %v929_v58  ;;  %v1013_v60 = vand.u32 %v1008_v59, %v2814_v63 }
 0x3b2   : > { %2641 = vpow2.f32 %v923_v14 }
 0x3b3   : > { %2477 = vmatpush3.bf16.msra.mxu1 %v1013_v60 }
 0x3b4   : > { %2488 = vmatprep.subr.bf16.mxu1 %v2691_v0  ;;  %v1110_v12 = vpop.permute.xlu1 %1109 }
 0x3b5   : > { %v1115_v42 = vand.u32 %v1110_v12, %v2814_v63 }
 0x3b7   : > { %v2638_v3 = vpop.eup %2637 }
 0x3b8   : > { %v935_v7 = vsel %vm420_vm2, %v2638_v3, 0.0  ;;  %v1200_v18 = vpop.permute.xlu1 %1199 }
 0x3b9   : > { %936 = vadd.xlane.f32.xlu1 %v935_v7 }
 0x3bb   : > { %v2960_v8 = vpop.eup %2639 }
 0x3bc   : > { %v938_v11 = vsel %vm420_vm2, %v2960_v8, 0.0  ;;  %v2642_v16 = vpop.eup %2641 }
 0x3bd   : > { %939 = vadd.xlane.f32.xlu1 %v938_v11  ;;  %v932_v62 = vsel %vm420_vm2, %v2642_v16, 0.0 }
 0x3c7   : > { %956 = vrot.lane.b32.xlu0 %v2966_v6, %s2693_s22 }
 0x3ce   : > { %1251 = vrot.lane.b32.xlu1 %v2820_v4, %s2695_s29 }
 0x3d2   : > { %1249 = vrot.lane.b32.xlu1 %v2838_v2, %s2695_s29 }
 0x3d6   : > { %1349 = vrot.lane.b32.xlu1 %v2851_v10, %s2695_s29 }
 0x3e6   : > { %933 = vadd.xlane.f32.xlu0 %v932_v62 }
 0x3fc   : > { %1201 = vrot.lane.b32.xlu0 %v2809_v61, %s2695_s29 }
 0x400   : > { %1301 = vrot.lane.b32.xlu0 %v2790_v38, %s2695_s29 }
 0x404   : > { %1299 = vrot.lane.b32.xlu0 %v2826_v5, %s2695_s29 }
 0x408   : > { %1351 = vrot.lane.b32.xlu0 %v2844_v9, %s2695_s29 }
 0x43e   : > { %v931_v17 = vpop.xlane.xlu0 %930 }
 0x43f   : > { %2643 = vrcp.f32 %v931_v17 }
 0x442   : > { %v957_v19 = vpop.permute.xlu0 %956 }
 0x443   : > { %v962_v21 = vand.u32 %v957_v19, %v2814_v63 }
 0x445   : > { %2471 = vmatpush3.bf16.msra.mxu0 %v962_v21 }
 0x446   : > { %v937_v22 = vpop.xlane.xlu1 %936  ;;  %2482 = vmatprep.subr.bf16.mxu0 %v2691_v0 }
 0x447   : > { %2645 = vrcp.f32 %v937_v22 }
 0x449   : > { %v2644_v23 = vpop.eup %2643 }
 0x44a   : > { %v945_v24 = vmul.f32 %v2644_v23, %v2636_v56  ;;  %v940_v31 = vpop.xlane.xlu1 %939 }
 0x44c   : > { %v949_v25 = vpack.c.bf16 %v945_v24, %v945_v24 }
 0x44e   : > { %2473 = vmatmul.mubr.msk.bf16.vlgmr.msra.gmra.mrb[24].mxu0 %vm469_vm5, %v949_v25  ;;  %v1252_v46 = vpop.permute.xlu1 %1251 }
 0x44f   : > { %2483 = vmatpush3.bf16.msra.mxu0 %v1064_v26  ;;  %2484 = vmatprep.mubr.msk.bf16.mxu0 %vm2692_vm0, %v2691_v0  ;;  %v1257_v49 = vsel %vm231_vm1, %v1252_v46, 0 }
 0x450   : > { %2494 = vmatprep.subr.bf16.mxu0 %v2691_v0 }
 0x451   : > { %v2646_v27 = vpop.eup %2645 }
 0x452   : > { %v947_v28 = vmul.f32 %v2646_v27, %v2638_v3  ;;  %v1250_v1 = vpop.permute.xlu1 %1249 }
 0x454   : > { %v951_v29 = vpack.c.bf16 %v947_v28, %v947_v28 }
 0x456   : > { %2485 = vmatmul.mubr.msk.bf16.vlgmr.msra.gmra.mrb[28].mxu0 %vm469_vm5, %v951_v29  ;;  %v1350_v52 = vpop.permute.xlu1 %1349 }
 0x457   : > { %2496 = vmatprep.mubr.msk.bf16.mxu0 %vm2692_vm0, %v2691_v0 }
 0x473   : > { %v934_v30 = vpop.xlane.xlu0 %933 }
 0x474   : > { %2647 = vrcp.f32 %v934_v30 }
 0x475   : > { %2649 = vrcp.f32 %v940_v31 }
 0x477   : > { %v1202_v32 = vpop.permute.xlu0 %1201 }
 0x478   : > { %v1207_v33 = vsel %vm231_vm1, %v1202_v32, 0 }
 0x479   : > { %2495 = vmatpush3.bf16.xpose.msra.mxu0 %v1207_v33 }
 0x47a   : > { %2506 = vmatprep.subr.bf16.mxu0 %v2691_v0 }
 0x47b   : > { %v1302_v34 = vpop.permute.xlu0 %1301 }
 0x47c   : > { %v1307_v36 = vsel %vm231_vm1, %v1302_v34, 0 }
 0x47e   : > { %v2648_v35 = vpop.eup %2647 }
 0x47f   : > { %v946_v39 = vmul.f32 %v2648_v35, %v2642_v16  ;;  %v2650_v41 = vpop.eup %2649  ;;  %v1300_v45 = vpop.permute.xlu0 %1299 }
 0x480   : > { %2497 = vmatmul.mubr.msk.bf16.vlgmr.msra.gmra.mrb[32].mxu0 %vm231_vm1, %v1200_v18  ;;  %v948_v43 = vmul.f32 %v2650_v41, %v2960_v8 }
 0x481   : > { %2507 = vmatpush3.bf16.xpose.msra.mxu0 %v1307_v36  ;;  %v950_v40 = vpack.c.bf16 %v946_v39, %v946_v39  ;;  %2508 = vmatprep.mubr.msk.bf16.mxu0 %vm2692_vm0, %v2691_v0 }
 0x482   : > { %2518 = vmatprep.subr.bf16.mxu0 %v2691_v0  ;;  %v952_v15 = vpack.c.bf16 %v948_v43, %v948_v43 }
 0x483   : > { %2479 = vmatmul.mubr.msk.bf16.vlgmr.msra.gmra.mrb[24].mxu1 %vm469_vm5, %v950_v40  ;;  %v1352_v50 = vpop.permute.xlu0 %1351 }
 0x484   : > { %2489 = vmatpush3.bf16.msra.mxu1 %v1115_v42  ;;  %2490 = vmatprep.mubr.msk.bf16.mxu1 %vm2692_vm0, %v2691_v0  ;;  %v1357_v51 = vsel %vm231_vm1, %v1352_v50, 0 }
 0x485   : > { %2500 = vmatprep.subr.bf16.mxu1 %v2691_v0 }
 0x488   : > { %2509 = vmatmul.mubr.msk.bf16.vlgmr.msra.gmra.mrb[36].mxu0 %vm231_vm1, %v1300_v45 }
 0x489   : > { %2520 = vmatprep.mubr.msk.bf16.mxu0 %vm2692_vm0, %v2691_v0 }
 0x48b   : > { %2491 = vmatmul.mubr.msk.bf16.vlgmr.msra.gmra.mrb[28].mxu1 %vm469_vm5, %v952_v15 }
 0x48c   : > { %2502 = vmatprep.mubr.msk.bf16.mxu1 %vm2692_vm0, %v2691_v0 }
 0x48d   : > { %2501 = vmatpush3.bf16.xpose.msra.mxu1 %v1257_v49 }
 0x48e   : > { %2512 = vmatprep.subr.bf16.mxu1 %v2691_v0 }
 0x494   : > { %2503 = vmatmul.mubr.msk.bf16.vlgmr.msra.gmra.mrb[32].mxu1 %vm231_vm1, %v1250_v1 }
 0x495   : > { %2513 = vmatpush3.bf16.xpose.msra.mxu1 %v1357_v51  ;;  %2514 = vmatprep.mubr.msk.bf16.mxu1 %vm2692_vm0, %v2691_v0 }
 0x496   : > { %2524 = vmatprep.subr.bf16.mxu1 %v2691_v0 }
 0x49c   : > { %2515 = vmatmul.mubr.msk.bf16.vlgmr.msra.gmra.mrb[36].mxu1 %vm231_vm1, %v1350_v52 }
 0x49d   : > { %2526 = vmatprep.mubr.msk.bf16.mxu1 %vm2692_vm0, %v2691_v0 }
 0x521   : > { %v3025_v53 = vpop.f32.mrb[24].mxu0 }
 0x522   : > { %v2474_v54 = vpop.f32.mrb[25].mxu0 }
 0x523   : > { %v1001_v55 = vpop.f32.mrb[26].mxu0 }
 0x524   : > { %v2475_v20 = vpop.f32.mrb[27].mxu0 }
 0x529   : > { %v3027_v56 = vpop.f32.mrb[28].mxu0 }
 0x52a   : > { %v2486_v57 = vpop.f32.mrb[29].mxu0 }
 0x52b   : > { %v1103_v58 = vpop.f32.mrb[30].mxu0 }
 0x52c   : > { %v2487_v59 = vpop.f32.mrb[31].mxu0 }
 0x553   : > { %v1243_v60 = vpop.f32.mrb[32].mxu0 }
 0x554   : > { %v1399_v3 = vmul.f32 0.35355338, %v1243_v60  ;;  %v2498_v7 = vpop.f32.mrb[33].mxu0 }
 0x555   : > { %v1246_v8 = vpop.f32.mrb[34].mxu0 }
 0x556   : > { %v3029_v11 = vpop.f32.mrb[24].mxu1  ;;  %v2499_v13 = vpop.f32.mrb[35].mxu0  ;;  %v1403_v14 = vsel %vm420_vm2, %v1399_v3, -inf }
 0x557   : > { %v2480_v16 = vpop.f32.mrb[25].mxu1  ;;  %1404 = vmax.xlane.f32.xlu0 %v1403_v14 }
 0x558   : > { %v1052_v62 = vpop.f32.mrb[26].mxu1 }
 0x559   : > { %v2481_v12 = vpop.f32.mrb[27].mxu1 }
 0x55b   : > { %v1343_v17 = vpop.f32.mrb[36].mxu0 }
 0x55c   : > { %v1401_v18 = vmul.f32 0.35355338, %v1343_v17  ;;  %v2510_v19 = vpop.f32.mrb[37].mxu0 }
 0x55d   : > { %v1346_v21 = vpop.f32.mrb[38].mxu0 }
 0x55e   : > { %v3032_v22 = vpop.f32.mrb[28].mxu1  ;;  %v1409_v23 = vsel %vm420_vm2, %v1401_v18, -inf  ;;  %v2511_v24 = vpop.f32.mrb[39].mxu0 }
 0x55f   : > { %v2492_v25 = vpop.f32.mrb[29].mxu1  ;;  %1410 = vmax.xlane.f32.xlu1 %v1409_v23 }
 0x560   : > { %v1154_v26 = vpop.f32.mrb[30].mxu1 }
 0x561   : > { %v2493_v27 = vpop.f32.mrb[31].mxu1 }
 0x567   : > { %v1293_v28 = vpop.f32.mrb[32].mxu1 }
 0x568   : > { %v1400_v29 = vmul.f32 0.35355338, %v1293_v28  ;;  %v2504_v30 = vpop.f32.mrb[33].mxu1 }
 0x569   : > { %v1296_v31 = vpop.f32.mrb[34].mxu1 }
 0x56a   : > { %v1406_v32 = vsel %vm420_vm2, %v1400_v29, -inf  ;;  %v2505_v33 = vpop.f32.mrb[35].mxu1 }
 0x56b   : > { %1407 = vmax.xlane.f32.xlu0 %v1406_v32 }
 0x56f   : > { %v1393_v34 = vpop.f32.mrb[36].mxu1 }
 0x570   : > { %v1402_v35 = vmul.f32 0.35355338, %v1393_v34  ;;  %v2516_v36 = vpop.f32.mrb[37].mxu1  ;;  %1547 = vrot.lane.b32.xlu1 %v2938_v47, %s2695_s29 }
 0x571   : > { %v1396_v39 = vpop.f32.mrb[38].mxu1 }
 0x572   : > { %v1412_v40 = vsel %vm420_vm2, %v1402_v35, -inf  ;;  %v2517_v41 = vpop.f32.mrb[39].mxu1 }
 0x573   : > { %1413 = vmax.xlane.f32.xlu0 %v1412_v40 }
 0x574   : > { %1499 = vrot.lane.b32.xlu1 %v2944_v48, %s2695_s29 }
 0x578   : > { %1595 = vrot.lane.b32.xlu1 %v2950_v44, %s2695_s29 }
 0x5e4   : > { %v1405_v42 = vpop.xlane.xlu0 %1404 }
 0x5e5   : > { %v1415_v43 = vsub.f32 %v1399_v3, %v1405_v42 }
 0x5e7   : > { %v1419_v45 = vmul.f32 1.442695, %v1415_v43 }
 0x5e9   : > { %2651 = vpow2.f32 %v1419_v45 }
 0x5ec   : > { %v1411_v46 = vpop.xlane.xlu1 %1410 }
 0x5ed   : > { %v1417_v15 = vsub.f32 %v1401_v18, %v1411_v46 }
 0x5ef   : > { %v1423_v49 = vmul.f32 1.442695, %v1417_v15 }
 0x5f0   : > { %v1548_v50 = vpop.permute.xlu1 %1547 }
 0x5f1   : > { %2653 = vpow2.f32 %v1423_v49  ;;  %v1553_v17 = vand.u32 %v1548_v50, %v2814_v63 }
 0x5f3   : > { %v2652_v1 = vpop.eup %2651 }
 0x5f4   : > { %v1427_v51 = vsel %vm420_vm2, %v2652_v1, 0.0  ;;  %v1500_v52 = vpop.permute.xlu1 %1499 }
 0x5f5   : > { %1428 = vadd.xlane.f32.xlu0 %v1427_v51  ;;  %v1505_v54 = vand.u32 %v1500_v52, %v2814_v63 }
 0x5f7   : > { %2525 = vmatpush3.bf16.msra.mxu1 %v1505_v54 }
 0x5f8   : > { %2536 = vmatprep.subr.bf16.mxu1 %v2691_v0  ;;  %v1408_v20 = vpop.xlane.xlu0 %1407 }
 0x5f9   : > { %v1416_v8 = vsub.f32 %v1400_v29, %v1408_v20 }
 0x5fb   : > { %v2654_v55 = vpop.eup %2653  ;;  %v1421_v13 = vmul.f32 1.442695, %v1416_v8 }
 0x5fc   : > { %v1433_v57 = vsel %vm420_vm2, %v2654_v55, 0.0 }
 0x5fd   : > { %1434 = vadd.xlane.f32.xlu1 %v1433_v57 }
 0x600   : > { %v1414_v58 = vpop.xlane.xlu0 %1413 }
 0x601   : > { %v1418_v59 = vsub.f32 %v1402_v35, %v1414_v58 }
 0x603   : > { %v1425_v60 = vmul.f32 1.442695, %v1418_v59 }
 0x605   : > { %2655 = vpow2.f32 %v1425_v60 }
 0x606   : > { %2657 = vpow2.f32 %v1421_v13 }
 0x60b   : > { %1451 = vrot.lane.b32.xlu0 %v2966_v6, %s2695_s29 }
 0x60f   : > { %v3049_v3 = vpop.eup %2655 }
 0x610   : > { %v1436_v7 = vsel %vm420_vm2, %v3049_v3, 0.0  ;;  %v2658_v14 = vpop.eup %2657 }
 0x611   : > { %1437 = vadd.xlane.f32.xlu1 %v1436_v7  ;;  %v1430_v16 = vsel %vm420_vm2, %v2658_v14, 0.0 }
 0x622   : > { %1685 = vrot.lane.b32.xlu1 %v2786_v37, %s2696_s30 }
 0x626   : > { %1735 = vrot.lane.b32.xlu1 %v2838_v2, %s2696_s30  ;;  %v1596_v2 = vpop.permute.xlu1 %1595 }
 0x627   : > { %v1601_v34 = vand.u32 %v1596_v2, %v2814_v63 }
 0x62a   : > { %1431 = vadd.xlane.f32.xlu0 %v1430_v16  ;;  %1785 = vrot.lane.b32.xlu1 %v2826_v5, %s2696_s30 }
 0x62e   : > { %1835 = vrot.lane.b32.xlu1 %v2851_v10, %s2696_s30 }
 0x640   : > { %1687 = vrot.lane.b32.xlu0 %v2809_v61, %s2696_s30 }
 0x644   : > { %1737 = vrot.lane.b32.xlu0 %v2820_v4, %s2696_s30 }
 0x648   : > { %1787 = vrot.lane.b32.xlu0 %v2790_v38, %s2696_s30 }
 0x64c   : > { %1837 = vrot.lane.b32.xlu0 %v2844_v9, %s2696_s30 }
 0x682   : > { %v1429_v37 = vpop.xlane.xlu0 %1428 }
 0x683   : > { %2659 = vrcp.f32 %v1429_v37 }
 0x686   : > { %v1452_v62 = vpop.permute.xlu0 %1451 }
 0x687   : > { %v1457_v5 = vand.u32 %v1452_v62, %v2814_v63 }
 0x689   : > { %2519 = vmatpush3.bf16.msra.mxu0 %v1457_v5 }
 0x68a   : > { %v1435_v10 = vpop.xlane.xlu1 %1434  ;;  %2530 = vmatprep.subr.bf16.mxu0 %v2691_v0 }
 0x68b   : > { %2661 = vrcp.f32 %v1435_v10 }
 0x68d   : > { %v2660_v61 = vpop.eup %2659 }
 0x68e   : > { %v1443_v12 = vmul.f32 %v2660_v61, %v2652_v1 }
 0x690   : > { %v1447_v4 = vpack.c.bf16 %v1443_v12, %v1443_v12 }
 0x692   : > { %2521 = vmatmul.mubr.msk.bf16.vlgmr.msra.gmra.mrb[40].mxu0 %vm469_vm5, %v1447_v4 }
 0x693   : > { %2531 = vmatpush3.bf16.msra.mxu0 %v1553_v17  ;;  %2532 = vmatprep.mubr.msk.bf16.mxu0 %vm2692_vm0, %v2691_v0 }
 0x694   : > { %2542 = vmatprep.subr.bf16.mxu0 %v2691_v0 }
 0x695   : > { %v2662_v38 = vpop.eup %2661 }
 0x696   : > { %v1445_v9 = vmul.f32 %v2662_v38, %v2654_v55 }
 0x698   : > { %v1449_v18 = vpack.c.bf16 %v1445_v9, %v1445_v9 }
 0x69a   : > { %2533 = vmatmul.mubr.msk.bf16.vlgmr.msra.gmra.mrb[44].mxu0 %vm469_vm5, %v1449_v18 }
 0x69b   : > { %2544 = vmatprep.mubr.msk.bf16.mxu0 %vm2692_vm0, %v2691_v0 }
 0x69e   : > { %v1438_v21 = vpop.xlane.xlu1 %1437 }
 0x6a2   : > { %v1686_v25 = vpop.permute.xlu1 %1685 }
 0x6a6   : > { %v1736_v30 = vpop.permute.xlu1 %1735 }
 0x6aa   : > { %v1786_v36 = vpop.permute.xlu1 %1785 }
 0x6ae   : > { %v1836_v43 = vpop.permute.xlu1 %1835 }
 0x6b7   : > { %v1432_v19 = vpop.xlane.xlu0 %1431 }
 0x6b8   : > { %2663 = vrcp.f32 %v1432_v19 }
 0x6b9   : > { %2665 = vrcp.f32 %v1438_v21 }
 0x6bb   : > { %v1688_v23 = vpop.permute.xlu0 %1687 }
 0x6bc   : > { %v1693_v24 = vsel %vm231_vm1, %v1688_v23, 0 }
 0x6bd   : > { %2543 = vmatpush3.bf16.xpose.msra.mxu0 %v1693_v24 }
 0x6be   : > { %2554 = vmatprep.subr.bf16.mxu0 %v2691_v0 }
 0x6bf   : > { %v1738_v26 = vpop.permute.xlu0 %1737 }
 0x6c0   : > { %v1743_v40 = vsel %vm231_vm1, %v1738_v26, 0 }
 0x6c2   : > { %v2664_v27 = vpop.eup %2663 }
 0x6c3   : > { %v1444_v28 = vmul.f32 %v2664_v27, %v2658_v14  ;;  %v1788_v29 = vpop.permute.xlu0 %1787  ;;  %v2666_v33 = vpop.eup %2665 }
 0x6c4   : > { %v1793_v31 = vsel %vm231_vm1, %v1788_v29, 0  ;;  %2545 = vmatmul.mubr.msk.bf16.vlgmr.msra.gmra.mrb[48].mxu0 %vm231_vm1, %v1686_v25  ;;  %v1446_v35 = vmul.f32 %v2666_v33, %v3049_v3 }
 0x6c5   : > { %2555 = vmatpush3.bf16.xpose.msra.mxu0 %v1793_v31  ;;  %v1448_v32 = vpack.c.bf16 %v1444_v28, %v1444_v28  ;;  %2556 = vmatprep.mubr.msk.bf16.mxu0 %vm2692_vm0, %v2691_v0 }
 0x6c6   : > { %2566 = vmatprep.subr.bf16.mxu0 %v2691_v0  ;;  %v1450_v39 = vpack.c.bf16 %v1446_v35, %v1446_v35 }
 0x6c7   : > { %2527 = vmatmul.mubr.msk.bf16.vlgmr.msra.gmra.mrb[40].mxu1 %vm469_vm5, %v1448_v32  ;;  %v1838_v41 = vpop.permute.xlu0 %1837 }
 0x6c8   : > { %2537 = vmatpush3.bf16.msra.mxu1 %v1601_v34  ;;  %2538 = vmatprep.mubr.msk.bf16.mxu1 %vm2692_vm0, %v2691_v0  ;;  %v1843_v42 = vsel %vm231_vm1, %v1838_v41, 0 }
 0x6c9   : > { %2548 = vmatprep.subr.bf16.mxu1 %v2691_v0 }
 0x6cc   : > { %2557 = vmatmul.mubr.msk.bf16.vlgmr.msra.gmra.mrb[52].mxu0 %vm231_vm1, %v1786_v36 }
 0x6cd   : > { %2568 = vmatprep.mubr.msk.bf16.mxu0 %vm2692_vm0, %v2691_v0 }
 0x6cf   : > { %2539 = vmatmul.mubr.msk.bf16.vlgmr.msra.gmra.mrb[44].mxu1 %vm469_vm5, %v1450_v39 }
 0x6d0   : > { %2550 = vmatprep.mubr.msk.bf16.mxu1 %vm2692_vm0, %v2691_v0 }
 0x6d1   : > { %2549 = vmatpush3.bf16.xpose.msra.mxu1 %v1743_v40 }
 0x6d2   : > { %2560 = vmatprep.subr.bf16.mxu1 %v2691_v0 }
 0x6d8   : > { %2551 = vmatmul.mubr.msk.bf16.vlgmr.msra.gmra.mrb[48].mxu1 %vm231_vm1, %v1736_v30 }
 0x6d9   : > { %2561 = vmatpush3.bf16.xpose.msra.mxu1 %v1843_v42  ;;  %2562 = vmatprep.mubr.msk.bf16.mxu1 %vm2692_vm0, %v2691_v0 }
 0x6da   : > { %2572 = vmatprep.subr.bf16.mxu1 %v2691_v0 }
 0x6e0   : > { %2563 = vmatmul.mubr.msk.bf16.vlgmr.msra.gmra.mrb[52].mxu1 %vm231_vm1, %v1836_v43 }
 0x6e1   : > { %2574 = vmatprep.mubr.msk.bf16.mxu1 %vm2692_vm0, %v2691_v0 }
 0x765   : > { %v3109_v45 = vpop.f32.mrb[40].mxu0 }
 0x766   : > { %v2522_v46 = vpop.f32.mrb[41].mxu0 }
 0x767   : > { %v1496_v15 = vpop.f32.mrb[42].mxu0 }
 0x768   : > { %v2523_v49 = vpop.f32.mrb[43].mxu0 }
 0x76d   : > { %v3111_v50 = vpop.f32.mrb[44].mxu0 }
 0x76e   : > { %v2534_v1 = vpop.f32.mrb[45].mxu0 }
 0x76f   : > { %v1592_v51 = vpop.f32.mrb[46].mxu0 }
 0x770   : > { %v2535_v52 = vpop.f32.mrb[47].mxu0 }
 0x797   : > { %v1729_v54 = vpop.f32.mrb[48].mxu0 }
 0x798   : > { %v1885_v55 = vmul.f32 0.35355338, %v1729_v54  ;;  %v2546_v20 = vpop.f32.mrb[49].mxu0 }
 0x799   : > { %v1732_v57 = vpop.f32.mrb[50].mxu0  ;;  %v2323_v20 = vpack.c.bf16 %v3029_v11, %v3029_v11  ;;  %v2328_v11 = vpack.c.bf16 %v3111_v50, %v3111_v50 }
 0x79a   : > { %v3113_v58 = vpop.f32.mrb[40].mxu1  ;;  %v1889_v59 = vsel %vm420_vm2, %v1885_v55, -inf  ;;  %v2547_v60 = vpop.f32.mrb[51].mxu0  ;;  %v2325_v57 = vpack.c.bf16 %v3032_v22, %v3032_v22 }
 0x79b   : > { %v2528_v3 = vpop.f32.mrb[41].mxu1  ;;  %1890 = vmax.xlane.f32.xlu0 %v1889_v59 }
 0x79c   : > { %v1544_v7 = vpop.f32.mrb[42].mxu1 }
 0x79d   : > { %v2529_v8 = vpop.f32.mrb[43].mxu1 }
 0x79f   : > { %v1829_v13 = vpop.f32.mrb[52].mxu0 }
 0x7a0   : > { %v1887_v14 = vmul.f32 0.35355338, %v1829_v13  ;;  %v2558_v16 = vpop.f32.mrb[53].mxu0 }
 0x7a1   : > { %v1832_v37 = vpop.f32.mrb[54].mxu0 }
 0x7a2   : > { %v3116_v2 = vpop.f32.mrb[44].mxu1  ;;  %v1895_v62 = vsel %vm420_vm2, %v1887_v14, -inf  ;;  %v2559_v5 = vpop.f32.mrb[55].mxu0 }
 0x7a3   : > { %v2540_v10 = vpop.f32.mrb[45].mxu1  ;;  %1896 = vmax.xlane.f32.xlu0 %v1895_v62  ;;  %v1187_v5 = vld [vmem:[%s2906_s28] sm:$0x7] }
 0x7a4   : > { %v1640_v61 = vpop.f32.mrb[46].mxu1 }
 0x7a5   : > { %v2541_v12 = vpop.f32.mrb[47].mxu1 }
 0x7ab   : > { %v1779_v4 = vpop.f32.mrb[48].mxu1 }
 0x7ac   : > { %v1886_v17 = vmul.f32 0.35355338, %v1779_v4  ;;  %v2552_v38 = vpop.f32.mrb[49].mxu1 }
 0x7ad   : > { %v1782_v9 = vpop.f32.mrb[50].mxu1 }
 0x7ae   : > { %v2553_v18 = vpop.f32.mrb[51].mxu1  ;;  %v1892_v19 = vsel %vm420_vm2, %v1886_v17, -inf }
 0x7af   : > { %1893 = vmax.xlane.f32.xlu1 %v1892_v19  ;;  %v1190_v19 = vld [vmem:[%s2906_s28 + $0x4] sm:$0x7] }
 0x7b3   : > { %v1879_v21 = vpop.f32.mrb[52].mxu1 }
 0x7b4   : > { %v1888_v23 = vmul.f32 0.35355338, %v1879_v21  ;;  %v2564_v24 = vpop.f32.mrb[53].mxu1 }
 0x7b5   : > { %v1882_v25 = vpop.f32.mrb[54].mxu1  ;;  %v1193_v24 = vld [vmem:[%s2906_s28 + $0x8] sm:$0x7] }
 0x7b6   : > { %v2565_v26 = vpop.f32.mrb[55].mxu1  ;;  %v1898_v27 = vsel %vm420_vm2, %v1888_v23, -inf }
 0x7b7   : > { %1899 = vmax.xlane.f32.xlu0 %v1898_v27  ;;  %v1196_v27 = vld [vmem:[%s2906_s28 + $0xc] sm:$0x7] }
 0x7c0   : > { %1937 = vrot.lane.b32.xlu1 %v2966_v6, %s2696_s30 }
 0x828   : > { %v1891_v28 = vpop.xlane.xlu0 %1890 }
 0x829   : > { %v1901_v29 = vsub.f32 %v1885_v55, %v1891_v28  ;;  %v2322_v55 = vpack.c.bf16 %v3025_v53, %v3025_v53  ;;  %v2326_v53 = vpack.c.bf16 %v3109_v45, %v3109_v45 }
 0x82b   : > { %v1905_v30 = vmul.f32 1.442695, %v1901_v29 }
 0x82d   : > { %2667 = vpow2.f32 %v1905_v30 }
 0x830   : > { %v1897_v31 = vpop.xlane.xlu0 %1896 }
 0x831   : > { %v1903_v32 = vsub.f32 %v1887_v14, %v1897_v31 }
 0x833   : > { %v1909_v33 = vmul.f32 1.442695, %v1903_v32 }
 0x835   : > { %2669 = vpow2.f32 %v1909_v33 }
 0x837   : > { %v2668_v34 = vpop.eup %2667 }
 0x838   : > { %v1913_v35 = vsel %vm420_vm2, %v2668_v34, 0.0 }
 0x839   : > { %1914 = vadd.xlane.f32.xlu0 %v1913_v35 }
 0x83c   : > { %v1894_v36 = vpop.xlane.xlu1 %1893 }
 0x83d   : > { %v1902_v39 = vsub.f32 %v1886_v17, %v1894_v36 }
 0x83f   : > { %v2670_v40 = vpop.eup %2669  ;;  %v1907_v41 = vmul.f32 1.442695, %v1902_v39 }
 0x840   : > { %v1919_v42 = vsel %vm420_vm2, %v2670_v40, 0.0  ;;  %v1938_v43 = vpop.permute.xlu1 %1937 }
 0x841   : > { %2671 = vpow2.f32 %v1907_v41  ;;  %1920 = vadd.xlane.f32.xlu0 %v1919_v42  ;;  %v1943_v6 = vand.u32 %v1938_v43, %v2814_v63 }
 0x843   : > { %2567 = vmatpush3.bf16.msra.mxu0 %v1943_v6 }
 0x844   : > { %v1900_v46 = vpop.xlane.xlu0 %1899  ;;  %2578 = vmatprep.subr.bf16.mxu0 %v2691_v0 }
 0x845   : > { %v1904_v15 = vsub.f32 %v1888_v23, %v1900_v46 }
 0x847   : > { %v1911_v49 = vmul.f32 1.442695, %v1904_v15 }
 0x849   : > { %2673 = vpow2.f32 %v1911_v49 }
 0x84b   : > { %v2672_v1 = vpop.eup %2671 }
 0x84c   : > { %v1916_v51 = vsel %vm420_vm2, %v2672_v1, 0.0 }
 0x84d   : > { %1917 = vadd.xlane.f32.xlu1 %v1916_v51 }
 0x853   : > { %v3128_v52 = vpop.eup %2673 }
 0x854   : > { %v1922_v54 = vsel %vm420_vm2, %v3128_v52, 0.0 }
 0x855   : > { %1923 = vadd.xlane.f32.xlu0 %v1922_v54 }
 0x85e   : > { %2033 = vrot.lane.b32.xlu1 %v2938_v47, %s2696_s30  ;;  %v2324_v47 = vpack.c.bf16 %v3027_v56, %v3027_v56 }
 0x862   : > { %2081 = vrot.lane.b32.xlu1 %v2950_v44, %s2696_s30  ;;  %v2327_v44 = vpack.c.bf16 %v3113_v58, %v3113_v58 }
 0x866   : > { %1173 = vrot.lane.b32.xlu1 %v2322_v55, %s2697_s4 }
 0x86a   : > { %1175 = vrot.lane.b32.xlu1 %v2323_v20, %s2697_s4 }
 0x86b   : > { %1985 = vrot.lane.b32.xlu0 %v2944_v48, %s2696_s30  ;;  %v2329_v48 = vpack.c.bf16 %v3116_v2, %v3116_v2 }
 0x86e   : > { %1179 = vrot.lane.b32.xlu1 %v2325_v57, %s2697_s4 }
 0x86f   : > { %1177 = vrot.lane.b32.xlu0 %v2324_v47, %s2697_s4 }
 0x872   : > { %1661 = vrot.lane.b32.xlu1 %v2327_v44, %s2698_s5 }
 0x873   : > { %1659 = vrot.lane.b32.xlu0 %v2326_v53, %s2698_s5 }
 0x876   : > { %1665 = vrot.lane.b32.xlu1 %v2329_v48, %s2698_s5 }
 0x877   : > { %1663 = vrot.lane.b32.xlu0 %v2328_v11, %s2698_s5 }
 0x8c6   : > { %v1915_v56 = vpop.xlane.xlu0 %1914 }
 0x8c7   : > { %2675 = vrcp.f32 %v1915_v56 }
 0x8ce   : > { %v1921_v22 = vpop.xlane.xlu0 %1920 }
 0x8cf   : > { %2677 = vrcp.f32 %v1921_v22 }
 0x8d1   : > { %v2676_v59 = vpop.eup %2675 }
 0x8d2   : > { %v1929_v58 = vmul.f32 %v2676_v59, %v2668_v34 }
 0x8d4   : > { %v1933_v60 = vpack.c.bf16 %v1929_v58, %v1929_v58 }
 0x8d6   : > { %2569 = vmatmul.mubr.msk.bf16.vlgmr.msra.gmra.mrb[56].mxu0 %vm469_vm5, %v1933_v60 }
 0x8d7   : > { %2580 = vmatprep.mubr.msk.bf16.mxu0 %vm2692_vm0, %v2691_v0 }
 0x8d9   : > { %v2678_v3 = vpop.eup %2677 }
 0x8da   : > { %v1918_v45 = vpop.xlane.xlu1 %1917  ;;  %v1931_v7 = vmul.f32 %v2678_v3, %v2670_v40 }
 0x8db   : > { %2679 = vrcp.f32 %v1918_v45 }
 0x8dc   : > { %v1935_v16 = vpack.c.bf16 %v1931_v7, %v1931_v7 }
 0x8de   : > { %v2034_v50 = vpop.permute.xlu1 %2033 }
 0x8df   : > { %v2039_v8 = vand.u32 %v2034_v50, %v2814_v63 }
 0x8e1   : > { %2579 = vmatpush3.bf16.msra.mxu0 %v2039_v8 }
 0x8e2   : > { %v2082_v13 = vpop.permute.xlu1 %2081  ;;  %v1924_v14 = vpop.xlane.xlu0 %1923 }
 0x8e3   : > { %2681 = vrcp.f32 %v1924_v14  ;;  %v2087_v17 = vand.u32 %v2082_v13, %v2814_v63 }
 0x8e4   : > { %2581 = vmatmul.mubr.msk.bf16.vlgmr.msra.gmra.mrb[60].mxu0 %vm469_vm5, %v1935_v16 }
 0x8e5   : > { %v2680_v2 = vpop.eup %2679 }
 0x8e6   : > { %v1930_v62 = vmul.f32 %v2680_v2, %v2672_v1  ;;  %v1174_v10 = vpop.permute.xlu1 %1173  ;;  %v1986_v61 = vpop.permute.xlu0 %1985 }
 0x8e7   : > { %v1188_v12 = vsel %vm3160_vm10, %v1174_v10, %v1187_v5  ;;  %v1991_v4 = vand.u32 %v1986_v61, %v2814_v63 }
 0x8e8   : > { %1189 = vst [vmem:[%s2906_s28] sm:$0x7] %v1188_v12  ;;  %v1934_v38 = vpack.c.bf16 %v1930_v62, %v1930_v62 }
 0x8e9   : > { %2573 = vmatpush3.bf16.msra.mxu1 %v1991_v4 }
 0x8ea   : > { %2584 = vmatprep.subr.bf16.mxu1 %v2691_v0  ;;  %v1176_v21 = vpop.permute.xlu1 %1175  ;;  %v1178_v25 = vpop.permute.xlu0 %1177 }
 0x8eb   : > { %v1191_v63 = vsel %vm3160_vm10, %v1176_v21, %v1190_v19 }
 0x8ec   : > { %2575 = vmatmul.mubr.msk.bf16.vlgmr.msra.gmra.mrb[56].mxu1 %vm469_vm5, %v1934_v38  ;;  %1192 = vst [vmem:[%s2906_s28 + $0x4] sm:$0x7] %v1191_v63 }
 0x8ed   : > { %v2682_v9 = vpop.eup %2681  ;;  %2585 = vmatpush3.bf16.msra.mxu1 %v2087_v17  ;;  %2586 = vmatprep.mubr.msk.bf16.mxu1 %vm2692_vm0, %v2691_v0  ;;  %v1194_v0 = vsel %vm3160_vm10, %v1178_v25, %v1193_v24 }
 0x8ee   : > { %v1932_v18 = vmul.f32 %v2682_v9, %v3128_v52  ;;  %1195 = vst [vmem:[%s2906_s28 + $0x8] sm:$0x7] %v1194_v0  ;;  %v1180_v26 = vpop.permute.xlu1 %1179  ;;  %v1660_v31 = vpop.permute.xlu0 %1659 }
 0x8ef   : > { %v1197_v28 = vsel %vm3160_vm10, %v1180_v26, %v1196_v27  ;;  %v1673_v30 = vld [vmem:[%s2906_s28] sm:$0x7] }
 0x8f0   : > { %v1936_v23 = vpack.c.bf16 %v1932_v18, %v1932_v18  ;;  %1198 = vst [vmem:[%s2906_s28 + $0xc] sm:$0x7] %v1197_v28  ;;  %v1674_v32 = vsel %vm3189_vm12, %v1660_v31, %v1673_v30 }
 0x8f1   : > { %1675 = vst [vmem:[%s2906_s28] sm:$0x7] %v1674_v32 }
 0x8f2   : > { %v1662_v33 = vpop.permute.xlu1 %1661  ;;  %v1664_v39 = vpop.permute.xlu0 %1663 }
 0x8f3   : > { %v1676_v34 = vld [vmem:[%s2906_s28 + $0x4] sm:$0x7] }
 0x8f4   : > { %2587 = vmatmul.mubr.msk.bf16.vlgmr.msra.gmra.mrb[60].mxu1 %vm469_vm5, %v1936_v23  ;;  %v1677_v35 = vsel %vm3189_vm12, %v1662_v33, %v1676_v34 }
 0x8f5   : > { %1678 = vst [vmem:[%s2906_s28 + $0x4] sm:$0x7] %v1677_v35  ;;  %v1679_v36 = vld [vmem:[%s2906_s28 + $0x8] sm:$0x7] }
 0x8f6   : > { %v1680_v40 = vsel %vm3189_vm12, %v1664_v39, %v1679_v36  ;;  %v1666_v41 = vpop.permute.xlu1 %1665 }
 0x8f7   : > { %1681 = vst [vmem:[%s2906_s28 + $0x8] sm:$0x7] %v1680_v40  ;;  %v1682_v42 = vld [vmem:[%s2906_s28 + $0xc] sm:$0x7] }
 0x8f8   : > { %v1683_v43 = vsel %vm3189_vm12, %v1666_v41, %v1682_v42  ;;  %v2159_v45 = vld [vmem:[%s2906_s28] sm:$0x7] }
 0x8f9   : > { %1684 = vst [vmem:[%s2906_s28 + $0xc] sm:$0x7] %v1683_v43 }
 0x8fc   : > { %v2162_v8 = vld [vmem:[%s2906_s28 + $0x4] sm:$0x7] }
 0x8fe   : > { %v2165_v16 = vld [vmem:[%s2906_s28 + $0x8] sm:$0x7] }
 0x900   : > { %v2168_v62 = vld [vmem:[%s2906_s28 + $0xc] sm:$0x7] }
 0x9a9   : > { %v1979_v6 = vpop.f32.mrb[56].mxu0 }
 0x9aa   : > { %v2330_v46 = vpack.c.bf16 %v1979_v6, %v1979_v6  ;;  %v2570_v15 = vpop.f32.mrb[57].mxu0 }
 0x9ab   : > { %v1982_v49 = vpop.f32.mrb[58].mxu0 }
 0x9ac   : > { %2145 = vrot.lane.b32.xlu0 %v2330_v46, %s2699_s6  ;;  %v2571_v1 = vpop.f32.mrb[59].mxu0 }
 0x9b7   : > { %v2075_v51 = vpop.f32.mrb[60].mxu0 }
 0x9b8   : > { %v2332_v52 = vpack.c.bf16 %v2075_v51, %v2075_v51  ;;  %v2582_v54 = vpop.f32.mrb[61].mxu0 }
 0x9b9   : > { %v2078_v55 = vpop.f32.mrb[62].mxu0 }
 0x9ba   : > { %2149 = vrot.lane.b32.xlu0 %v2332_v52, %s2699_s6  ;;  %v2583_v20 = vpop.f32.mrb[63].mxu0 }
 0x9bf   : > { %v2027_v57 = vpop.f32.mrb[56].mxu1 }
 0x9c0   : > { %v2331_v47 = vpack.c.bf16 %v2027_v57, %v2027_v57  ;;  %v2576_v44 = vpop.f32.mrb[57].mxu1 }
 0x9c1   : > { %v2030_v53 = vpop.f32.mrb[58].mxu1 }
 0x9c2   : > { %2147 = vrot.lane.b32.xlu1 %v2331_v47, %s2699_s6  ;;  %v2577_v48 = vpop.f32.mrb[59].mxu1 }
 0x9c7   : > { %v2123_v11 = vpop.f32.mrb[60].mxu1 }
 0x9c8   : > { %v2333_v56 = vpack.c.bf16 %v2123_v11, %v2123_v11  ;;  %v2588_v22 = vpop.f32.mrb[61].mxu1 }
 0x9c9   : > { %v2126_v59 = vpop.f32.mrb[62].mxu1 }
 0x9ca   : > { %2151 = vrot.lane.b32.xlu1 %v2333_v56, %s2699_s6  ;;  %v2589_v58 = vpop.f32.mrb[63].mxu1 }
 0xa1e   : > { %v2146_v3 = vpop.permute.xlu0 %2145 }
 0xa1f   : > { %v2160_v7 = vsel %vm3210_vm14, %v2146_v3, %v2159_v45 }
 0xa20   : > { %2161 = vst [vmem:[%s2906_s28] sm:$0x7] %v2160_v7 }
 0xa2c   : > { %v2150_v14 = vpop.permute.xlu0 %2149 }
 0xa2d   : > { %v2166_v37 = vsel %vm3210_vm14, %v2150_v14, %v2165_v16 }
 0xa2e   : > { %2167 = vst [vmem:[%s2906_s28 + $0x8] sm:$0x7] %v2166_v37 }
 0xa34   : > { %v2148_v50 = vpop.permute.xlu1 %2147 }
 0xa35   : > { %v2163_v13 = vsel %vm3210_vm14, %v2148_v50, %v2162_v8 }
 0xa36   : > { %2164 = vst [vmem:[%s2906_s28 + $0x4] sm:$0x7] %v2163_v13 }
 0xa3c   : > { %v2152_v2 = vpop.permute.xlu1 %2151 }
 0xa3d   : > { %v2169_v5 = vsel %vm3210_vm14, %v2152_v2, %v2168_v62 }
 0xa3e   : > { %2170 = vst [vmem:[%s2906_s28 + $0xc] sm:$0x7] %v2169_v5 }
 0xa3f PF: > { %s13_s12 = sadd.s32 1, %s2689_s12  }
 0xa40   : > { %p10_p4 = scmp.ge.s32.totalorder %s13_s12, 4  }
 0xa42   :  { %12 = sbr.rel (!%p10_p4) target bundleno = 1 (0x1), region = 68 }

// kernel: timesformer_forward.23
= control target key start
LH: loop header
LB: loop body
LE: loop exit
PB: predicated region body
PF: predicated region fallthrough
CT: control target
= control target key end

     0   :  { %s1218_s24 = smov 0   ;;  %s1220_s25 = smov 0   ;;  %s1390_s0 = inlined_call_operand.vmem [shape: bf16[34,32], index: 0, kind: input, shape index: {}]   ;;  %s1391_s1 = inlined_call_operand.vmem [shape: f32[1,32], index: 1, kind: input, shape index: {}]   ;;  %s1392_s2 = inlined_call_operand.vmem [shape: f32[1,32], index: 2, kind: input, shape index: {}]   ;;  %s1393_s3 = inlined_call_operand.vmem [shape: bf16[32,128], index: 3, kind: input, shape index: {}]   ;;  %s1394_s4 = inlined_call_operand.vmem [shape: f32[1,128], index: 4, kind: input, shape index: {}]   ;;  %s1395_s5 = inlined_call_operand.vmem [shape: bf16[128,32], index: 5, kind: input, shape index: {}]   ;;  %s1396_s6 = inlined_call_operand.vmem [shape: f32[1,32], index: 6, kind: input, shape index: {}]   ;;  %s1397_s7 = inlined_call_operand.vmem [shape: bf16[34,32], index: 7, kind: output, shape index: {}]  }
   0x1   :  { %s1222_s26 = smov 0  }
   0x2 LB: > { %s1231_s27 = sadd.s32 4294967295, %s1144_s26   ;;  %s1233_s28 = sadd.s32 1, %s1144_s26   ;;  %s1144_s26 = sphi %s1222_s26, %s1404_s26   ;;  %s1140_s25 = sphi %s1220_s25, %s1403_s25   ;;  %s1136_s24 = sphi %s1218_s24, %s1402_s24  }
   0x3   : > { %s173_s29 = ssub.s32 %s1144_s26, %s1233_s28  ;;  %s176_s30 = sadd.s32 1, %s1140_s25 }
   0x4   : > { %p174_p0 = scmp.eq.s32.totalorder %s173_s29, 0  ;;  %p186_p1 = scmp.ne.s32.totalorder %s1140_s25, %s1136_s24 }
   0x5   : > { %p187_p2 = scmp.eq.s32.totalorder %s1231_s27, 1  ;;  %p877_p3 = scmp.ge.s32.totalorder %s1144_s26, 1 }
   0x6   : > { %s1241_s8 = scalar_select %p174_p0, %s1140_s25, %s176_s30  }
   0x7   : > { %p1243_p4 = por %p187_p2, %p186_p1  ;;  %p246_p5 = scmp.lt.s32.totalorder %s1144_s26, 3 }
   0x9   : > { %p247_p6 = pnand %p877_p3, %p246_p5 }
   0xa   : > { %s1248_s10 = sshll.u32 (!%p247_p6), %s1231_s27, 2  ;;  %vm311_vm0 = vcmask (!%p247_p6), 261120   ;;  %v1064_v30 = vld [vmem:[%s1393_s3] sm:$0xff] (!%p247_p6)   ;;  %v1065_v31 = vld [vmem:[%s1393_s3 + $0x8] sm:$0xff] (!%p247_p6)   ;;  %s278_s30 = sand.u32 (!%p247_p6), 1, %s1136_s24   ;;  %vm643_vm1 = vcmask (!%p247_p6), 257024  }
   0xb   : > { %250 = sbr.rel (%p247_p6) target bundleno = 870 (0x366), region = 48  ;;  %p286_p7 = scmp.lt.s32.totalorder (!%p247_p6), %s1248_s10, 4  ;;  %948 = vmatprep.subr.bf16.mxu0 (!%p247_p6), %v1064_v30  ;;  %v881_v46 = vld [vmem:[%s1391_s1] ss:$0 sm:$0xff] (!%p247_p6) }
   0xc   : > { %949 = vmatpush3.bf16.msra.mxu0 (!%p247_p6), %v1064_v30  ;;  %v882_v52 = vld [vmem:[%s1392_s2] ss:$0 sm:$0xff] (!%p247_p6)  ;;  %s878_s13 = sshll.u32 (!%p247_p6), %s278_s30, 4 }
   0xd   : > { %950 = vmatprep.subr.bf16.mxu0 (!%p247_p6), %v1065_v31  ;;  %s1328_s24 = scalar_lea.vmem (!%p247_p6), [#allocation2], %s878_s13  }
  0x10   : > { %951 = vmatpush3.bf16.msra.mxu0 (!%p247_p6), %v1065_v31 }
  0x12   : > { %s287_s11 = scalar_select %p286_p7, %s1248_s10, 4 }
  0x13   : > { %s656_s14 = ssub.s32 (%p1243_p4), 5, %s1248_s10 }
  0x14   : > { %s880_s12 = sshll.u32 %s287_s11, 2  ;;  %p657_p8 = scmp.lt.s32.totalorder (%p1243_p4), %s656_s14, 4 }
  0x15   : > { %s289_s15 = scalar_lea.vmem %s1390_s0, %s880_s12 }
  0x16   : > { %v926_v0 = vld [vmem:[%s289_s15] sm:$0xff]   ;;  %v933_v1 = vld [vmem:[%s289_s15 + $0x8] sm:$0xff]   ;;  %s922_s15 = sshll.u32 (%p1243_p4), %s1231_s27, 4 }
  0x17   : > { %v1255_v2 = vunpack.c.l.bf16 %v926_v0  ;;  %v1257_v3 = vunpack.c.l.bf16 %v933_v1  ;;  %v1259_v4 = vunpack.c.h.bf16 %v926_v0  ;;  %v1261_v5 = vunpack.c.h.bf16 %v933_v1  ;;  %v1066_v0 = vld [vmem:[%s1395_s5] sm:$0xff]   ;;  %v1067_v1 = vld [vmem:[%s1395_s5 + $0x8] sm:$0xff]   ;;  %s1341_s18 = scalar_lea.vmem (%p1243_p4), %s1397_s7, %s922_s15  }
  0x18   : > { %956 = vmatprep.subr.bf16.mxu1 %v1066_v0 }
  0x19   : > { %v312_v6 = vsel %vm311_vm0, %v1255_v2, 0.0  ;;  %v318_v7 = vsel %vm311_vm0, %v1257_v3, 0.0  ;;  %v315_v8 = vsel %vm311_vm0, %v1259_v4, 0.0  ;;  %v321_v9 = vsel %vm311_vm0, %v1261_v5, 0.0  ;;  %957 = vmatpush3.bf16.msra.mxu1 %v1066_v0 }
  0x1a   : > { %313 = vadd.xlane.f32.xlu0 %v312_v6  ;;  %319 = vadd.xlane.f32.xlu1 %v318_v7  ;;  %v1068_v6 = vld [vmem:[%s1395_s5 + $0x10] sm:$0xff]   ;;  %v1069_v7 = vld [vmem:[%s1395_s5 + $0x18] sm:$0xff]  }
  0x1b   : > { %958 = vmatprep.subr.bf16.mxu1 %v1067_v1 }
  0x1d   : > { %959 = vmatpush3.bf16.msra.mxu1 %v1067_v1 }
  0x1e   : > { %316 = vadd.xlane.f32.xlu0 %v315_v8  ;;  %322 = vadd.xlane.f32.xlu1 %v321_v9  ;;  %v1070_v8 = vld [vmem:[%s1395_s5 + $0x20] sm:$0xff]   ;;  %v1071_v9 = vld [vmem:[%s1395_s5 + $0x28] sm:$0xff]  }
  0x1f   : > { %960 = vmatprep.subr.bf16.mxu1 %v1068_v6 }
  0x21   : > { %961 = vmatpush3.bf16.msra.mxu1 %v1068_v6 }
  0x22   : > { %962 = vmatprep.subr.bf16.mxu1 %v1069_v7 }
  0x25   : > { %963 = vmatpush3.bf16.msra.mxu1 %v1069_v7 }
  0x26   : > { %964 = vmatprep.subr.bf16.mxu1 %v1070_v8 }
  0x29   : > { %965 = vmatpush3.bf16.msra.mxu1 %v1070_v8 }
  0x2a   : > { %966 = vmatprep.subr.bf16.mxu1 %v1071_v9 }
  0x2d   : > { %967 = vmatpush3.bf16.msra.mxu1 %v1071_v9 }
  0xa7   : > { %v314_v10 = vpop.xlane.xlu0 %313  ;;  %v320_v11 = vpop.xlane.xlu1 %319 }
  0xa8   : > { %v325_v12 = vmul.f32 0.03125, %v314_v10  ;;  %v327_v13 = vmul.f32 0.03125, %v320_v11  ;;  %v1072_v10 = vld [vmem:[%s1395_s5 + $0x30] sm:$0xff]   ;;  %v1073_v11 = vld [vmem:[%s1395_s5 + $0x38] sm:$0xff]  }
  0xa9   : > { %968 = vmatprep.subr.bf16.mxu1 %v1072_v10 }
  0xaa   : > { %v329_v14 = vsub.f32 %v1255_v2, %v325_v12  ;;  %v331_v15 = vsub.f32 %v1257_v3, %v327_v13  ;;  %969 = vmatpush3.bf16.msra.mxu1 %v1072_v10  ;;  %v883_v12 = vld [vmem:[%s1394_s4] ss:$0 sm:$0xff] }
  0xab   : > { %v317_v16 = vpop.xlane.xlu0 %316  ;;  %v323_v17 = vpop.xlane.xlu1 %322  ;;  %970 = vmatprep.subr.bf16.mxu1 %v1073_v11 }
  0xac   : > { %v326_v18 = vmul.f32 0.03125, %v317_v16  ;;  %v328_v19 = vmul.f32 0.03125, %v323_v17  ;;  %v333_v20 = vmul.f32 %v329_v14, %v329_v14  ;;  %v335_v21 = vmul.f32 %v331_v15, %v331_v15 }
  0xae   : > { %v330_v22 = vsub.f32 %v1259_v4, %v326_v18  ;;  %v332_v23 = vsub.f32 %v1261_v5, %v328_v19  ;;  %v337_v24 = vsel %vm311_vm0, %v333_v20, 0.0  ;;  %v343_v25 = vsel %vm311_vm0, %v335_v21, 0.0  ;;  %971 = vmatpush3.bf16.msra.mxu1 %v1073_v11 }
  0xaf   : > { %338 = vadd.xlane.f32.xlu0 %v337_v24 }
  0xb0   : > { %v334_v26 = vmul.f32 %v330_v22, %v330_v22  ;;  %v336_v27 = vmul.f32 %v332_v23, %v332_v23 }
  0xb2   : > { %v340_v28 = vsel %vm311_vm0, %v334_v26, 0.0  ;;  %v346_v29 = vsel %vm311_vm0, %v336_v27, 0.0 }
  0xb3   : > { %344 = vadd.xlane.f32.xlu0 %v343_v25  ;;  %341 = vadd.xlane.f32.xlu1 %v340_v28 }
  0xb7   : > { %347 = vadd.xlane.f32.xlu1 %v346_v29 }
 0x13c   : > { %v339_v32 = vpop.xlane.xlu0 %338 }
 0x13d   : > { %v349_v33 = vmul.f32 0.03125, %v339_v32 }
 0x13f   : > { %v353_v34 = vadd.f32 1e-05, %v349_v33 }
 0x140   : > { %v342_v35 = vpop.xlane.xlu1 %341  ;;  %v345_v36 = vpop.xlane.xlu0 %344 }
 0x141   : > { %1074 = vrsqrt.f32 %v353_v34  ;;  %v350_v37 = vmul.f32 0.03125, %v342_v35  ;;  %v351_v38 = vmul.f32 0.03125, %v345_v36 }
 0x143   : > { %v354_v39 = vadd.f32 1e-05, %v350_v37  ;;  %v355_v40 = vadd.f32 1e-05, %v351_v38 }
 0x144   : > { %v348_v41 = vpop.xlane.xlu1 %347 }
 0x145   : > { %1076 = vrsqrt.f32 %v354_v39  ;;  %v352_v42 = vmul.f32 0.03125, %v348_v41 }
 0x146   : > { %1078 = vrsqrt.f32 %v355_v40 }
 0x147   : > { %v356_v43 = vadd.f32 1e-05, %v352_v42 }
 0x149   : > { %1080 = vrsqrt.f32 %v356_v43 }
 0x14b   : > { %v1075_v44 = vpop.eup %1074 }
 0x14c   : > { %v361_v45 = vmul.f32 %v1075_v44, %v329_v14 }
 0x14e   : > { %v371_v50 = vmul.f32 %v881_v46, %v361_v45 }
 0x14f   : > { %v1077_v47 = vpop.eup %1076 }
 0x150   : > { %v1079_v48 = vpop.eup %1078  ;;  %v362_v49 = vmul.f32 %v1077_v47, %v330_v22  ;;  %v381_v56 = vadd.f32 %v882_v52, %v371_v50 }
 0x151   : > { %v363_v51 = vmul.f32 %v1079_v48, %v331_v15 }
 0x152   : > { %v372_v53 = vmul.f32 %v881_v46, %v362_v49 }
 0x153   : > { %v1081_v54 = vpop.eup %1080  ;;  %v373_v58 = vmul.f32 %v881_v46, %v363_v51 }
 0x154   : > { %v364_v55 = vmul.f32 %v1081_v54, %v332_v23  ;;  %v382_v57 = vadd.f32 %v882_v52, %v372_v53 }
 0x155   : > { %v383_v61 = vadd.f32 %v882_v52, %v373_v58 }
 0x156   : > { %v385_v59 = vpack.c.bf16 %v382_v57, %v381_v56  ;;  %v374_v60 = vmul.f32 %v881_v46, %v364_v55 }
 0x158   : > { %952 = vmatprep.mubr.msk.bf16.mxu0 %vm311_vm0, %v385_v59  ;;  %v384_v62 = vadd.f32 %v882_v52, %v374_v60  ;;  %v888_v59 = vld [vmem:[%s1396_s6] ss:$0 sm:$0xff] }
 0x15a   : > { %v386_v63 = vpack.c.bf16 %v384_v62, %v383_v61 }
 0x15c   : > { %953 = vmatmul.mubr.msk.bf16.vlgmr.msra.gmra.mrb[0].mxu0 %vm311_vm0, %v386_v63 }
 0x22f   : > { %v954_v13 = vpop.f32.mrb[0].mxu0 }
 0x230   : > { %v459_v14 = vadd.f32 %v954_v13, %v883_v12  ;;  %v450_v15 = vpop.f32.mrb[1].mxu0 }
 0x231   : > { %v451_v16 = vadd.f32 %v883_v12, %v450_v15  ;;  %v955_v17 = vpop.f32.mrb[2].mxu0 }
 0x232   : > { %v467_v18 = vmul.f32 %v459_v14, %v459_v14  ;;  %v462_v19 = vadd.f32 %v955_v17, %v883_v12  ;;  %v453_v20 = vpop.f32.mrb[3].mxu0 }
 0x233   : > { %v465_v21 = vmul.f32 %v451_v16, %v451_v16  ;;  %v454_v22 = vadd.f32 %v883_v12, %v453_v20 }
 0x234   : > { %v471_v23 = vmul.f32 %v467_v18, %v459_v14  ;;  %v468_v24 = vmul.f32 %v462_v19, %v462_v19 }
 0x235   : > { %v469_v25 = vmul.f32 %v465_v21, %v451_v16  ;;  %v466_v26 = vmul.f32 %v454_v22, %v454_v22 }
 0x236   : > { %v475_v27 = vmul.f32 0.044715, %v471_v23  ;;  %v472_v28 = vmul.f32 %v468_v24, %v462_v19 }
 0x237   : > { %v473_v29 = vmul.f32 0.044715, %v469_v25  ;;  %v470_v30 = vmul.f32 %v466_v26, %v454_v22 }
 0x238   : > { %v479_v31 = vadd.f32 %v475_v27, %v459_v14  ;;  %v476_v32 = vmul.f32 0.044715, %v472_v28 }
 0x239   : > { %v474_v33 = vmul.f32 0.044715, %v470_v30  ;;  %v477_v34 = vadd.f32 %v473_v29, %v451_v16 }
 0x23a   : > { %v483_v35 = vmul.f32 0.7978846, %v479_v31  ;;  %v480_v36 = vadd.f32 %v476_v32, %v462_v19 }
 0x23b   : > { %v478_v37 = vadd.f32 %v474_v33, %v454_v22  ;;  %v481_v38 = vmul.f32 0.7978846, %v477_v34 }
 0x23c   : > { %1082 = vtanh.f32 %v483_v35  ;;  %v484_v39 = vmul.f32 0.7978846, %v480_v36 }
 0x23d   : > { %v482_v40 = vmul.f32 0.7978846, %v478_v37  ;;  %1084 = vtanh.f32 %v481_v38 }
 0x23e   : > { %1086 = vtanh.f32 %v484_v39 }
 0x23f   : > { %1088 = vtanh.f32 %v482_v40 }
 0x246   : > { %v1083_v41 = vpop.eup %1082 }
 0x247   : > { %v1085_v42 = vpop.eup %1084  ;;  %v491_v43 = vadd.f32 1.0, %v1083_v41 }
 0x248   : > { %v1087_v44 = vpop.eup %1086  ;;  %v489_v45 = vadd.f32 1.0, %v1085_v42 }
 0x249   : > { %v1089_v46 = vpop.eup %1088  ;;  %v492_v47 = vadd.f32 1.0, %v1087_v44  ;;  %v495_v48 = vmul.f32 0.5, %v491_v43 }
 0x24a   : > { %v490_v49 = vadd.f32 1.0, %v1089_v46  ;;  %v493_v50 = vmul.f32 0.5, %v489_v45 }
 0x24b   : > { %v496_v51 = vmul.f32 0.5, %v492_v47  ;;  %v499_v53 = vmul.f32 %v495_v48, %v459_v14 }
 0x24c   : > { %v494_v52 = vmul.f32 0.5, %v490_v49  ;;  %v497_v55 = vmul.f32 %v493_v50, %v451_v16 }
 0x24d   : > { %v500_v54 = vmul.f32 %v496_v51, %v462_v19 }
 0x24e   : > { %v498_v56 = vmul.f32 %v494_v52, %v454_v22 }
 0x24f   : > { %v502_v57 = vpack.c.bf16 %v500_v54, %v499_v53 }
 0x250   : > { %v501_v58 = vpack.c.bf16 %v498_v56, %v497_v55 }
 0x252   : > { %972 = vmatprep.mubr.bf16.mxu1 %v501_v58 }
 0x253   : > { %973 = vmatmul.mubr.bf16.vlgmr.msra.gmra.mrb[0].mxu1 %v502_v57 }
 0x326   : > { %v974_v60 = vpop.f32.mrb[0].mxu1 }
 0x327   : > { %v617_v61 = vadd.f32 %v974_v60, %v888_v59  ;;  %v608_v62 = vpop.f32.mrb[1].mxu1 }
 0x328   : > { %v609_v63 = vadd.f32 %v888_v59, %v608_v62  ;;  %v975_v0 = vpop.f32.mrb[2].mxu1 }
 0x329   : > { %v625_v1 = vadd.f32 %v1257_v3, %v617_v61  ;;  %v620_v6 = vadd.f32 %v975_v0, %v888_v59  ;;  %v611_v7 = vpop.f32.mrb[3].mxu1 }
 0x32a   : > { %v623_v8 = vadd.f32 %v1255_v2, %v609_v63  ;;  %v612_v9 = vadd.f32 %v888_v59, %v611_v7  ;;  %654 = sbr.rel (!%p1243_p4) target bundleno = 870 (0x366), region = 52 }
 0x32b   : > { %v920_v10 = vpack.c.bf16 %v625_v1, %v625_v1  ;;  %v626_v11 = vadd.f32 %v1261_v5, %v620_v6 }
 0x32c   : > { %v918_v12 = vpack.c.bf16 %v623_v8, %v623_v8  ;;  %v624_v13 = vadd.f32 %v1259_v4, %v612_v9 }
 0x32d   : > { %646 = vst.msk [vmem:[%s1328_s24 + $0x8] sm:$0xf] %vm643_vm1, %v920_v10  ;;  %v921_v3 = vpack.c.bf16 %v626_v11, %v626_v11 }
 0x32e   : > { %644 = vst.msk [vmem:[%s1328_s24] sm:$0xf] %vm643_vm1, %v918_v12  ;;  %v919_v14 = vpack.c.bf16 %v624_v13, %v624_v13 }
 0x32f   : > { %647 = vst.msk [vmem:[%s1328_s24 + $0xc] sm:$0xf] %vm643_vm1, %v921_v3 }
 0x330   : > { %645 = vst.msk [vmem:[%s1328_s24 + $0x4] sm:$0xf] %vm643_vm1, %v919_v14 }
 0x331   : > { %s1406_s14 = smov (!%p657_p8, %s656_s14), 4 }
 0x332   : > { %s903_s19 = sshll.u32 %s1406_s14, 6 }
 0x333   : > { %p906_p9 = scmp.eq.s32.totalorder %s903_s19, 0 }
 0x334   : > { %s1347_s20 = sshrl.u32 (!%p906_p9), %s1406_s14, 2 }
 0x335   : > { %665 = sbr.rel (%p906_p9) target bundleno = 870 (0x366), region = 56  ;;  %p907_p10 = scmp.le.s32.totalorder (!%p906_p9), %s1347_s20, 0 }
 0x33c   : > { %830 = sbr.rel (%p907_p10) target bundleno = 849 (0x351), region = 128  ;;  %s1399_s27 = smov (!%p907_p10), %s1341_s18 }
 0x33d   : > { %s1400_s9 = smov (!%p907_p10), %s1328_s24  ;;  %s1356_s10 = smov (!%p907_p10), 0  }
 0x33e   : > { %s1158_s21 = smov (!%p907_p10), 0  }
 0x343 LB: >> { %v681_v2 = vld [vmem:[%s1152_s9] sm:$0xf]  ;;  %v683_v4 = vld [vmem:[%s1152_s9 + $0x4] sm:$0xf]  ;;  %v685_v5 = vld [vmem:[%s1152_s9 + $0x8] sm:$0xf]  ;;  %s1160_s21 = sphi %s1158_s21, %s675_s21   ;;  %s1156_s10 = sphi %s1356_s10, %s1401_s10   ;;  %s1152_s9 = sphi %s1400_s9, %s694_s9   ;;  %s1148_s27 = sphi %s1399_s27, %s695_s27  }
 0x344   : >> { %682 = vst [vmem:[%s1148_s27] sm:$0xf] %v681_v2  ;;  %684 = vst [vmem:[%s1148_s27 + $0x4] sm:$0xf] %v683_v4  ;;  %v687_v15 = vld [vmem:[%s1152_s9 + $0xc] sm:$0xf]  ;;  %s689_s22 = sadd.s32 1, %s1156_s10 }
 0x345   : >> { %686 = vst [vmem:[%s1148_s27 + $0x8] sm:$0xf] %v685_v5  ;;  %688 = vst [vmem:[%s1148_s27 + $0xc] sm:$0xf] %v687_v15  ;;  %p690_p11 = scmp.ge.s32.totalorder %s689_s22, %s1347_s20  ;;  %s675_s21 = sadd.s32 1, %s1160_s21  }
 0x346   : >> { %p674_p12 = scmp.ge.s32.totalorder %s675_s21, %s1347_s20 }
 0x347   : >> { %s1408_s22 = smov (%p690_p11, %s689_s22), 0 }
 0x348   : >> { %s908_s23 = sshll.u32 %s1408_s22, 4  ;;  %s1401_s10 = smov %s1408_s22 }
 0x349   : >> { %s694_s9 = scalar_lea.vmem %s1328_s24, %s908_s23 [#allocation2]   ;;  %s695_s27 = scalar_lea.vmem %s1341_s18, %s908_s23  }
 0x34a   : > { %677 = sbr.rel (!%p674_p12) target bundleno = 835 (0x343), region = 134 }
 0x351 PF: > { %s1372_s26 = sand.u32 3, %s1406_s14   ;;  %s923_s29 = sshll.u32 %s1347_s20, 4 }
 0x352   : > { %s700_s30 = scalar_lea.vmem %s1328_s24, %s923_s29 [#allocation2]   ;;  %s702_s11 = scalar_lea.vmem %s1341_s18, %s923_s29  }
 0x353   : > { %p913_p13 = scmp.le.s32.totalorder %s1372_s26, 0 }
 0x354   : > { %s1162_s12 = smov (!%p913_p13), %s702_s11   ;;  %s1166_s13 = smov (!%p913_p13), %s700_s30  }
 0x355   : > { %844 = sbr.rel (%p913_p13) target bundleno = 870 (0x366), region = 139  ;;  %s1170_s15 = smov (!%p913_p13), 0  }
 0x356   : > { %s1174_s16 = smov (!%p913_p13), 0  }
 0x35c LB: >> { %v712_v16 = vld [vmem:[%s1168_s13] sm:$0xf]  ;;  %s714_s14 = sadd.s32 1, %s1172_s15  ;;  %s706_s16 = sadd.s32 1, %s1176_s16   ;;  %s1176_s16 = sphi %s1174_s16, %s706_s16   ;;  %s1172_s15 = sphi %s1170_s15, %s1171_s15   ;;  %s1168_s13 = sphi %s1166_s13, %s719_s13   ;;  %s1164_s12 = sphi %s1162_s12, %s720_s12  }
 0x35d   : >> { %713 = vst [vmem:[%s1164_s12] sm:$0xf] %v712_v16  ;;  %p715_p0 = scmp.ge.s32.totalorder %s714_s14, %s1372_s26  ;;  %p705_p1 = scmp.ge.s32.totalorder %s706_s16, %s1372_s26 }
 0x35f   : >> { %s1410_s14 = smov (%p715_p0, %s714_s14), 0  ;;  %708 = sbr.rel (!%p705_p1) target bundleno = 860 (0x35c), region = 145 }
 0x360   : >> { %s914_s24 = sshll.u32 %s1410_s14, 2  ;;  %s1171_s15 = smov %s1410_s14  }
 0x361   : >> { %s719_s13 = scalar_lea.vmem %s700_s30, %s914_s24 [#allocation2]   ;;  %s720_s12 = scalar_lea.vmem %s702_s11, %s914_s24  }
 0x366 PF: > { %p14_p2 = scmp.ge.s32.totalorder %s1233_s28, 4   ;;  %s1402_s24 = smov %s1140_s25 }
 0x367   : > { %s1403_s25 = smov %s1241_s8  ;;  %s1404_s26 = smov %s1233_s28 }
 0x368   :  { %16 = sbr.rel (!%p14_p2) target bundleno = 2 (0x2), region = 156 }

// kernel: timesformer_forward.31
= control target key start
LH: loop header
LB: loop body
LE: loop exit
PB: predicated region body
PF: predicated region fallthrough
CT: control target
= control target key end

     0   :  { %vm26_vm0 = vcmask 254976   ;;  %s250_s0 = inlined_call_operand.vmem [shape: bf16[2,32], index: 0, kind: input, shape index: {}]   ;;  %s251_s1 = inlined_call_operand.vmem [shape: f32[1,32], index: 1, kind: input, shape index: {}]   ;;  %s252_s2 = inlined_call_operand.vmem [shape: f32[1,32], index: 2, kind: input, shape index: {}]   ;;  %s253_s3 = inlined_call_operand.vmem [shape: bf16[32,8], index: 3, kind: input, shape index: {}]   ;;  %s254_s4 = inlined_call_operand.vmem [shape: f32[1,8], index: 4, kind: input, shape index: {}]   ;;  %s255_s5 = inlined_call_operand.hbm [shape: f32[2,8], index: 5, kind: output, shape index: {}]  }
   0x1   :  { %v22_v0 = vld [vmem:[%s250_s0] sm:$0x1] }
   0x2   :  { %v23_v1 = vunpack.c.l.bf16 %v22_v0 }
   0x3   :  { %10 = vsyncpa [#allocation3], 0  ;;  %v159_v8 = vld [vmem:[%s253_s3] sm:$0xff]   ;;  %v187_v9 = vmov 0.0   ;;  %v160_v10 = vld [vmem:[%s253_s3 + $0x8] sm:$0xff]   ;;  %vm188_vm1 = vmmov 0  }
   0x4   :  { %v27_v2 = vsel %vm26_vm0, %v23_v1, 0.0  ;;  %148 = vmatprep.subr.bf16.mxu0 %v187_v9  ;;  %152 = vmatprep.mubr.msk.bf16.mxu0 %vm188_vm1, %v187_v9  ;;  %v139_v15 = vld [vmem:[%s251_s1] ss:$0 sm:$0xff]  ;;  %vm79_vm2 = vcmask 261120   ;;  %s189_s28 = smov [#allocation2]   ;;  %vm123_vm3 = vcmask 58368  }
   0x5   :  { %28 = vadd.xlane.f32.xlu0 %v27_v2  ;;  %149 = vmatpush3.bf16.msra.mxu0 %v159_v8  ;;  %v140_v17 = vld [vmem:[%s252_s2] ss:$0 sm:$0xff]  ;;  %s131_s29 = sshll.u32 %s189_s28, 4  ;;  %s132_s29 = int_to_ptr.vmem [resolvable:$true] %s131_s29 }
   0x6   :  { %150 = vmatprep.subr.bf16.mxu0 %v187_v9  ;;  %v141_v21 = vld [vmem:[%s254_s4] ss:$0 sm:$0xff]  ;;  %s163_s1 = scalar_lea.vmem %s132_s29, 32  ;;  %p168_p1 = scmp.lt.s32.totalorder %s132_s29, %s132_s29 }
   0x7   :  { %p164_p0 = scmp.ne.s32.totalorder %s132_s29, %s163_s1  ;;  %p169_p2 = scmp.lt.s32.totalorder %s163_s1, %s163_s1 }
   0x9   :  { %151 = vmatpush3.bf16.msra.mxu0 %v160_v10  ;;  %p170_p3 = por %p169_p2, %p168_p1 }
   0xb   :  { %p171_p4 = pnand %p170_p3, %p164_p0 }
  0x92   :  { %v29_v3 = vpop.xlane.xlu0 %28 }
  0x93   :  { %v31_v4 = vmul.f32 0.03125, %v29_v3 }
  0x95   :  { %v32_v5 = vsub.f32 %v23_v1, %v31_v4 }
  0x97   :  { %v33_v6 = vmul.f32 %v32_v5, %v32_v5 }
  0x99   :  { %v34_v7 = vsel %vm26_vm0, %v33_v6, 0.0 }
  0x9a   :  { %35 = vadd.xlane.f32.xlu0 %v34_v7 }
 0x127   :  { %v36_v11 = vpop.xlane.xlu0 %35 }
 0x128   :  { %v37_v12 = vmul.f32 0.03125, %v36_v11 }
 0x12a   :  { %v38_v13 = vadd.f32 1e-05, %v37_v12 }
 0x12c   :  { %161 = vrsqrt.f32 %v38_v13 }
 0x136   :  { %v162_v14 = vpop.eup %161 }
 0x137   :  { %v40_v16 = vmul.f32 %v162_v14, %v32_v5 }
 0x139   :  { %v47_v18 = vmul.f32 %v139_v15, %v40_v16 }
 0x13b   :  { %v54_v19 = vadd.f32 %v140_v17, %v47_v18 }
 0x13d   :  { %v55_v20 = vpack.c.bf16 %v54_v19, %v54_v19 }
 0x13f   :  { %153 = vmatmul.mubr.msk.bf16.vlgmr.msra.gmra.mrb[0].mxu0 %vm79_vm2, %v55_v20 }
 0x212   :  { %v117_v22 = vpop.f32.mrb[0].mxu0 }
 0x213   :  { %v118_v23 = vadd.f32 %v141_v21, %v117_v22  ;;  %v154_v24 = vpop.f32.mrb[1].mxu0 }
 0x214   :  { %v120_v25 = vpop.f32.mrb[2].mxu0 }
 0x215   :  { %v155_v26 = vpop.f32.mrb[3].mxu0  ;;  %124 = vst.msk [vmem:[#allocation2] sm:$0x3] %vm123_vm3, %v118_v23 }
 0x216   :  { %174 = shalt.err (!%p171_p4)
}
 0x217   :  { %s175_s4 = scalar_lea.hbm %s255_s5, 32 }
 0x218   :  { %p176_p5 = scmp.ne.s32.totalorder %s255_s5, %s175_s4  ;;  %p179_p6 = scmp.lt.u32.totalorder %s175_s4, %s255_s5 }
 0x21a   :  { %p181_p7 = pnand %p179_p6, %p176_p5 }
 0x21c   :  { %184 = shalt.err (!%p181_p7)
}
 0x21d   :  { %134 = dma.vmem_to_hbm [thread:$0]  %s132_s29, 32, %s255_s5, [#allocation3]  }
 0x21e   :  { %185 = dma.done.wait [#allocation3], 32  }
 0x21f   :  { %186 = vsyncadd [#allocation3], 4294967264 }
 0x220   :  { %138 = vsyncpa [#allocation3], 1 }

</bundles_post_ra>
